<compile_context>
chip_gen: v5e
topology: v5e:2x2
jax: 0.10.0
libtpu: 0.0.40
codegen_flags: <defaults>
</compile_context>

<pallas_src>
import functools
import math

import jax
import jax.numpy as jnp
from jax.experimental import pallas as pl
from jax.experimental.pallas import tpu as pltpu

BN_EPS = 1e-5


# ----------------------------------------------------------------------------
# Trace-time helpers used inside the kernel (all indices are static Python ints)
# ----------------------------------------------------------------------------
def _elu(v):
    # ELU(alpha=1); exp lands on the EUP slot, rest is a single VPU select.
    return jnp.where(v > 0, v, jnp.exp(jnp.minimum(v, 0.0)) - 1.0)


def _stack_shifted(h, l_in, l_out, k, stride, pad, blk):
    """h: (Cin, l_in*blk) in (channel, length-block*batch) layout.
    Returns (k*Cin, l_out*blk) where row-group kk / length-block lo holds the
    input length-block li with lo == li*stride - pad + kk (zeros elsewhere),
    so a ConvTranspose1d becomes a single matmul with its (Cout, k*Cin) weight.
    Everything here is static slicing / concatenation."""
    cin = h.shape[0]
    groups = []
    for kk in range(k):
        if stride == 1:
            shift = kk - pad                                   # lo = li + shift
            lo_start = max(0, shift)
            lo_end = min(l_out, l_in + shift)
            parts = []
            if lo_start > 0:
                parts.append(jnp.zeros((cin, lo_start * blk), h.dtype))
            parts.append(h[:, (lo_start - shift) * blk:(lo_end - shift) * blk])
            if lo_end < l_out:
                parts.append(jnp.zeros((cin, (l_out - lo_end) * blk), h.dtype))
            groups.append(parts[0] if len(parts) == 1
                          else jnp.concatenate(parts, axis=1))
        else:
            zero_blk = jnp.zeros((cin, blk), h.dtype)
            blocks = []
            for lo in range(l_out):
                num = lo + pad - kk
                li = num // stride
                if num % stride == 0 and 0 <= li < l_in:
                    blocks.append(h[:, li * blk:(li + 1) * blk])
                else:
                    blocks.append(zero_blk)
            groups.append(jnp.concatenate(blocks, axis=1))
    return jnp.concatenate(groups, axis=0)


# ----------------------------------------------------------------------------
# Pallas kernel: entire ConvDecoder1D forward, fully fused.
# ----------------------------------------------------------------------------
def _decoder_kernel(x_ref, w_ref, p_ref, o_ref, *, cfg, inv_lam, apply_f):
    npad = cfg["npad"]
    k = cfg["k"]

    def wsl(off, rows, width):                       # bf16 weight tile
        return w_ref[0:rows, off:off + width]

    def col(j, rows):                                # f32 (rows, 1) column
        return p_ref[0:rows, j:j + 1]

    def mm(w16, h):                                  # bf16 x bf16 -> f32 on MXU
        return jnp.dot(w16, h.astype(jnp.bfloat16),
                       preferred_element_type=jnp.float32)

    # fc1_t -> ELU -> BatchNorm(fc1b_t)                       h: (64, npad)
    h = mm(wsl(cfg["w1_off"], 64, cfg["enc"]), x_ref[...]) + col(cfg["b1"], 64)
    h = _elu(h)
    h = h * col(cfg["s1"], 64) + col(cfg["t1"], 64)

    # fc2_t -> ELU -> reshape(N,64,L0) -> BatchNorm(conv1b_t)  h: (64, L0*npad)
    l0 = cfg["l0"]
    pieces = [mm(wsl(cfg["w2_off"] + l * 64, 64, 64), h) + col(cfg["b2_0"] + l, 64)
              for l in range(l0)]
    h = _elu(jnp.concatenate(pieces, axis=1))
    h = h * col(cfg["s2"], 64) + col(cfg["t2"], 64)

    # Four ConvTranspose1d layers: one compact matmul each.
    length = l0
    for (w_off, cin, cout, stride, pad, l_out,
         b_col, s_col, t_col, has_act) in cfg["convs"]:
        xs = _stack_shifted(h, length, l_out, k, stride, pad, npad)
        h = mm(wsl(w_off, cout, k * cin), xs) + col(b_col, cout)
        if has_act:                                  # ELU + following BatchNorm
            h = _elu(h)
            h = h * col(s_col, cout) + col(t_col, cout)
        length = l_out

    # AdaptiveAvgPool1d(l_final) over length blocks           h: (1, length*npad)
    l_final = cfg["l_final"]
    outs = []
    for i in range(l_final):
        s = (i * length) // l_final
        e = -(-((i + 1) * length) // l_final)
        acc = h[:, s * npad:(s + 1) * npad]
        for l in range(s + 1, e):
            acc = acc + h[:, l * npad:(l + 1) * npad]
        outs.append(acc * (1.0 / (e - s)))
    d = jnp.concatenate(outs, axis=1)                # (1, l_final*npad) = (1,128)

    if apply_f:
        d = jnp.tanh(d * inv_lam)                    # f(dec / lam)
    o_ref[...] = d


def conv_decoder1d_forward(w_buf, p_buf, x, *, cfg, lam=1.0, apply_f=True):
    batch = x.shape[0]
    npad = cfg["npad"]
    assert batch <= npad, "increase npad (or add a batch grid) for larger batches"
    l_final = cfg["l_final"]
    # Pad batch to 8 sublanes, transpose to the (enc, npad) kernel layout.
    x_pad = jnp.zeros((npad, cfg["enc"]), jnp.float32).at[:batch].set(
        x.astype(jnp.float32))
    xt = x_pad.T
    kernel = functools.partial(_decoder_kernel, cfg=cfg,
                               inv_lam=1.0 / lam, apply_f=apply_f)
    vmem = pl.BlockSpec(memory_space=pltpu.MemorySpace.VMEM)
    out = pl.pallas_call(
        kernel,
        out_shape=jax.ShapeDtypeStruct((1, l_final * npad), jnp.float32),
        in_specs=[vmem, vmem, vmem],
        out_specs=vmem,
    )(xt, w_buf, p_buf)
    dec = out.reshape(l_final, npad).T[:batch]       # (batch, l_final)
    return dec.reshape(batch, 1, l_final)            # (N, 1, 16), like the module


# ----------------------------------------------------------------------------
# One-time parameter preparation (runs OUTSIDE the jitted forward).
# ----------------------------------------------------------------------------
def bn_scale_shift(gamma, beta, rmean, rvar):
    scale = gamma / jnp.sqrt(rvar + BN_EPS)
    return scale, beta - rmean * scale


def _tstride_pad(l_in_conf, l_out_conf, k):
    # Reproduces the stride/padding search in ConvDecoder1D.__init__.
    stride = 1
    p = math.floor(((l_in_conf - 1) * stride + k - l_out_conf) / 2)
    while p < 0:
        stride += 1
        p = math.floor(((l_in_conf - 1) * stride + k - l_out_conf) / 2)
    return stride, int(p)


def prepare_decoder_params(raw, conv_shape_list, *, npad=8):
    """Pack all matmul weights into a single bf16 buffer (128-aligned columns)
    and all biases / eval-mode BN affines into a single f32 buffer, plus the
    static layer config."""
    cs = [int(c) for c in conv_shape_list]
    k = 3
    fc1_w, fc1_b = raw['fc1_t']
    fc2_w, fc2_b = raw['fc2_t']
    enc = int(fc1_w.shape[1])
    l0 = cs[-1]

    # Compact matmul weights: rows = Cout, cols = contraction dim.
    mats = [fc1_w.astype(jnp.float32),                          # (64, enc)
            fc2_w.astype(jnp.float32).reshape(64, l0 * 64)]     # [c, l*64 + j]
    conv_defs = [('conv1_t', cs[-1], cs[-2]), ('conv2_t', cs[-2], cs[-3]),
                 ('conv3_t', cs[-3], cs[-4]), ('conv4_t', cs[-4], cs[-5])]
    conv_meta = []
    length = l0
    for name, lin_conf, lout_conf in conv_defs:
        w, _ = raw[name]
        cin, cout = int(w.shape[0]), int(w.shape[1])
        stride, pad = _tstride_pad(lin_conf, lout_conf, k)
        l_out = (length - 1) * stride - 2 * pad + k    # actual (PyTorch) length
        mats.append(jnp.transpose(w.astype(jnp.float32), (1, 2, 0))
                    .reshape(cout, k * cin))           # [co, kk*cin + ci]
        conv_meta.append((name, cin, cout, stride, pad, l_out))
        length = l_out

    offs, total = [], 0
    for m in mats:
        offs.append(total)
        total += -(-int(m.shape[1]) // 128) * 128
    wbuf = jnp.zeros((64, total), jnp.float32)
    for m, off in zip(mats, offs):
        wbuf = wbuf.at[:m.shape[0], off:off + m.shape[1]].set(m)
    wbuf = wbuf.astype(jnp.bfloat16)    # halves weight DMA; MXU operands in bf16

    # Small-params buffer: one f32 column per bias / BN scale / BN shift.
    cols, cidx = [], {}

    def add_col(name, v):
        v = jnp.asarray(v, jnp.float32).reshape(-1)
        cidx[name] = len(cols)
        cols.append(jnp.zeros((64,), jnp.float32).at[:v.shape[0]].set(v))

    add_col('b1', fc1_b)
    s, t = bn_scale_shift(*raw['fc1b_t']);   add_col('s1', s); add_col('t1', t)
    b2_mat = fc2_b.astype(jnp.float32).reshape(64, l0)
    for l in range(l0):
        add_col(f'b2_{l}', b2_mat[:, l])
    s, t = bn_scale_shift(*raw['conv1b_t']); add_col('s2', s); add_col('t2', t)

    bn_after = ['conv2b_t', 'conv3b_t', 'conv4b_t', None]
    conv_cfg = []
    for i, ((name, cin, cout, stride, pad, l_out), bn_name) in enumerate(
            zip(conv_meta, bn_after)):
        add_col(f'b{i + 3}', raw[name][1])
        if bn_name is not None:
            s, t = bn_scale_shift(*raw[bn_name])
            add_col(f's{i + 3}', s); add_col(f't{i + 3}', t)
            conv_cfg.append((offs[2 + i], cin, cout, stride, pad, l_out,
                             cidx[f'b{i + 3}'], cidx[f's{i + 3}'],
                             cidx[f't{i + 3}'], True))
        else:
            conv_cfg.append((offs[2 + i], cin, cout, stride, pad, l_out,
                             cidx[f'b{i + 3}'], 0, 0, False))

    pbuf = jnp.stack(cols, axis=1)
    pad_cols = (-pbuf.shape[1]) % 8
    if pad_cols:
        pbuf = jnp.pad(pbuf, ((0, 0), (0, pad_cols)))

    cfg = dict(enc=enc, npad=int(npad), l0=l0, l_final=cs[-5], k=k,
               w1_off=offs[0], w2_off=offs[1],
               b1=cidx['b1'], s1=cidx['s1'], t1=cidx['t1'],
               b2_0=cidx['b2_0'], s2=cidx['s2'], t2=cidx['t2'],
               convs=tuple(conv_cfg))
    return wbuf, pbuf, cfg


# ----------------------------------------------------------------------------
# Pure-JAX f32 mirror of the PyTorch module (for numerical parity checking).
# ----------------------------------------------------------------------------
def reference_forward(raw, x, *, conv_shape, lam=1.0, apply_f=True):
    cs = [int(c) for c in conv_shape]
    k = 3

    def elu(v):
        return jnp.where(v > 0, v, jnp.expm1(jnp.minimum(v, 0.0)))

    def bn(h, params):
        gamma, beta, mean, var = params
        scale = gamma / jnp.sqrt(var + BN_EPS)
        shift = beta - mean * scale
        if h.ndim == 3:
            return h * scale[None, :, None] + shift[None, :, None]
        return h * scale[None, :] + shift[None, :]

    def linear(h, wb):
        w, b = wb
        return h @ w.T + b[None, :]

    def conv_t(h, wb, stride, pad):
        w, b = wb
        n, cin, lin = h.shape
        cout = w.shape[1]
        lout = (lin - 1) * stride - 2 * pad + k
        out = jnp.zeros((n, cout, lout), jnp.float32)
        for kk in range(k):
            for li in range(lin):
                lo = li * stride - pad + kk
                if 0 <= lo < lout:
                    out = out.at[:, :, lo].add(h[:, :, li] @ w[:, :, kk])
        return out + b[None, :, None]

    def adapool(h, lout):
        lin = h.shape[-1]
        return jnp.concatenate(
            [h[..., (i * lin) // lout: -(-((i + 1) * lin) // lout)]
             .mean(axis=-1, keepdims=True) for i in range(lout)], axis=-1)

    sp = [_tstride_pad(cs[-1], cs[-2], k), _tstride_pad(cs[-2], cs[-3], k),
          _tstride_pad(cs[-3], cs[-4], k), _tstride_pad(cs[-4], cs[-5], k)]

    h = bn(elu(linear(x, raw['fc1_t'])), raw['fc1b_t'])
    h = elu(linear(h, raw['fc2_t']))
    dec = bn(h.reshape(h.shape[0], 64, -1), raw['conv1b_t'])
    dec = bn(elu(conv_t(dec, raw['conv1_t'], *sp[0])), raw['conv2b_t'])
    dec = bn(elu(conv_t(dec, raw['conv2_t'], *sp[1])), raw['conv3b_t'])
    dec = bn(elu(conv_t(dec, raw['conv3_t'], *sp[2])), raw['conv4b_t'])
    dec = conv_t(dec, raw['conv4_t'], *sp[3])
    dec = adapool(dec, cs[-5])
    if apply_f:
        dec = jnp.tanh(dec / lam)
    return dec


# ----------------------------------------------------------------------------
# Deterministic raw parameter initialization (module __init__ shapes).
# ----------------------------------------------------------------------------
def init_raw_params(key, encoded_dimension, conv_shape_list):
    kit = iter(jax.random.split(key, 64))

    def nrm(shape, scale=0.1):
        return scale * jax.random.normal(next(kit), shape, dtype=jnp.float32)

    def lin(out_f, in_f):
        return (nrm((out_f, in_f)), nrm((out_f,)))

    def conv_t(in_c, out_c, ksz=3):
        return (nrm((in_c, out_c, ksz)), nrm((out_c,)))

    def bn(n):
        return (1.0 + nrm((n,)), nrm((n,)), nrm((n,)), 1.0 + jnp.abs(nrm((n,))))

    l0 = int(conv_shape_list[-1])
    return {
        'fc1_t': lin(64, encoded_dimension), 'fc1b_t': bn(64),
        'fc2_t': lin(64 * l0, 64),           'conv1b_t': bn(64),
        'conv1_t': conv_t(64, 64),           'conv2b_t': bn(64),
        'conv2_t': conv_t(64, 32),           'conv3b_t': bn(32),
        'conv3_t': conv_t(32, 16),           'conv4b_t': bn(16),
        'conv4_t': conv_t(16, 1),
    }


if __name__ == "__main__":
    key = jax.random.PRNGKey(0)
    kp, kx = jax.random.split(key)

    conv_shape_list = [16, 14, 14, 7, 7]   # 1D conv shapes for conv_shape=16
    encoded_dim = 4
    lam = 1.0
    batch = 2

    raw = init_raw_params(kp, encoded_dim, conv_shape_list)
    w_buf, p_buf, cfg = prepare_decoder_params(raw, conv_shape_list)  # one-time prep

    x = jax.random.normal(kx, (batch, encoded_dim), dtype=jnp.float32)

    fwd = jax.jit(functools.partial(conv_decoder1d_forward,
                                    cfg=cfg, lam=lam, apply_f=True))
    dec = fwd(w_buf, p_buf, x)
    jax.block_until_ready(dec)

    assert dec.shape == (batch, 1, conv_shape_list[-5])
    assert bool(jnp.all(jnp.isfinite(dec)))
    assert bool(jnp.all(jnp.abs(dec) <= 1.0))      # tanh output range

    # Numerical parity vs the f32 pure-JAX mirror of the PyTorch module.
    # (Loose tolerance: the kernel uses bf16 MXU operands per the perf review.)
    ref = reference_forward(raw, x, conv_shape=tuple(conv_shape_list),
                            lam=lam, apply_f=True)
    assert ref.shape == dec.shape
    assert float(jnp.max(jnp.abs(dec - ref))) < 0.1

    print("KERNEL_OK")
</pallas_src>

<mosaic_0001>
module attributes {stable_mosaic.version = 11 : i64} {
  func.func @_decoder_kernel(%arg0: memref<4x8xf32, #tpu.memory_space<vmem>>, %arg1: memref<64x1408xbf16, #tpu.memory_space<vmem>>, %arg2: memref<64x24xf32, #tpu.memory_space<vmem>>, %arg3: memref<1x128xf32, #tpu.memory_space<vmem>>) attributes {dimension_semantics = [], scalar_prefetch = 0 : i64, scratch_operands = 0 : i64, tpu.core_type = #tpu.core_type<tc>} {
    %c0 = arith.constant 0 : index
    %c0_0 = arith.constant 0 : index
    %0 = vector.load %arg1[%c0, %c0_0] : memref<64x1408xbf16, #tpu.memory_space<vmem>>, vector<64x4xbf16>
    %c0_1 = arith.constant 0 : index
    %c0_2 = arith.constant 0 : index
    %1 = vector.load %arg0[%c0_1, %c0_2] : memref<4x8xf32, #tpu.memory_space<vmem>>, vector<4x8xf32>
    %2 = arith.truncf %1 : vector<4x8xf32> to vector<4x8xbf16>
    %cst = arith.constant dense<0.000000e+00> : vector<64x8xf32>
    %3 = tpu.matmul %0, %2, %cst {dimension_numbers = #tpu.dot_dimension_numbers<[1], [0], [0], [1], [0, 0, 1, 1], [], []>} : vector<64x4xbf16>, vector<4x8xbf16>, vector<64x8xf32> -> vector<64x8xf32>
    %c0_3 = arith.constant 0 : index
    %c0_4 = arith.constant 0 : index
    %4 = vector.load %arg2[%c0_3, %c0_4] : memref<64x24xf32, #tpu.memory_space<vmem>>, vector<64x1xf32>
    %5 = vector.broadcast %4 : vector<64x1xf32> to vector<64x8xf32>
    %6 = arith.addf %3, %5 : vector<64x8xf32>
    %cst_5 = arith.constant 0.000000e+00 : f32
    %7 = vector.broadcast %cst_5 : f32 to vector<64x8xf32>
    %8 = arith.cmpf ogt, %6, %7 : vector<64x8xf32>
    %cst_6 = arith.constant 0.000000e+00 : f32
    %9 = vector.broadcast %cst_6 : f32 to vector<64x8xf32>
    %10 = arith.minimumf %6, %9 : vector<64x8xf32>
    %11 = math.exp %10 : vector<64x8xf32>
    %cst_7 = arith.constant 1.000000e+00 : f32
    %12 = vector.broadcast %cst_7 : f32 to vector<64x8xf32>
    %13 = arith.subf %11, %12 : vector<64x8xf32>
    %14 = arith.select %8, %6, %13 : vector<64x8xi1>, vector<64x8xf32>
    %c0_8 = arith.constant 0 : index
    %c1 = arith.constant 1 : index
    %15 = vector.load %arg2[%c0_8, %c1] : memref<64x24xf32, #tpu.memory_space<vmem>>, vector<64x1xf32>
    %16 = vector.broadcast %15 : vector<64x1xf32> to vector<64x8xf32>
    %17 = arith.mulf %14, %16 : vector<64x8xf32>
    %c0_9 = arith.constant 0 : index
    %c2 = arith.constant 2 : index
    %18 = vector.load %arg2[%c0_9, %c2] : memref<64x24xf32, #tpu.memory_space<vmem>>, vector<64x1xf32>
    %19 = vector.broadcast %18 : vector<64x1xf32> to vector<64x8xf32>
    %20 = arith.addf %17, %19 : vector<64x8xf32>
    %c0_10 = arith.constant 0 : index
    %c128 = arith.constant 128 : index
    %21 = vector.load %arg1[%c0_10, %c128] : memref<64x1408xbf16, #tpu.memory_space<vmem>>, vector<64x64xbf16>
    %22 = arith.truncf %20 : vector<64x8xf32> to vector<64x8xbf16>
    %cst_11 = arith.constant dense<0.000000e+00> : vector<64x8xf32>
    %23 = tpu.matmul %21, %22, %cst_11 {dimension_numbers = #tpu.dot_dimension_numbers<[1], [0], [0], [1], [0, 0, 1, 1], [], []>} : vector<64x64xbf16>, vector<64x8xbf16>, vector<64x8xf32> -> vector<64x8xf32>
    %c0_12 = arith.constant 0 : index
    %c3 = arith.constant 3 : index
    %24 = vector.load %arg2[%c0_12, %c3] : memref<64x24xf32, #tpu.memory_space<vmem>>, vector<64x1xf32>
    %25 = vector.broadcast %24 : vector<64x1xf32> to vector<64x8xf32>
    %26 = arith.addf %23, %25 : vector<64x8xf32>
    %c0_13 = arith.constant 0 : index
    %c192 = arith.constant 192 : index
    %27 = vector.load %arg1[%c0_13, %c192] : memref<64x1408xbf16, #tpu.memory_space<vmem>>, vector<64x64xbf16>
    %28 = arith.truncf %20 : vector<64x8xf32> to vector<64x8xbf16>
    %cst_14 = arith.constant dense<0.000000e+00> : vector<64x8xf32>
    %29 = tpu.matmul %27, %28, %cst_14 {dimension_numbers = #tpu.dot_dimension_numbers<[1], [0], [0], [1], [0, 0, 1, 1], [], []>} : vector<64x64xbf16>, vector<64x8xbf16>, vector<64x8xf32> -> vector<64x8xf32>
    %c0_15 = arith.constant 0 : index
    %c4 = arith.constant 4 : index
    %30 = vector.load %arg2[%c0_15, %c4] : memref<64x24xf32, #tpu.memory_space<vmem>>, vector<64x1xf32>
    %31 = vector.broadcast %30 : vector<64x1xf32> to vector<64x8xf32>
    %32 = arith.addf %29, %31 : vector<64x8xf32>
    %c0_16 = arith.constant 0 : index
    %c256 = arith.constant 256 : index
    %33 = vector.load %arg1[%c0_16, %c256] : memref<64x1408xbf16, #tpu.memory_space<vmem>>, vector<64x64xbf16>
    %34 = arith.truncf %20 : vector<64x8xf32> to vector<64x8xbf16>
    %cst_17 = arith.constant dense<0.000000e+00> : vector<64x8xf32>
    %35 = tpu.matmul %33, %34, %cst_17 {dimension_numbers = #tpu.dot_dimension_numbers<[1], [0], [0], [1], [0, 0, 1, 1], [], []>} : vector<64x64xbf16>, vector<64x8xbf16>, vector<64x8xf32> -> vector<64x8xf32>
    %c0_18 = arith.constant 0 : index
    %c5 = arith.constant 5 : index
    %36 = vector.load %arg2[%c0_18, %c5] : memref<64x24xf32, #tpu.memory_space<vmem>>, vector<64x1xf32>
    %37 = vector.broadcast %36 : vector<64x1xf32> to vector<64x8xf32>
    %38 = arith.addf %35, %37 : vector<64x8xf32>
    %c0_19 = arith.constant 0 : index
    %c320 = arith.constant 320 : index
    %39 = vector.load %arg1[%c0_19, %c320] : memref<64x1408xbf16, #tpu.memory_space<vmem>>, vector<64x64xbf16>
    %40 = arith.truncf %20 : vector<64x8xf32> to vector<64x8xbf16>
    %cst_20 = arith.constant dense<0.000000e+00> : vector<64x8xf32>
    %41 = tpu.matmul %39, %40, %cst_20 {dimension_numbers = #tpu.dot_dimension_numbers<[1], [0], [0], [1], [0, 0, 1, 1], [], []>} : vector<64x64xbf16>, vector<64x8xbf16>, vector<64x8xf32> -> vector<64x8xf32>
    %c0_21 = arith.constant 0 : index
    %c6 = arith.constant 6 : index
    %42 = vector.load %arg2[%c0_21, %c6] : memref<64x24xf32, #tpu.memory_space<vmem>>, vector<64x1xf32>
    %43 = vector.broadcast %42 : vector<64x1xf32> to vector<64x8xf32>
    %44 = arith.addf %41, %43 : vector<64x8xf32>
    %c0_22 = arith.constant 0 : index
    %c384 = arith.constant 384 : index
    %45 = vector.load %arg1[%c0_22, %c384] : memref<64x1408xbf16, #tpu.memory_space<vmem>>, vector<64x64xbf16>
    %46 = arith.truncf %20 : vector<64x8xf32> to vector<64x8xbf16>
    %cst_23 = arith.constant dense<0.000000e+00> : vector<64x8xf32>
    %47 = tpu.matmul %45, %46, %cst_23 {dimension_numbers = #tpu.dot_dimension_numbers<[1], [0], [0], [1], [0, 0, 1, 1], [], []>} : vector<64x64xbf16>, vector<64x8xbf16>, vector<64x8xf32> -> vector<64x8xf32>
    %c0_24 = arith.constant 0 : index
    %c7 = arith.constant 7 : index
    %48 = vector.load %arg2[%c0_24, %c7] : memref<64x24xf32, #tpu.memory_space<vmem>>, vector<64x1xf32>
    %49 = vector.broadcast %48 : vector<64x1xf32> to vector<64x8xf32>
    %50 = arith.addf %47, %49 : vector<64x8xf32>
    %c0_25 = arith.constant 0 : index
    %c448 = arith.constant 448 : index
    %51 = vector.load %arg1[%c0_25, %c448] : memref<64x1408xbf16, #tpu.memory_space<vmem>>, vector<64x64xbf16>
    %52 = arith.truncf %20 : vector<64x8xf32> to vector<64x8xbf16>
    %cst_26 = arith.constant dense<0.000000e+00> : vector<64x8xf32>
    %53 = tpu.matmul %51, %52, %cst_26 {dimension_numbers = #tpu.dot_dimension_numbers<[1], [0], [0], [1], [0, 0, 1, 1], [], []>} : vector<64x64xbf16>, vector<64x8xbf16>, vector<64x8xf32> -> vector<64x8xf32>
    %c0_27 = arith.constant 0 : index
    %c8 = arith.constant 8 : index
    %54 = vector.load %arg2[%c0_27, %c8] : memref<64x24xf32, #tpu.memory_space<vmem>>, vector<64x1xf32>
    %55 = vector.broadcast %54 : vector<64x1xf32> to vector<64x8xf32>
    %56 = arith.addf %53, %55 : vector<64x8xf32>
    %c0_28 = arith.constant 0 : index
    %c512 = arith.constant 512 : index
    %57 = vector.load %arg1[%c0_28, %c512] : memref<64x1408xbf16, #tpu.memory_space<vmem>>, vector<64x64xbf16>
    %58 = arith.truncf %20 : vector<64x8xf32> to vector<64x8xbf16>
    %cst_29 = arith.constant dense<0.000000e+00> : vector<64x8xf32>
    %59 = tpu.matmul %57, %58, %cst_29 {dimension_numbers = #tpu.dot_dimension_numbers<[1], [0], [0], [1], [0, 0, 1, 1], [], []>} : vector<64x64xbf16>, vector<64x8xbf16>, vector<64x8xf32> -> vector<64x8xf32>
    %c0_30 = arith.constant 0 : index
    %c9 = arith.constant 9 : index
    %60 = vector.load %arg2[%c0_30, %c9] : memref<64x24xf32, #tpu.memory_space<vmem>>, vector<64x1xf32>
    %61 = vector.broadcast %60 : vector<64x1xf32> to vector<64x8xf32>
    %62 = arith.addf %59, %61 : vector<64x8xf32>
    %63 = tpu.concatenate %26, %32, %38, %44, %50, %56, %62 in 1 : vector<64x8xf32>, vector<64x8xf32>, vector<64x8xf32>, vector<64x8xf32>, vector<64x8xf32>, vector<64x8xf32>, vector<64x8xf32> -> vector<64x56xf32>
    %cst_31 = arith.constant 0.000000e+00 : f32
    %64 = vector.broadcast %cst_31 : f32 to vector<64x56xf32>
    %65 = arith.cmpf ogt, %63, %64 : vector<64x56xf32>
    %cst_32 = arith.constant 0.000000e+00 : f32
    %66 = vector.broadcast %cst_32 : f32 to vector<64x56xf32>
    %67 = arith.minimumf %63, %66 : vector<64x56xf32>
    %68 = math.exp %67 : vector<64x56xf32>
    %cst_33 = arith.constant 1.000000e+00 : f32
    %69 = vector.broadcast %cst_33 : f32 to vector<64x56xf32>
    %70 = arith.subf %68, %69 : vector<64x56xf32>
    %71 = arith.select %65, %63, %70 : vector<64x56xi1>, vector<64x56xf32>
    %c0_34 = arith.constant 0 : index
    %c10 = arith.constant 10 : index
    %72 = vector.load %arg2[%c0_34, %c10] : memref<64x24xf32, #tpu.memory_space<vmem>>, vector<64x1xf32>
    %73 = vector.broadcast %72 : vector<64x1xf32> to vector<64x56xf32>
    %74 = arith.mulf %71, %73 : vector<64x56xf32>
    %c0_35 = arith.constant 0 : index
    %c11 = arith.constant 11 : index
    %75 = vector.load %arg2[%c0_35, %c11] : memref<64x24xf32, #tpu.memory_space<vmem>>, vector<64x1xf32>
    %76 = vector.broadcast %75 : vector<64x1xf32> to vector<64x56xf32>
    %77 = arith.addf %74, %76 : vector<64x56xf32>
    %78 = vector.extract_strided_slice %77 {offsets = [0, 8], sizes = [64, 48], strides = [1, 1]} : vector<64x56xf32> to vector<64x48xf32>
    %cst_36 = arith.constant 0.000000e+00 : f32
    %79 = vector.broadcast %cst_36 : f32 to vector<64x8xf32>
    %80 = tpu.concatenate %78, %79 in 1 : vector<64x48xf32>, vector<64x8xf32> -> vector<64x56xf32>
    %cst_37 = arith.constant 0.000000e+00 : f32
    %81 = vector.broadcast %cst_37 : f32 to vector<64x8xf32>
    %82 = vector.extract_strided_slice %77 {offsets = [0, 0], sizes = [64, 48], strides = [1, 1]} : vector<64x56xf32> to vector<64x48xf32>
    %83 = tpu.concatenate %81, %82 in 1 : vector<64x8xf32>, vector<64x48xf32> -> vector<64x56xf32>
    %84 = tpu.concatenate %80, %77, %83 in 0 : vector<64x56xf32>, vector<64x56xf32>, vector<64x56xf32> -> vector<192x56xf32>
    %c0_38 = arith.constant 0 : index
    %c640 = arith.constant 640 : index
    %85 = vector.load %arg1[%c0_38, %c640] : memref<64x1408xbf16, #tpu.memory_space<vmem>>, vector<64x192xbf16>
    %86 = arith.truncf %84 : vector<192x56xf32> to vector<192x56xbf16>
    %cst_39 = arith.constant dense<0.000000e+00> : vector<64x56xf32>
    %87 = tpu.matmul %85, %86, %cst_39 {dimension_numbers = #tpu.dot_dimension_numbers<[1], [0], [0], [1], [0, 0, 1, 1], [], []>} : vector<64x192xbf16>, vector<192x56xbf16>, vector<64x56xf32> -> vector<64x56xf32>
    %c0_40 = arith.constant 0 : index
    %c12 = arith.constant 12 : index
    %88 = vector.load %arg2[%c0_40, %c12] : memref<64x24xf32, #tpu.memory_space<vmem>>, vector<64x1xf32>
    %89 = vector.broadcast %88 : vector<64x1xf32> to vector<64x56xf32>
    %90 = arith.addf %87, %89 : vector<64x56xf32>
    %cst_41 = arith.constant 0.000000e+00 : f32
    %91 = vector.broadcast %cst_41 : f32 to vector<64x56xf32>
    %92 = arith.cmpf ogt, %90, %91 : vector<64x56xf32>
    %cst_42 = arith.constant 0.000000e+00 : f32
    %93 = vector.broadcast %cst_42 : f32 to vector<64x56xf32>
    %94 = arith.minimumf %90, %93 : vector<64x56xf32>
    %95 = math.exp %94 : vector<64x56xf32>
    %cst_43 = arith.constant 1.000000e+00 : f32
    %96 = vector.broadcast %cst_43 : f32 to vector<64x56xf32>
    %97 = arith.subf %95, %96 : vector<64x56xf32>
    %98 = arith.select %92, %90, %97 : vector<64x56xi1>, vector<64x56xf32>
    %c0_44 = arith.constant 0 : index
    %c13 = arith.constant 13 : index
    %99 = vector.load %arg2[%c0_44, %c13] : memref<64x24xf32, #tpu.memory_space<vmem>>, vector<64x1xf32>
    %100 = vector.broadcast %99 : vector<64x1xf32> to vector<64x56xf32>
    %101 = arith.mulf %98, %100 : vector<64x56xf32>
    %c0_45 = arith.constant 0 : index
    %c14 = arith.constant 14 : index
    %102 = vector.load %arg2[%c0_45, %c14] : memref<64x24xf32, #tpu.memory_space<vmem>>, vector<64x1xf32>
    %103 = vector.broadcast %102 : vector<64x1xf32> to vector<64x56xf32>
    %104 = arith.addf %101, %103 : vector<64x56xf32>
    %cst_46 = arith.constant 0.000000e+00 : f32
    %105 = vector.broadcast %cst_46 : f32 to vector<64x8xf32>
    %106 = vector.extract_strided_slice %104 {offsets = [0, 0], sizes = [64, 8], strides = [1, 1]} : vector<64x56xf32> to vector<64x8xf32>
    %107 = vector.extract_strided_slice %104 {offsets = [0, 8], sizes = [64, 8], strides = [1, 1]} : vector<64x56xf32> to vector<64x8xf32>
    %108 = vector.extract_strided_slice %104 {offsets = [0, 16], sizes = [64, 8], strides = [1, 1]} : vector<64x56xf32> to vector<64x8xf32>
    %109 = vector.extract_strided_slice %104 {offsets = [0, 24], sizes = [64, 8], strides = [1, 1]} : vector<64x56xf32> to vector<64x8xf32>
    %110 = vector.extract_strided_slice %104 {offsets = [0, 32], sizes = [64, 8], strides = [1, 1]} : vector<64x56xf32> to vector<64x8xf32>
    %111 = vector.extract_strided_slice %104 {offsets = [0, 40], sizes = [64, 8], strides = [1, 1]} : vector<64x56xf32> to vector<64x8xf32>
    %112 = vector.extract_strided_slice %104 {offsets = [0, 48], sizes = [64, 8], strides = [1, 1]} : vector<64x56xf32> to vector<64x8xf32>
    %113 = tpu.concatenate %106, %105, %107, %105, %108, %105, %109, %105, %110, %105, %111, %105, %112, %105, %105 in 1 : vector<64x8xf32>, vector<64x8xf32>, vector<64x8xf32>, vector<64x8xf32>, vector<64x8xf32>, vector<64x8xf32>, vector<64x8xf32>, vector<64x8xf32>, vector<64x8xf32>, vector<64x8xf32>, vector<64x8xf32>, vector<64x8xf32>, vector<64x8xf32>, vector<64x8xf32>, vector<64x8xf32> -> vector<64x120xf32>
    %cst_47 = arith.constant 0.000000e+00 : f32
    %114 = vector.broadcast %cst_47 : f32 to vector<64x8xf32>
    %115 = vector.extract_strided_slice %104 {offsets = [0, 0], sizes = [64, 8], strides = [1, 1]} : vector<64x56xf32> to vector<64x8xf32>
    %116 = vector.extract_strided_slice %104 {offsets = [0, 8], sizes = [64, 8], strides = [1, 1]} : vector<64x56xf32> to vector<64x8xf32>
    %117 = vector.extract_strided_slice %104 {offsets = [0, 16], sizes = [64, 8], strides = [1, 1]} : vector<64x56xf32> to vector<64x8xf32>
    %118 = vector.extract_strided_slice %104 {offsets = [0, 24], sizes = [64, 8], strides = [1, 1]} : vector<64x56xf32> to vector<64x8xf32>
    %119 = vector.extract_strided_slice %104 {offsets = [0, 32], sizes = [64, 8], strides = [1, 1]} : vector<64x56xf32> to vector<64x8xf32>
    %120 = vector.extract_strided_slice %104 {offsets = [0, 40], sizes = [64, 8], strides = [1, 1]} : vector<64x56xf32> to vector<64x8xf32>
    %121 = vector.extract_strided_slice %104 {offsets = [0, 48], sizes = [64, 8], strides = [1, 1]} : vector<64x56xf32> to vector<64x8xf32>
    %122 = tpu.concatenate %114, %115, %114, %116, %114, %117, %114, %118, %114, %119, %114, %120, %114, %121, %114 in 1 : vector<64x8xf32>, vector<64x8xf32>, vector<64x8xf32>, vector<64x8xf32>, vector<64x8xf32>, vector<64x8xf32>, vector<64x8xf32>, vector<64x8xf32>, vector<64x8xf32>, vector<64x8xf32>, vector<64x8xf32>, vector<64x8xf32>, vector<64x8xf32>, vector<64x8xf32>, vector<64x8xf32> -> vector<64x120xf32>
    %cst_48 = arith.constant 0.000000e+00 : f32
    %123 = vector.broadcast %cst_48 : f32 to vector<64x8xf32>
    %124 = vector.extract_strided_slice %104 {offsets = [0, 0], sizes = [64, 8], strides = [1, 1]} : vector<64x56xf32> to vector<64x8xf32>
    %125 = vector.extract_strided_slice %104 {offsets = [0, 8], sizes = [64, 8], strides = [1, 1]} : vector<64x56xf32> to vector<64x8xf32>
    %126 = vector.extract_strided_slice %104 {offsets = [0, 16], sizes = [64, 8], strides = [1, 1]} : vector<64x56xf32> to vector<64x8xf32>
    %127 = vector.extract_strided_slice %104 {offsets = [0, 24], sizes = [64, 8], strides = [1, 1]} : vector<64x56xf32> to vector<64x8xf32>
    %128 = vector.extract_strided_slice %104 {offsets = [0, 32], sizes = [64, 8], strides = [1, 1]} : vector<64x56xf32> to vector<64x8xf32>
    %129 = vector.extract_strided_slice %104 {offsets = [0, 40], sizes = [64, 8], strides = [1, 1]} : vector<64x56xf32> to vector<64x8xf32>
    %130 = vector.extract_strided_slice %104 {offsets = [0, 48], sizes = [64, 8], strides = [1, 1]} : vector<64x56xf32> to vector<64x8xf32>
    %131 = tpu.concatenate %123, %123, %124, %123, %125, %123, %126, %123, %127, %123, %128, %123, %129, %123, %130 in 1 : vector<64x8xf32>, vector<64x8xf32>, vector<64x8xf32>, vector<64x8xf32>, vector<64x8xf32>, vector<64x8xf32>, vector<64x8xf32>, vector<64x8xf32>, vector<64x8xf32>, vector<64x8xf32>, vector<64x8xf32>, vector<64x8xf32>, vector<64x8xf32>, vector<64x8xf32>, vector<64x8xf32> -> vector<64x120xf32>
    %132 = tpu.concatenate %113, %122, %131 in 0 : vector<64x120xf32>, vector<64x120xf32>, vector<64x120xf32> -> vector<192x120xf32>
    %c0_49 = arith.constant 0 : index
    %c896 = arith.constant 896 : index
    %133 = vector.load %arg1[%c0_49, %c896] : memref<64x1408xbf16, #tpu.memory_space<vmem>>, vector<32x192xbf16>
    %134 = arith.truncf %132 : vector<192x120xf32> to vector<192x120xbf16>
    %cst_50 = arith.constant dense<0.000000e+00> : vector<32x120xf32>
    %135 = tpu.matmul %133, %134, %cst_50 {dimension_numbers = #tpu.dot_dimension_numbers<[1], [0], [0], [1], [0, 0, 1, 1], [], []>} : vector<32x192xbf16>, vector<192x120xbf16>, vector<32x120xf32> -> vector<32x120xf32>
    %c0_51 = arith.constant 0 : index
    %c15 = arith.constant 15 : index
    %136 = vector.load %arg2[%c0_51, %c15] : memref<64x24xf32, #tpu.memory_space<vmem>>, vector<32x1xf32>
    %137 = vector.broadcast %136 : vector<32x1xf32> to vector<32x120xf32>
    %138 = arith.addf %135, %137 : vector<32x120xf32>
    %cst_52 = arith.constant 0.000000e+00 : f32
    %139 = vector.broadcast %cst_52 : f32 to vector<32x120xf32>
    %140 = arith.cmpf ogt, %138, %139 : vector<32x120xf32>
    %cst_53 = arith.constant 0.000000e+00 : f32
    %141 = vector.broadcast %cst_53 : f32 to vector<32x120xf32>
    %142 = arith.minimumf %138, %141 : vector<32x120xf32>
    %143 = math.exp %142 : vector<32x120xf32>
    %cst_54 = arith.constant 1.000000e+00 : f32
    %144 = vector.broadcast %cst_54 : f32 to vector<32x120xf32>
    %145 = arith.subf %143, %144 : vector<32x120xf32>
    %146 = arith.select %140, %138, %145 : vector<32x120xi1>, vector<32x120xf32>
    %c0_55 = arith.constant 0 : index
    %c16 = arith.constant 16 : index
    %147 = vector.load %arg2[%c0_55, %c16] : memref<64x24xf32, #tpu.memory_space<vmem>>, vector<32x1xf32>
    %148 = vector.broadcast %147 : vector<32x1xf32> to vector<32x120xf32>
    %149 = arith.mulf %146, %148 : vector<32x120xf32>
    %c0_56 = arith.constant 0 : index
    %c17 = arith.constant 17 : index
    %150 = vector.load %arg2[%c0_56, %c17] : memref<64x24xf32, #tpu.memory_space<vmem>>, vector<32x1xf32>
    %151 = vector.broadcast %150 : vector<32x1xf32> to vector<32x120xf32>
    %152 = arith.addf %149, %151 : vector<32x120xf32>
    %153 = vector.extract_strided_slice %152 {offsets = [0, 8], sizes = [32, 112], strides = [1, 1]} : vector<32x120xf32> to vector<32x112xf32>
    %cst_57 = arith.constant 0.000000e+00 : f32
    %154 = vector.broadcast %cst_57 : f32 to vector<32x8xf32>
    %155 = tpu.concatenate %153, %154 in 1 : vector<32x112xf32>, vector<32x8xf32> -> vector<32x120xf32>
    %cst_58 = arith.constant 0.000000e+00 : f32
    %156 = vector.broadcast %cst_58 : f32 to vector<32x8xf32>
    %157 = vector.extract_strided_slice %152 {offsets = [0, 0], sizes = [32, 112], strides = [1, 1]} : vector<32x120xf32> to vector<32x112xf32>
    %158 = tpu.concatenate %156, %157 in 1 : vector<32x8xf32>, vector<32x112xf32> -> vector<32x120xf32>
    %159 = tpu.concatenate %155, %152, %158 in 0 : vector<32x120xf32>, vector<32x120xf32>, vector<32x120xf32> -> vector<96x120xf32>
    %c0_59 = arith.constant 0 : index
    %c1152 = arith.constant 1152 : index
    %160 = vector.load %arg1[%c0_59, %c1152] : memref<64x1408xbf16, #tpu.memory_space<vmem>>, vector<16x96xbf16>
    %161 = arith.truncf %159 : vector<96x120xf32> to vector<96x120xbf16>
    %cst_60 = arith.constant dense<0.000000e+00> : vector<16x120xf32>
    %162 = tpu.matmul %160, %161, %cst_60 {dimension_numbers = #tpu.dot_dimension_numbers<[1], [0], [0], [1], [0, 0, 1, 1], [], []>} : vector<16x96xbf16>, vector<96x120xbf16>, vector<16x120xf32> -> vector<16x120xf32>
    %c0_61 = arith.constant 0 : index
    %c18 = arith.constant 18 : index
    %163 = vector.load %arg2[%c0_61, %c18] : memref<64x24xf32, #tpu.memory_space<vmem>>, vector<16x1xf32>
    %164 = vector.broadcast %163 : vector<16x1xf32> to vector<16x120xf32>
    %165 = arith.addf %162, %164 : vector<16x120xf32>
    %cst_62 = arith.constant 0.000000e+00 : f32
    %166 = vector.broadcast %cst_62 : f32 to vector<16x120xf32>
    %167 = arith.cmpf ogt, %165, %166 : vector<16x120xf32>
    %cst_63 = arith.constant 0.000000e+00 : f32
    %168 = vector.broadcast %cst_63 : f32 to vector<16x120xf32>
    %169 = arith.minimumf %165, %168 : vector<16x120xf32>
    %170 = math.exp %169 : vector<16x120xf32>
    %cst_64 = arith.constant 1.000000e+00 : f32
    %171 = vector.broadcast %cst_64 : f32 to vector<16x120xf32>
    %172 = arith.subf %170, %171 : vector<16x120xf32>
    %173 = arith.select %167, %165, %172 : vector<16x120xi1>, vector<16x120xf32>
    %c0_65 = arith.constant 0 : index
    %c19 = arith.constant 19 : index
    %174 = vector.load %arg2[%c0_65, %c19] : memref<64x24xf32, #tpu.memory_space<vmem>>, vector<16x1xf32>
    %175 = vector.broadcast %174 : vector<16x1xf32> to vector<16x120xf32>
    %176 = arith.mulf %173, %175 : vector<16x120xf32>
    %c0_66 = arith.constant 0 : index
    %c20 = arith.constant 20 : index
    %177 = vector.load %arg2[%c0_66, %c20] : memref<64x24xf32, #tpu.memory_space<vmem>>, vector<16x1xf32>
    %178 = vector.broadcast %177 : vector<16x1xf32> to vector<16x120xf32>
    %179 = arith.addf %176, %178 : vector<16x120xf32>
    %cst_67 = arith.constant 0.000000e+00 : f32
    %180 = vector.broadcast %cst_67 : f32 to vector<16x16xf32>
    %181 = tpu.concatenate %179, %180 in 1 : vector<16x120xf32>, vector<16x16xf32> -> vector<16x136xf32>
    %cst_68 = arith.constant 0.000000e+00 : f32
    %182 = vector.broadcast %cst_68 : f32 to vector<16x8xf32>
    %cst_69 = arith.constant 0.000000e+00 : f32
    %183 = vector.broadcast %cst_69 : f32 to vector<16x8xf32>
    %184 = tpu.concatenate %182, %179, %183 in 1 : vector<16x8xf32>, vector<16x120xf32>, vector<16x8xf32> -> vector<16x136xf32>
    %cst_70 = arith.constant 0.000000e+00 : f32
    %185 = vector.broadcast %cst_70 : f32 to vector<16x16xf32>
    %186 = tpu.concatenate %185, %179 in 1 : vector<16x16xf32>, vector<16x120xf32> -> vector<16x136xf32>
    %187 = tpu.concatenate %181, %184, %186 in 0 : vector<16x136xf32>, vector<16x136xf32>, vector<16x136xf32> -> vector<48x136xf32>
    %c0_71 = arith.constant 0 : index
    %c1280 = arith.constant 1280 : index
    %188 = vector.load %arg1[%c0_71, %c1280] : memref<64x1408xbf16, #tpu.memory_space<vmem>>, vector<1x48xbf16>
    %189 = arith.truncf %187 : vector<48x136xf32> to vector<48x136xbf16>
    %cst_72 = arith.constant dense<0.000000e+00> : vector<1x136xf32>
    %190 = tpu.matmul %188, %189, %cst_72 {dimension_numbers = #tpu.dot_dimension_numbers<[1], [0], [0], [1], [0, 0, 1, 1], [], []>} : vector<1x48xbf16>, vector<48x136xbf16>, vector<1x136xf32> -> vector<1x136xf32>
    %c0_73 = arith.constant 0 : index
    %c21 = arith.constant 21 : index
    %191 = vector.load %arg2[%c0_73, %c21] : memref<64x24xf32, #tpu.memory_space<vmem>>, vector<1x1xf32>
    %192 = vector.broadcast %191 : vector<1x1xf32> to vector<1x136xf32>
    %193 = arith.addf %190, %192 : vector<1x136xf32>
    %194 = vector.extract_strided_slice %193 {offsets = [0, 0], sizes = [1, 8], strides = [1, 1]} : vector<1x136xf32> to vector<1x8xf32>
    %195 = vector.extract_strided_slice %193 {offsets = [0, 8], sizes = [1, 8], strides = [1, 1]} : vector<1x136xf32> to vector<1x8xf32>
    %196 = arith.addf %194, %195 : vector<1x8xf32>
    %cst_74 = arith.constant 5.000000e-01 : f32
    %197 = vector.broadcast %cst_74 : f32 to vector<1x8xf32>
    %198 = arith.mulf %196, %197 : vector<1x8xf32>
    %199 = vector.extract_strided_slice %193 {offsets = [0, 8], sizes = [1, 8], strides = [1, 1]} : vector<1x136xf32> to vector<1x8xf32>
    %200 = vector.extract_strided_slice %193 {offsets = [0, 16], sizes = [1, 8], strides = [1, 1]} : vector<1x136xf32> to vector<1x8xf32>
    %201 = arith.addf %199, %200 : vector<1x8xf32>
    %cst_75 = arith.constant 5.000000e-01 : f32
    %202 = vector.broadcast %cst_75 : f32 to vector<1x8xf32>
    %203 = arith.mulf %201, %202 : vector<1x8xf32>
    %204 = vector.extract_strided_slice %193 {offsets = [0, 16], sizes = [1, 8], strides = [1, 1]} : vector<1x136xf32> to vector<1x8xf32>
    %205 = vector.extract_strided_slice %193 {offsets = [0, 24], sizes = [1, 8], strides = [1, 1]} : vector<1x136xf32> to vector<1x8xf32>
    %206 = arith.addf %204, %205 : vector<1x8xf32>
    %cst_76 = arith.constant 5.000000e-01 : f32
    %207 = vector.broadcast %cst_76 : f32 to vector<1x8xf32>
    %208 = arith.mulf %206, %207 : vector<1x8xf32>
    %209 = vector.extract_strided_slice %193 {offsets = [0, 24], sizes = [1, 8], strides = [1, 1]} : vector<1x136xf32> to vector<1x8xf32>
    %210 = vector.extract_strided_slice %193 {offsets = [0, 32], sizes = [1, 8], strides = [1, 1]} : vector<1x136xf32> to vector<1x8xf32>
    %211 = arith.addf %209, %210 : vector<1x8xf32>
    %cst_77 = arith.constant 5.000000e-01 : f32
    %212 = vector.broadcast %cst_77 : f32 to vector<1x8xf32>
    %213 = arith.mulf %211, %212 : vector<1x8xf32>
    %214 = vector.extract_strided_slice %193 {offsets = [0, 32], sizes = [1, 8], strides = [1, 1]} : vector<1x136xf32> to vector<1x8xf32>
    %215 = vector.extract_strided_slice %193 {offsets = [0, 40], sizes = [1, 8], strides = [1, 1]} : vector<1x136xf32> to vector<1x8xf32>
    %216 = arith.addf %214, %215 : vector<1x8xf32>
    %cst_78 = arith.constant 5.000000e-01 : f32
    %217 = vector.broadcast %cst_78 : f32 to vector<1x8xf32>
    %218 = arith.mulf %216, %217 : vector<1x8xf32>
    %219 = vector.extract_strided_slice %193 {offsets = [0, 40], sizes = [1, 8], strides = [1, 1]} : vector<1x136xf32> to vector<1x8xf32>
    %220 = vector.extract_strided_slice %193 {offsets = [0, 48], sizes = [1, 8], strides = [1, 1]} : vector<1x136xf32> to vector<1x8xf32>
    %221 = arith.addf %219, %220 : vector<1x8xf32>
    %cst_79 = arith.constant 5.000000e-01 : f32
    %222 = vector.broadcast %cst_79 : f32 to vector<1x8xf32>
    %223 = arith.mulf %221, %222 : vector<1x8xf32>
    %224 = vector.extract_strided_slice %193 {offsets = [0, 48], sizes = [1, 8], strides = [1, 1]} : vector<1x136xf32> to vector<1x8xf32>
    %225 = vector.extract_strided_slice %193 {offsets = [0, 56], sizes = [1, 8], strides = [1, 1]} : vector<1x136xf32> to vector<1x8xf32>
    %226 = arith.addf %224, %225 : vector<1x8xf32>
    %cst_80 = arith.constant 5.000000e-01 : f32
    %227 = vector.broadcast %cst_80 : f32 to vector<1x8xf32>
    %228 = arith.mulf %226, %227 : vector<1x8xf32>
    %229 = vector.extract_strided_slice %193 {offsets = [0, 56], sizes = [1, 8], strides = [1, 1]} : vector<1x136xf32> to vector<1x8xf32>
    %230 = vector.extract_strided_slice %193 {offsets = [0, 64], sizes = [1, 8], strides = [1, 1]} : vector<1x136xf32> to vector<1x8xf32>
    %231 = arith.addf %229, %230 : vector<1x8xf32>
    %cst_81 = arith.constant 5.000000e-01 : f32
    %232 = vector.broadcast %cst_81 : f32 to vector<1x8xf32>
    %233 = arith.mulf %231, %232 : vector<1x8xf32>
    %234 = vector.extract_strided_slice %193 {offsets = [0, 64], sizes = [1, 8], strides = [1, 1]} : vector<1x136xf32> to vector<1x8xf32>
    %235 = vector.extract_strided_slice %193 {offsets = [0, 72], sizes = [1, 8], strides = [1, 1]} : vector<1x136xf32> to vector<1x8xf32>
    %236 = arith.addf %234, %235 : vector<1x8xf32>
    %cst_82 = arith.constant 5.000000e-01 : f32
    %237 = vector.broadcast %cst_82 : f32 to vector<1x8xf32>
    %238 = arith.mulf %236, %237 : vector<1x8xf32>
    %239 = vector.extract_strided_slice %193 {offsets = [0, 72], sizes = [1, 8], strides = [1, 1]} : vector<1x136xf32> to vector<1x8xf32>
    %240 = vector.extract_strided_slice %193 {offsets = [0, 80], sizes = [1, 8], strides = [1, 1]} : vector<1x136xf32> to vector<1x8xf32>
    %241 = arith.addf %239, %240 : vector<1x8xf32>
    %cst_83 = arith.constant 5.000000e-01 : f32
    %242 = vector.broadcast %cst_83 : f32 to vector<1x8xf32>
    %243 = arith.mulf %241, %242 : vector<1x8xf32>
    %244 = vector.extract_strided_slice %193 {offsets = [0, 80], sizes = [1, 8], strides = [1, 1]} : vector<1x136xf32> to vector<1x8xf32>
    %245 = vector.extract_strided_slice %193 {offsets = [0, 88], sizes = [1, 8], strides = [1, 1]} : vector<1x136xf32> to vector<1x8xf32>
    %246 = arith.addf %244, %245 : vector<1x8xf32>
    %cst_84 = arith.constant 5.000000e-01 : f32
    %247 = vector.broadcast %cst_84 : f32 to vector<1x8xf32>
    %248 = arith.mulf %246, %247 : vector<1x8xf32>
    %249 = vector.extract_strided_slice %193 {offsets = [0, 88], sizes = [1, 8], strides = [1, 1]} : vector<1x136xf32> to vector<1x8xf32>
    %250 = vector.extract_strided_slice %193 {offsets = [0, 96], sizes = [1, 8], strides = [1, 1]} : vector<1x136xf32> to vector<1x8xf32>
    %251 = arith.addf %249, %250 : vector<1x8xf32>
    %cst_85 = arith.constant 5.000000e-01 : f32
    %252 = vector.broadcast %cst_85 : f32 to vector<1x8xf32>
    %253 = arith.mulf %251, %252 : vector<1x8xf32>
    %254 = vector.extract_strided_slice %193 {offsets = [0, 96], sizes = [1, 8], strides = [1, 1]} : vector<1x136xf32> to vector<1x8xf32>
    %255 = vector.extract_strided_slice %193 {offsets = [0, 104], sizes = [1, 8], strides = [1, 1]} : vector<1x136xf32> to vector<1x8xf32>
    %256 = arith.addf %254, %255 : vector<1x8xf32>
    %cst_86 = arith.constant 5.000000e-01 : f32
    %257 = vector.broadcast %cst_86 : f32 to vector<1x8xf32>
    %258 = arith.mulf %256, %257 : vector<1x8xf32>
    %259 = vector.extract_strided_slice %193 {offsets = [0, 104], sizes = [1, 8], strides = [1, 1]} : vector<1x136xf32> to vector<1x8xf32>
    %260 = vector.extract_strided_slice %193 {offsets = [0, 112], sizes = [1, 8], strides = [1, 1]} : vector<1x136xf32> to vector<1x8xf32>
    %261 = arith.addf %259, %260 : vector<1x8xf32>
    %cst_87 = arith.constant 5.000000e-01 : f32
    %262 = vector.broadcast %cst_87 : f32 to vector<1x8xf32>
    %263 = arith.mulf %261, %262 : vector<1x8xf32>
    %264 = vector.extract_strided_slice %193 {offsets = [0, 112], sizes = [1, 8], strides = [1, 1]} : vector<1x136xf32> to vector<1x8xf32>
    %265 = vector.extract_strided_slice %193 {offsets = [0, 120], sizes = [1, 8], strides = [1, 1]} : vector<1x136xf32> to vector<1x8xf32>
    %266 = arith.addf %264, %265 : vector<1x8xf32>
    %cst_88 = arith.constant 5.000000e-01 : f32
    %267 = vector.broadcast %cst_88 : f32 to vector<1x8xf32>
    %268 = arith.mulf %266, %267 : vector<1x8xf32>
    %269 = vector.extract_strided_slice %193 {offsets = [0, 120], sizes = [1, 8], strides = [1, 1]} : vector<1x136xf32> to vector<1x8xf32>
    %270 = vector.extract_strided_slice %193 {offsets = [0, 128], sizes = [1, 8], strides = [1, 1]} : vector<1x136xf32> to vector<1x8xf32>
    %271 = arith.addf %269, %270 : vector<1x8xf32>
    %cst_89 = arith.constant 5.000000e-01 : f32
    %272 = vector.broadcast %cst_89 : f32 to vector<1x8xf32>
    %273 = arith.mulf %271, %272 : vector<1x8xf32>
    %274 = tpu.concatenate %198, %203, %208, %213, %218, %223, %228, %233, %238, %243, %248, %253, %258, %263, %268, %273 in 1 : vector<1x8xf32>, vector<1x8xf32>, vector<1x8xf32>, vector<1x8xf32>, vector<1x8xf32>, vector<1x8xf32>, vector<1x8xf32>, vector<1x8xf32>, vector<1x8xf32>, vector<1x8xf32>, vector<1x8xf32>, vector<1x8xf32>, vector<1x8xf32>, vector<1x8xf32>, vector<1x8xf32>, vector<1x8xf32> -> vector<1x128xf32>
    %cst_90 = arith.constant 1.000000e+00 : f32
    %275 = vector.broadcast %cst_90 : f32 to vector<1x128xf32>
    %276 = arith.mulf %274, %275 : vector<1x128xf32>
    %277 = math.tanh %276 : vector<1x128xf32>
    %c0_91 = arith.constant 0 : index
    %c0_92 = arith.constant 0 : index
    %278 = vector.load %arg3[%c0_91, %c0_92] : memref<1x128xf32, #tpu.memory_space<vmem>>, vector<1x128xf32>
    tpu.vector_store %arg3[%c0_91, %c0_92], %277 {strides = array<i32>} : memref<1x128xf32, #tpu.memory_space<vmem>>, vector<1x128xf32>,
    return
  }
}

</mosaic_0001>

<bundles_post_ra>
// kernel: conv_decoder1d_forward.1
= control target key start
LH: loop header
LB: loop body
LE: loop exit
PB: predicated region body
PF: predicated region fallthrough
CT: control target
= control target key end

     0   :  { %8 = vsyncpa [#allocation3], 0  ;;  %s3360_s15 = smov [#allocation2]   ;;  %s3361_s17 = smov 704   ;;  %s4917_s0 = inlined_call_operand.vmem [shape: f32[4,8], index: 0, kind: input, shape index: {}]   ;;  %s4918_s1 = inlined_call_operand.hbm [shape: bf16[64,1408], index: 1, kind: input, shape index: {}]   ;;  %s4919_s2 = inlined_call_operand.vmem [shape: f32[64,24], index: 2, kind: input, shape index: {}]   ;;  %s4920_s3 = inlined_call_operand.vmem [shape: f32[1,128], index: 3, kind: output, shape index: {}]  }
   0x1   :  { %s15_s14 = sshll.u32 %s4918_s1, 4  ;;  %s17_s16 = sshll.u32 %s3360_s15, 4  ;;  %s16_s14 = int_to_ptr.hbm [resolvable:$true] %s15_s14  ;;  %s18_s16 = int_to_ptr.vmem [resolvable:$true] %s17_s16 }
   0x2   :  { %s3362_s18 = smov 44  }
   0x3   :  { %23 = dma.hbm_to_vmem [thread:$0]  %s16_s14, 5632, %s18_s16, [#allocation3], %s3361_s17, %s3361_s17, %s3362_s18  }
   0x4   :  { %3358 = dma.done.wait [#allocation3], 5632  }
   0x5   :  { %3359 = vsyncadd [#allocation3], 4294961664  ;;  %v3363_v0 = vmov 0   ;;  %v3421_v1 = vld [vmem:[%s4919_s2 + $0x20] sm:$0xff]  ;;  %v3426_v2 = vld [vmem:[%s4919_s2 + $0x10] sm:$0xff]  ;;  %vm122_vm0 = vcmask 1041408  }
   0x6   :  { %2931 = vset.pattern.permute.xlu2 %v3363_v0  ;;  %2930 = vset.pattern.permute.xlu1 %v3363_v0  ;;  %v3431_v3 = vld [vmem:[%s4919_s2 + $0x30] sm:$0xff]  ;;  %v39_v4 = vld [vmem:[%s4917_s0] sm:$0xf]  ;;  %v2861_v6 = vld [vmem:[#allocation2 + $0x28] sm:$0xf0]  ;;  %vm109_vm1 = vcmask 31744  }
   0x7   :  { %2929 = vset.pattern.permute.xlu0 %v3363_v0  ;;  %71 = vperm.xlu1 %2930, %v3421_v1   ;;  %v2575_v5 = vld [vmem:[#allocation2] sm:$0xf]  ;;  %v40_v7 = vpack.c.bf16 %v39_v4, %v39_v4  ;;  %v3442_v10 = vld [vmem:[%s4919_s2 + $0x28] sm:$0xff]  ;;  %v3447_v11 = vld [vmem:[%s4919_s2 + $0x18] sm:$0xff]  ;;  %v3364_v15 = vmov 1   ;;  %v3365_v19 = vmov 2  }
   0x8   :  { %61 = vperm.xlu2 %2931, %v3426_v2   ;;  %81 = vperm.xlu0 %2929, %v3431_v3   ;;  %v2576_v9 = vor.u32 %v2861_v6, %v2575_v5  ;;  %v3452_v12 = vld [vmem:[%s4919_s2 + $0x38] sm:$0xff]  ;;  %v3461_v13 = vld [vmem:[%s4919_s2 + $0x8] sm:$0xff]  ;;  %v3466_v14 = vld [vmem:[%s4919_s2] sm:$0xff]  ;;  %s3366_s8 = smov 64   ;;  %v4921_v33 = vmov 3   ;;  %v4927_v6 = vmov 4  }
   0x9   :  { %v124_v8 = vsel %vm122_vm0, %v40_v7, 0  ;;  %v2579_v16 = vld [vmem:[#allocation2 + $0x58] sm:$0xf]  ;;  %v2862_v17 = vld [vmem:[#allocation2 + $0x80] sm:$0xf0]  ;;  %vm347_vm10 = vcmask 523264  }
   0xa   :  { %133 = vmatpush.bf16.msra.mxu0 %v124_v8  ;;  %v2580_v18 = vor.u32 %v2862_v17, %v2579_v16  ;;  %v2583_v20 = vld [vmem:[#allocation2 + $0xb0] sm:$0xf]  ;;  %v2863_v21 = vld [vmem:[#allocation2 + $0xd8] sm:$0xf0]  ;;  %v2587_v23 = vld [vmem:[#allocation2 + $0x108] sm:$0xf] }
   0xb   :  { %v2584_v22 = vor.u32 %v2863_v21, %v2583_v20  ;;  %v2864_v24 = vld [vmem:[#allocation2 + $0x130] sm:$0xf0]  ;;  %v2603_v26 = vld [vmem:[#allocation2 + $0x4] sm:$0xf]  ;;  %v2865_v27 = vld [vmem:[#allocation2 + $0x2c] sm:$0xf0] }
   0xc   :  { %v2588_v25 = vor.u32 %v2864_v24, %v2587_v23  ;;  %v3488_v28 = vor.u32 %v2865_v27, %v2603_v26  ;;  %v2615_v29 = vld [vmem:[#allocation2 + $0x10c] sm:$0xf]  ;;  %v2868_v30 = vld [vmem:[#allocation2 + $0x134] sm:$0xf0]  ;;  %v2611_v31 = vld [vmem:[#allocation2 + $0xb4] sm:$0xf] }
   0xd   :  { %2589 = vmatmul.msk.bf16.vlgmr.msra.gmra.mxu0 %vm109_vm1, %v2576_v9  ;;  %v2867_v32 = vld [vmem:[#allocation2 + $0xdc] sm:$0xf0]  ;;  %v3494_v34 = vor.u32 %v2868_v30, %v2615_v29  ;;  %v2607_v36 = vld [vmem:[#allocation2 + $0x5c] sm:$0xf]  ;;  %v2866_v37 = vld [vmem:[#allocation2 + $0x84] sm:$0xf0] }
   0xe   :  { %v3496_v35 = vor.u32 %v2867_v32, %v2611_v31  ;;  %v2655_v38 = vld [vmem:[#allocation2 + $0x64] sm:$0xf]  ;;  %v3502_v39 = vor.u32 %v2866_v37, %v2607_v36  ;;  %v2874_v40 = vld [vmem:[#allocation2 + $0x8c] sm:$0xf0]  ;;  %v2627_v41 = vld [vmem:[#allocation2 + $0x8] sm:$0xf] }
   0xf   :  { %76 = vperm.xlu1 %2930, %v3442_v10   ;;  %v2869_v42 = vld [vmem:[#allocation2 + $0x30] sm:$0xf0]  ;;  %v3507_v43 = vor.u32 %v2874_v40, %v2655_v38  ;;  %v2651_v45 = vld [vmem:[#allocation2 + $0xc] sm:$0xf]  ;;  %v2873_v46 = vld [vmem:[#allocation2 + $0x34] sm:$0xf0] }
  0x10   :  { %66 = vperm.xlu2 %2931, %v3447_v11   ;;  %86 = vperm.xlu0 %2929, %v3452_v12   ;;  %v3509_v44 = vor.u32 %v2869_v42, %v2627_v41  ;;  %v2635_v47 = vld [vmem:[#allocation2 + $0xb8] sm:$0xf]  ;;  %v3515_v48 = vor.u32 %v2873_v46, %v2651_v45  ;;  %v2871_v49 = vld [vmem:[#allocation2 + $0xe0] sm:$0xf0]  ;;  %v2659_v50 = vld [vmem:[#allocation2 + $0xbc] sm:$0xf] }
  0x11   :  { %v2875_v51 = vld [vmem:[#allocation2 + $0xe4] sm:$0xf0]  ;;  %v3519_v52 = vor.u32 %v2871_v49, %v2635_v47  ;;  %v2631_v55 = vld [vmem:[#allocation2 + $0x60] sm:$0xf]  ;;  %v2870_v56 = vld [vmem:[#allocation2 + $0x88] sm:$0xf0] }
  0x12   :  { %v3521_v53 = vor.u32 %v2875_v51, %v2659_v50  ;;  %v3529_v57 = vor.u32 %v2870_v56, %v2631_v55  ;;  %v2639_v58 = vld [vmem:[#allocation2 + $0x110] sm:$0xf]  ;;  %v2872_v59 = vld [vmem:[#allocation2 + $0x138] sm:$0xf0]  ;;  %v2663_v4 = vld [vmem:[#allocation2 + $0x114] sm:$0xf] }
  0x13   :  { %v3533_v60 = vor.u32 %v2872_v59, %v2639_v58  ;;  %v2876_v5 = vld [vmem:[#allocation2 + $0x13c] sm:$0xf0]  ;;  %v4931_v9 = vmov 8   ;;  %v4923_v20 = vmov 6   ;;  %v4929_v24 = vmov 7   ;;  %s3376_s9 = smov 24  }
  0x14   :  { %v3550_v7 = vor.u32 %v2876_v5, %v2663_v4  ;;  %v4933_v41 = vmov 9   ;;  %s3377_s10 = smov 8   ;;  %s3378_s11 = smov 16   ;;  %vm1127_vm11 = vcmask 64512   ;;  %vm1136_vm12 = vcmask 130048  }
  0x15   :  { %s3379_s12 = smov 40   ;;  %s3380_s13 = smov 32   ;;  %vm1145_vm13 = vcmask 195584   ;;  %vm1163_vm14 = vcmask 326656   ;;  %vm1154_vm15 = vcmask 261120   ;;  %vm1172_vm0 = vcmask 392192  }
  0x16   :  { %s3381_s14 = smov 48   ;;  %s3382_s26 = smov 120  }
  0x17   :  { %56 = vperm.xlu1 %2930, %v3461_v13   ;;  %s3386_s30 = smov 56  }
  0x18   :  { %2932 = vset.pattern.permute.xlu2 %v3364_v15  ;;  %51 = vperm.xlu0 %2929, %v3466_v14  }
  0x19   :  { %228 = vperm.xlu2 %2932, %v3431_v3  }
  0x1d   :  { %2590 = vmatmul.msk.bf16.gmra.mxu0 %vm109_vm1, %v2580_v18 }
  0x1f   :  { %2934 = vset.pattern.permute.xlu1 %v3365_v19 }
  0x20   :  { %268 = vperm.xlu1 %2934, %v3431_v3   ;;  %2933 = vset.pattern.permute.xlu0 %v3364_v15 }
  0x21   :  { %2935 = vset.pattern.permute.xlu2 %v3365_v19  ;;  %232 = vperm.xlu0 %2933, %v3452_v12  }
  0x22   :  { %272 = vperm.xlu2 %2935, %v3452_v12  }
  0x28   :  { %2936 = vset.pattern.permute.xlu1 %v3364_v15 }
  0x29   :  { %220 = vperm.xlu1 %2936, %v3421_v1   ;;  %2938 = vset.pattern.permute.xlu0 %v3365_v19 }
  0x2a   :  { %2937 = vset.pattern.permute.xlu2 %v3364_v15  ;;  %260 = vperm.xlu0 %2938, %v3421_v1  }
  0x2b   :  { %224 = vperm.xlu2 %2937, %v3442_v10  }
  0x2d   :  { %2591 = vmatmul.msk.bf16.gmra.mxu0 %vm109_vm1, %v2584_v22 }
  0x31   :  { %2939 = vset.pattern.permute.xlu1 %v3365_v19 }
  0x32   :  { %264 = vperm.xlu1 %2939, %v3442_v10   ;;  %256 = vperm.xlu0 %2938, %v3447_v11  }
  0x33   :  { %212 = vperm.xlu2 %2937, %v3426_v2  }
  0x3a   :  { %2940 = vset.pattern.permute.xlu1 %v3364_v15  ;;  %244 = vperm.xlu0 %2938, %v3466_v14  }
  0x3b   :  { %2941 = vset.pattern.permute.xlu2 %v3365_v19  ;;  %216 = vperm.xlu1 %2940, %v3447_v11  }
  0x3c   :  { %252 = vperm.xlu2 %2941, %v3426_v2  }
  0x3d   :  { %2592 = vmatmul.msk.bf16.gmra.mxu0 %vm109_vm1, %v2588_v25 }
  0x42   :  { %423 = vrot.lane.b32.xlu0 %v3502_v39, %s3366_s8 }
  0x43   :  { %204 = vperm.xlu1 %2940, %v3466_v14   ;;  %2955 = vset.pattern.permute.xlu0 %v4931_v9 }
  0x44   :  { %2942 = vset.pattern.permute.xlu2 %v3364_v15  ;;  %v4925_v15 = vmov 5  }
  0x45   :  { %208 = vperm.xlu2 %2942, %v3461_v13  }
  0x4a   :  { %785 = vrot.lane.b32.xlu0 %v3515_v48, %s3366_s8 }
  0x4b   :  { %2943 = vset.pattern.permute.xlu1 %v3365_v19 }
  0x4c   :  { %248 = vperm.xlu1 %2943, %v3461_v13  }
  0x4d   :  { %421 = vrot.lane.b32.xlu2 %v3488_v28, %s3366_s8 }
  0x4e   :  { %2944 = vset.pattern.permute.xlu2 %v4921_v33 }
  0x52   :  { %605 = vrot.lane.b32.xlu0 %v3529_v57, %s3366_s8 }
  0x54   :  { %425 = vrot.lane.b32.xlu1 %v3496_v35, %s3366_s8 }
  0x55   :  { %427 = vrot.lane.b32.xlu2 %v3494_v34, %s3366_s8  ;;  %2945 = vset.pattern.permute.xlu1 %v4921_v33 }
  0x5a   :  { %791 = vrot.lane.b32.xlu0 %v3550_v7, %s3366_s8 }
  0x5c   :  { %603 = vrot.lane.b32.xlu1 %v3509_v44, %s3366_s8 }
  0x5d   :  { %787 = vrot.lane.b32.xlu2 %v3507_v43, %s3366_s8 }
  0x62   :  { %v3523_v54 = vpop.permute.xlu2 %61  ;;  %782 = vperm.xlu0 %2955, %v3452_v12  }
  0x64   :  { %789 = vrot.lane.b32.xlu1 %v3521_v53, %s3366_s8 }
  0x65   :  { %607 = vrot.lane.b32.xlu2 %v3519_v52, %s3366_s8 }
  0x6a   :  { %v3535_v61 = vpop.permute.xlu2 %66  ;;  %2956 = vset.pattern.permute.xlu0 %v4927_v6 }
  0x6b   :  { %418 = vperm.xlu0 %2956, %v3452_v12  }
  0x6c   :  { %609 = vrot.lane.b32.xlu1 %v3533_v60, %s3366_s8 }
  0x6d   :  { %296 = vperm.xlu2 %2944, %v3466_v14  }
  0x73   :  { %v3540_v62 = vpop.permute.xlu2 %228  ;;  %402 = vperm.xlu0 %2956, %v3447_v11  }
  0x74   :  { %304 = vperm.xlu1 %2945, %v3426_v2  }
  0x75   :  { %308 = vperm.xlu2 %2944, %v3447_v11  }
  0x79   :  { %v3544_v63 = vpop.permute.xlu1 %71 }
  0x7a   :  { %v82_v29 = vpop.permute.xlu0 %81 }
  0x7b   :  { %2965 = vset.pattern.permute.xlu0 %v4929_v24 }
  0x7c   :  { %v3546_v0 = vpop.permute.xlu2 %272  ;;  %312 = vperm.xlu1 %2945, %v3421_v1   ;;  %685 = vperm.xlu0 %2965, %v3431_v3  }
  0x7d   :  { %2946 = vset.pattern.permute.xlu2 %v4927_v6 }
  0x7e   :  { %414 = vperm.xlu2 %2946, %v3431_v3  }
  0x81   :  { %v77_v8 = vpop.permute.xlu1 %76 }
  0x82   :  { %v87_v36 = vpop.permute.xlu0 %86 }
  0x84   :  { %2947 = vset.pattern.permute.xlu1 %v4925_v15  ;;  %673 = vperm.xlu0 %2965, %v3447_v11  }
  0x85   :  { %v3557_v16 = vpop.permute.xlu2 %224  ;;  %503 = vperm.xlu1 %2947, %v3431_v3  }
  0x86   :  { %2948 = vset.pattern.permute.xlu2 %v4925_v15 }
  0x87   :  { %507 = vperm.xlu2 %2948, %v3452_v12  }
  0x89   :  { %v3563_v17 = vpop.permute.xlu1 %56 }
  0x8a   :  { %v3565_v18 = vpop.f32.mrf.mxu0  ;;  %v52_v45 = vpop.permute.xlu0 %51 }
  0x8b   :  { %v3652_v33 = vadd.f32 %v3565_v18, %v52_v45 }
  0x8c   :  { %2978 = vset.pattern.permute.xlu0 %v4925_v15 }
  0x8d   :  { %v3567_v19 = vpop.permute.xlu2 %212  ;;  %2949 = vset.pattern.permute.xlu1 %v4923_v20  ;;  %479 = vperm.xlu0 %2978, %v3466_v14   ;;  %vm155_vm9 = vcmp.gt.f32.partialorder %v3652_v33, 0.0 }
  0x8e   :  { %596 = vperm.xlu1 %2949, %v3431_v3  }
  0x8f   :  { %2950 = vset.pattern.permute.xlu2 %v4923_v20 }
  0x90   :  { %600 = vperm.xlu2 %2950, %v3452_v12  }
  0x92   :  { %v3575_v21 = vpop.permute.xlu1 %268  ;;  %v3577_v22 = vpop.f32.mrf.mxu0 }
  0x95   :  { %2979 = vset.pattern.permute.xlu0 %v4923_v20 }
  0x96   :  { %v3579_v23 = vpop.permute.xlu2 %252  ;;  %2951 = vset.pattern.permute.xlu1 %v4929_v24  ;;  %588 = vperm.xlu0 %2979, %v3421_v1  }
  0x97   :  { %689 = vperm.xlu1 %2951, %v3452_v12  }
  0x98   :  { %2952 = vset.pattern.permute.xlu2 %v4927_v6 }
  0x99   :  { %406 = vperm.xlu2 %2952, %v3421_v1  }
  0x9a   :  { %v140_v25 = vpop.f32.mrf.mxu0 }
  0x9b   :  { %v3586_v26 = vpop.permute.xlu1 %220  ;;  %v3634_v59 = vadd.f32 %v140_v25, %v3523_v54  ;;  %v3648_v54 = vadd.f32 %v3577_v22, %v3563_v17 }
  0x9d   :  { %v164_v17 = vmin.f32 %v3648_v54, 0.0  ;;  %vm157_vm7 = vcmp.gt.f32.partialorder %v3634_v59, 0.0  ;;  %vm156_vm8 = vcmp.gt.f32.partialorder %v3648_v54, 0.0 }
  0x9e   :  { %576 = vperm.xlu0 %2979, %v3461_v13  }
  0x9f   :  { %v3588_v27 = vpop.permute.xlu2 %208  ;;  %2953 = vset.pattern.permute.xlu1 %v4927_v6 }
  0xa0   :  { %410 = vperm.xlu1 %2953, %v3442_v10  }
  0xa1   :  { %2954 = vset.pattern.permute.xlu2 %v4931_v9 }
  0xa2   :  { %778 = vperm.xlu2 %2954, %v3431_v3   ;;  %v142_v30 = vpop.f32.mrf.mxu0 }
  0xa3   :  { %v3628_v55 = vadd.f32 %v142_v30, %v3535_v61 }
  0xa4   :  { %v3596_v31 = vpop.permute.xlu1 %264 }
  0xa5   :  { %vm158_vm6 = vcmp.gt.f32.partialorder %v3628_v55, 0.0 }
  0xa6   :  { %2984 = vset.pattern.permute.xlu0 %v4933_v41 }
  0xa7   :  { %v3598_v32 = vpop.permute.xlu2 %421  ;;  %859 = vperm.xlu0 %2984, %v3421_v1  }
  0xa8   :  { %2957 = vset.pattern.permute.xlu1 %v4925_v15 }
  0xa9   :  { %495 = vperm.xlu1 %2957, %v3421_v1  }
  0xaa   :  { %2958 = vset.pattern.permute.xlu2 %v4925_v15  ;;  %v145_v37 = vpop.f32.mrf.mxu0 }
  0xab   :  { %499 = vperm.xlu2 %2958, %v3442_v10   ;;  %v3622_v50 = vadd.f32 %v145_v37, %v3544_v63  ;;  %v3636_v63 = vpop.permute.xlu0 %232 }
  0xad   :  { %v3605_v38 = vpop.permute.xlu1 %216  ;;  %v167_v4 = vmin.f32 %v3622_v50, 0.0  ;;  %vm159_vm4 = vcmp.gt.f32.partialorder %v3622_v50, 0.0 }
  0xaf   :  { %v3607_v40 = vpop.permute.xlu2 %427  ;;  %v179_v25 = vmul.f32 1.442695, %v167_v4  ;;  %843 = vperm.xlu0 %2984, %v3466_v14  }
  0xb1   :  { %2959 = vset.pattern.permute.xlu1 %v4933_v41 }
  0xb2   :  { %867 = vperm.xlu1 %2959, %v3431_v3   ;;  %v147_v42 = vpop.f32.mrf.mxu0 }
  0xb3   :  { %2960 = vset.pattern.permute.xlu2 %v4933_v41  ;;  %v3619_v49 = vadd.f32 %v147_v42, %v77_v8  ;;  %v165_v42 = vmin.f32 %v3634_v59, 0.0 }
  0xb4   :  { %871 = vperm.xlu2 %2960, %v3452_v12  }
  0xb5   :  { %v3615_v46 = vpop.permute.xlu1 %204  ;;  %v168_v56 = vmin.f32 %v3619_v49, 0.0  ;;  %vm160_vm3 = vcmp.gt.f32.partialorder %v3619_v49, 0.0 }
  0xb7   :  { %v3617_v47 = vpop.permute.xlu2 %787  ;;  %v181_v30 = vmul.f32 1.442695, %v168_v56  ;;  %v175_v56 = vmul.f32 1.442695, %v165_v42 }
  0xba   :  { %2961 = vset.pattern.permute.xlu1 %v4923_v20  ;;  %v150_v51 = vpop.f32.mrf.mxu0 }
  0xbb   :  { %592 = vperm.xlu1 %2961, %v3442_v10   ;;  %v151_v58 = vadd.f32 %v150_v51, %v82_v29  ;;  %v166_v29 = vmin.f32 %v3628_v55, 0.0 }
  0xbc   :  { %2962 = vset.pattern.permute.xlu2 %v4929_v24 }
  0xbd   :  { %677 = vperm.xlu2 %2962, %v3421_v1   ;;  %v169_v5 = vmin.f32 %v151_v58, 0.0  ;;  %v177_v20 = vmul.f32 1.442695, %v166_v29  ;;  %vm161_vm2 = vcmp.gt.f32.partialorder %v151_v58, 0.0 }
  0xbe   :  { %v3640_v8 = vpop.permute.xlu1 %248 }
  0xbf   :  { %v3642_v61 = vpop.permute.xlu2 %607  ;;  %v183_v37 = vmul.f32 1.442695, %v169_v5  ;;  %v261_v5 = vpop.permute.xlu0 %260 }
  0xc1   :  { %3264 = vpow2.f32 %v183_v37  ;;  %v173_v37 = vmul.f32 1.442695, %v164_v17 }
  0xc2   :  { %v152_v51 = vpop.f32.mrf.mxu0  ;;  %3266 = vpow2.f32 %v181_v30 }
  0xc3   :  { %2963 = vset.pattern.permute.xlu1 %v4929_v24  ;;  %v153_v15 = vadd.f32 %v152_v51, %v87_v36  ;;  %3268 = vpow2.f32 %v179_v25  ;;  %v163_v36 = vmin.f32 %v3652_v33, 0.0 }
  0xc4   :  { %681 = vperm.xlu1 %2963, %v3442_v10   ;;  %3270 = vpow2.f32 %v177_v20 }
  0xc5   :  { %2964 = vset.pattern.permute.xlu2 %v4927_v6  ;;  %v170_v22 = vmin.f32 %v153_v15, 0.0  ;;  %3272 = vpow2.f32 %v175_v56  ;;  %v171_v6 = vmul.f32 1.442695, %v163_v36  ;;  %vm162_vm5 = vcmp.gt.f32.partialorder %v153_v15, 0.0 }
  0xc6   :  { %398 = vperm.xlu2 %2964, %v3426_v2   ;;  %v3659_v4 = vpop.permute.xlu1 %425 }
  0xc7   :  { %v3661_v18 = vpop.permute.xlu2 %296  ;;  %v3265_v45 = vpop.eup %3264  ;;  %v185_v29 = vmul.f32 1.442695, %v170_v22 }
  0xc8   :  { %v3267_v30 = vpop.eup %3266  ;;  %v2599_v42 = vadd.f32 -1.0, %v3265_v45 }
  0xc9   :  { %3274 = vpow2.f32 %v185_v29  ;;  %v3269_v51 = vpop.eup %3268  ;;  %v2598_v25 = vadd.f32 -1.0, %v3267_v30 }
  0xca   :  { %v3271_v24 = vpop.eup %3270  ;;  %3276 = vpow2.f32 %v173_v37  ;;  %v2597_v17 = vadd.f32 -1.0, %v3269_v51  ;;  %v201_v22 = vsel %vm161_vm2, %v151_v58, %v2599_v42 }
  0xcb   :  { %v3273_v56 = vpop.eup %3272  ;;  %3278 = vpow2.f32 %v171_v6  ;;  %v2596_v29 = vadd.f32 -1.0, %v3271_v24  ;;  %v200_v30 = vsel %vm160_vm3, %v3619_v49, %v2598_v25  ;;  %v241_v41 = vmul.f32 %v3540_v62, %v201_v22 }
  0xcc   :  { %2966 = vset.pattern.permute.xlu1 %v4931_v9  ;;  %v2595_v51 = vadd.f32 -1.0, %v3273_v56  ;;  %v199_v58 = vsel %vm159_vm4, %v3622_v50, %v2597_v17  ;;  %v240_v6 = vmul.f32 %v3557_v16, %v200_v30  ;;  %v4936_v25 = vmov 5  }
  0xcd   :  { %770 = vperm.xlu1 %2966, %v3421_v1   ;;  %v198_v49 = vsel %vm158_vm6, %v3628_v55, %v2596_v29  ;;  %v239_v62 = vmul.f32 %v3586_v26, %v199_v58  ;;  %v281_v56 = vadd.f32 %v3575_v21, %v241_v41  ;;  %v4938_v58 = vmov 6  }
  0xce   :  { %2967 = vset.pattern.permute.xlu2 %v4931_v9  ;;  %v3668_v20 = vpop.permute.xlu1 %603  ;;  %v257_v9 = vpop.permute.xlu0 %256  ;;  %v197_v50 = vsel %vm157_vm7, %v3634_v59, %v2595_v51  ;;  %v238_v26 = vmul.f32 %v3605_v38, %v198_v49  ;;  %v280_v21 = vadd.f32 %v3596_v31, %v240_v6  ;;  %v4937_v51 = vmov 9  }
  0xcf   :  { %774 = vperm.xlu2 %2967, %v3442_v10   ;;  %v3671_v45 = vpop.permute.xlu2 %308  ;;  %v3275_v36 = vpop.eup %3274  ;;  %v237_v17 = vmul.f32 %v3567_v19, %v197_v50  ;;  %v279_v22 = vadd.f32 %v261_v5, %v239_v62  ;;  %v4942_v62 = vmov 8  }
  0xd0   :  { %4935 = vst [vmem:[#allocation5_spill] sm:$0xff] %v3671_v45  ;;  %v2600_v37 = vadd.f32 -1.0, %v3275_v36  ;;  %v3277_v45 = vpop.eup %3276 }
  0xd1   :  { %v3279_v36 = vpop.eup %3278  ;;  %v2594_v55 = vadd.f32 -1.0, %v3277_v45  ;;  %v278_v45 = vadd.f32 %v257_v9, %v238_v26  ;;  %v293_v29 = vpack.c.bf16 %v280_v21, %v279_v22  ;;  %v277_v19 = vadd.f32 %v3579_v23, %v237_v17 }
  0xd2   :  { %v202_v42 = vsel %vm162_vm5, %v153_v15, %v2600_v37  ;;  %v2593_v41 = vadd.f32 -1.0, %v3279_v36 }
  0xd3   :  { %v242_v24 = vmul.f32 %v3636_v63, %v202_v42  ;;  %v196_v59 = vsel %vm156_vm8, %v3648_v54, %v2594_v55  ;;  %v292_v54 = vpack.c.bf16 %v278_v45, %v277_v19  ;;  %v4939_v42 = vmov 3   ;;  %v2877_v55 = vld [vmem:[#allocation2 + $0x38] sm:$0xf0] }
  0xd4   :  { %v195_v31 = vsel %vm155_vm9, %v3652_v33, %v2593_v41  ;;  %v236_v30 = vmul.f32 %v3588_v27, %v196_v59  ;;  %2989 = vset.pattern.permute.xlu0 %v4939_v42  ;;  %vm2745_vm9 = vmneg %vm1127_vm11 }
  0xd5   :  { %2968 = vset.pattern.permute.xlu1 %v4936_v25  ;;  %v282_v15 = vadd.f32 %v3546_v0, %v242_v24  ;;  %v235_v37 = vmul.f32 %v3615_v46, %v195_v31  ;;  %300 = vperm.xlu0 %2989, %v3461_v13   ;;  %v4940_v24 = vmov 7   ;;  %v2879_v31 = vld [vmem:[#allocation2 + $0xe8] sm:$0xf0] }
  0xd6   :  { %487 = vperm.xlu1 %2968, %v3426_v2   ;;  %v3690_v16 = vpop.permute.xlu1 %789  ;;  %v245_v38 = vpop.permute.xlu0 %244  ;;  %v276_v9 = vadd.f32 %v3640_v8, %v236_v30 }
  0xd7   :  { %2969 = vset.pattern.permute.xlu2 %v4936_v25  ;;  %v294_v0 = vpack.c.bf16 %v282_v15, %v281_v56  ;;  %v275_v23 = vadd.f32 %v245_v38, %v235_v37 }
  0xd8   :  { %491 = vperm.xlu2 %2969, %v3447_v11   ;;  %v3694_v63 = vpop.permute.xlu2 %414 }
  0xd9   :  { %364 = vmatpush.bf16.msra.mxu1 %v294_v0  ;;  %445 = vmatpush.bf16.msra.mxu2 %v294_v0  ;;  %v291_v27 = vpack.c.bf16 %v276_v9, %v275_v23  ;;  %v2687_v9 = vld [vmem:[#allocation2 + $0x118] sm:$0xf] }
  0xda   :  { %546 = vmatpush.bf16.msra.mxu3 %v294_v0  ;;  %627 = vmatpush.bf16.msrb.mxu0 %v294_v0 }
  0xdd   :  { %365 = vmatpush.bf16.msra.mxu1 %v293_v29  ;;  %446 = vmatpush.bf16.msra.mxu2 %v293_v29 }
  0xde   :  { %v3707_v5 = vpop.permute.xlu1 %609  ;;  %547 = vmatpush.bf16.msra.mxu3 %v293_v29  ;;  %628 = vmatpush.bf16.msrb.mxu0 %v293_v29  ;;  %v424_v46 = vpop.permute.xlu0 %423 }
  0xdf   :  { %2970 = vset.pattern.permute.xlu1 %v4937_v51  ;;  %316 = vperm.xlu0 %2989, %v3442_v10  }
  0xe0   :  { %2971 = vset.pattern.permute.xlu2 %v4938_v58  ;;  %863 = vperm.xlu1 %2970, %v3442_v10  }
  0xe1   :  { %v3712_v33 = vpop.permute.xlu2 %507  ;;  %580 = vperm.xlu2 %2971, %v3426_v2   ;;  %366 = vmatpush.bf16.msra.mxu1 %v292_v54 }
  0xe2   :  { %447 = vmatpush.bf16.msra.mxu2 %v292_v54  ;;  %548 = vmatpush.bf16.msra.mxu3 %v292_v54 }
  0xe3   :  { %629 = vmatpush.bf16.msrb.mxu0 %v292_v54 }
  0xe5   :  { %367 = vmatpush.bf16.msra.mxu1 %v291_v27 }
  0xe6   :  { %448 = vmatpush.bf16.msra.mxu2 %v291_v27  ;;  %v3718_v8 = vpop.permute.xlu1 %304  ;;  %549 = vmatpush.bf16.msra.mxu3 %v291_v27  ;;  %v3734_v49 = vpop.permute.xlu0 %785 }
  0xe7   :  { %630 = vmatpush.bf16.msrb.mxu0 %v291_v27 }
  0xe8   :  { %2972 = vset.pattern.permute.xlu1 %v4938_v58  ;;  %2617 = vmatmul.msk.bf16.vlgmr.msra.gmra.mxu1 %vm347_vm10, %v3488_v28 }
  0xe9   :  { %728 = vmatpush.bf16.msrb.mxu1 %v294_v0  ;;  %2973 = vset.pattern.permute.xlu2 %v4940_v24 }
  0xea   :  { %809 = vmatpush.bf16.msrb.mxu2 %v294_v0  ;;  %910 = vmatpush.bf16.msrb.mxu3 %v294_v0  ;;  %v3721_v6 = vpop.permute.xlu2 %600 }
  0xeb   :  { %584 = vperm.xlu1 %2972, %v3447_v11   ;;  %2621 = vmatmul.msk.bf16.vlgmr.msra.gmra.mxu2 %vm347_vm10, %v3598_v32 }
  0xec   :  { %2641 = vmatmul.msk.bf16.vlgmr.msra.gmra.mxu3 %vm347_vm10, %v3509_v44  ;;  %2645 = vmatmul.msk.bf16.vlgmr.msrb.gmra.mxu0 %vm347_vm10, %v3668_v20  ;;  %v4941_v44 = vmov 4  }
  0xed   :  { %669 = vperm.xlu2 %2973, %v3426_v2   ;;  %729 = vmatpush.bf16.msrb.mxu1 %v293_v29 }
  0xee   :  { %810 = vmatpush.bf16.msrb.mxu2 %v293_v29  ;;  %911 = vmatpush.bf16.msrb.mxu3 %v293_v29  ;;  %v3736_v36 = vpop.permute.xlu1 %312  ;;  %v606_v20 = vpop.permute.xlu0 %605  ;;  %v3374_v29 = vmov 10  }
  0xf1   :  { %730 = vmatpush.bf16.msrb.mxu1 %v292_v54 }
  0xf2   :  { %811 = vmatpush.bf16.msrb.mxu2 %v292_v54  ;;  %912 = vmatpush.bf16.msrb.mxu3 %v292_v54 }
  0xf3   :  { %v3739_v28 = vpop.permute.xlu2 %406  ;;  %2974 = vset.pattern.permute.xlu1 %v4941_v44 }
  0xf4   :  { %390 = vperm.xlu1 %2974, %v3466_v14  }
  0xf5   :  { %2975 = vset.pattern.permute.xlu2 %v4941_v44  ;;  %731 = vmatpush.bf16.msrb.mxu1 %v291_v27 }
  0xf6   :  { %394 = vperm.xlu2 %2975, %v3461_v13   ;;  %812 = vmatpush.bf16.msrb.mxu2 %v291_v27 }
  0xf7   :  { %913 = vmatpush.bf16.msrb.mxu3 %v291_v27  ;;  %v3745_v32 = vpop.permute.xlu1 %503 }
  0xf8   :  { %2618 = vmatmul.msk.bf16.gmra.mxu1 %vm347_vm10, %v3502_v39  ;;  %v3761_v39 = vpop.permute.xlu0 %791 }
  0xfb   :  { %2622 = vmatmul.msk.bf16.gmra.mxu2 %vm347_vm10, %v424_v46 }
  0xfc   :  { %v3750_v10 = vpop.permute.xlu2 %778  ;;  %2642 = vmatmul.msk.bf16.gmra.mxu3 %vm347_vm10, %v3529_v57  ;;  %2646 = vmatmul.msk.bf16.gmra.mxu0 %vm347_vm10, %v606_v20 }
  0xfd   :  { %2976 = vset.pattern.permute.xlu1 %v4942_v62 }
  0xfe   :  { %2977 = vset.pattern.permute.xlu2 %v4942_v62  ;;  %762 = vperm.xlu1 %2976, %v3426_v2  }
  0xff   :  { %766 = vperm.xlu2 %2977, %v3447_v11  }
 0x100   :  { %v3759_v56 = vpop.permute.xlu1 %596  ;;  %v3771_v50 = vpop.permute.xlu0 %782 }
 0x105   :  { %v3763_v15 = vpop.permute.xlu2 %499 }
 0x106   :  { %2980 = vset.pattern.permute.xlu1 %v4936_v25 }
 0x107   :  { %2981 = vset.pattern.permute.xlu2 %v4937_v51  ;;  %483 = vperm.xlu1 %2980, %v3461_v13  }
 0x108   :  { %851 = vperm.xlu2 %2981, %v3426_v2   ;;  %2619 = vmatmul.msk.bf16.gmra.mxu1 %vm347_vm10, %v3496_v35  ;;  %v3789_v35 = vpop.permute.xlu0 %418 }
 0x109   :  { %v3769_v57 = vpop.permute.xlu1 %689 }
 0x10b   :  { %2623 = vmatmul.msk.bf16.gmra.mxu2 %vm347_vm10, %v3659_v4 }
 0x10c   :  { %2643 = vmatmul.msk.bf16.gmra.mxu3 %vm347_vm10, %v3519_v52  ;;  %2647 = vmatmul.msk.bf16.gmra.mxu0 %vm347_vm10, %v3642_v61 }
 0x10e   :  { %v3781_v25 = vpop.permute.xlu2 %871 }
 0x10f   :  { %2982 = vset.pattern.permute.xlu1 %v4937_v51 }
 0x110   :  { %2983 = vset.pattern.permute.xlu2 %v4938_v58  ;;  %855 = vperm.xlu1 %2982, %v3447_v11   ;;  %v3807_v52 = vpop.permute.xlu0 %402 }
 0x111   :  { %572 = vperm.xlu2 %2983, %v3466_v14  }
 0x112   :  { %v3787_v2 = vpop.permute.xlu1 %410 }
 0x117   :  { %v3791_v4 = vpop.permute.xlu2 %677 }
 0x118   :  { %2985 = vset.pattern.permute.xlu1 %v4940_v24  ;;  %2620 = vmatmul.msk.bf16.gmra.mxu1 %vm347_vm10, %v3494_v34  ;;  %v3817_v26 = vpop.permute.xlu0 %685 }
 0x119   :  { %661 = vperm.xlu1 %2985, %v3466_v14   ;;  %2986 = vset.pattern.permute.xlu2 %v4940_v24 }
 0x11a   :  { %665 = vperm.xlu2 %2986, %v3461_v13  }
 0x11b   :  { %2624 = vmatmul.msk.bf16.gmra.mxu2 %vm347_vm10, %v3607_v40  ;;  %v3801_v11 = vpop.permute.xlu1 %495  ;;  %v2675_v40 = vld [vmem:[#allocation2 + $0x10] sm:$0xf] }
 0x11c   :  { %2644 = vmatmul.msk.bf16.gmra.mxu3 %vm347_vm10, %v3533_v60  ;;  %2648 = vmatmul.msk.bf16.gmra.mxu0 %vm347_vm10, %v3707_v5  ;;  %v2676_v60 = vor.u32 %v2877_v55, %v2675_v40 }
 0x120   :  { %v3809_v61 = vpop.permute.xlu2 %398  ;;  %v3832_v0 = vpop.permute.xlu0 %673 }
 0x121   :  { %2987 = vset.pattern.permute.xlu1 %v4942_v62 }
 0x122   :  { %754 = vperm.xlu1 %2987, %v3466_v14   ;;  %2988 = vset.pattern.permute.xlu2 %v4942_v62 }
 0x123   :  { %758 = vperm.xlu2 %2988, %v3461_v13  }
 0x124   :  { %v3815_v34 = vpop.permute.xlu1 %867 }
 0x128   :  { %2665 = vmatmul.msk.bf16.vlgmr.msrb.gmra.mxu1 %vm347_vm10, %v3515_v48  ;;  %v2878_v48 = vld [vmem:[#allocation2 + $0x90] sm:$0xf0]  ;;  %v480_v59 = vpop.permute.xlu0 %479 }
 0x129   :  { %v3819_v21 = vpop.permute.xlu2 %774 }
 0x12a   :  { %2990 = vset.pattern.permute.xlu1 %v4937_v51 }
 0x12b   :  { %847 = vperm.xlu1 %2990, %v3461_v13   ;;  %2669 = vmatmul.msk.bf16.vlgmr.msrb.gmra.mxu2 %vm347_vm10, %v3734_v49  ;;  %v2679_v13 = vld [vmem:[#allocation2 + $0x68] sm:$0xf] }
 0x12c   :  { %2689 = vmatmul.msk.bf16.vlgmr.msrb.gmra.mxu3 %vm347_vm10, %v2676_v60  ;;  %2991 = vset.pattern.permute.xlu2 %v4939_v42  ;;  %v2680_v22 = vor.u32 %v2878_v48, %v2679_v13 }
 0x12d   :  { %v3828_v14 = vpop.permute.xlu1 %592  ;;  %320 = vperm.xlu2 %2991, %v3431_v3  }
 0x130   :  { %v3855_v30 = vpop.permute.xlu0 %588 }
 0x132   :  { %v3835_v41 = vpop.permute.xlu2 %491 }
 0x133   :  { %2992 = vset.pattern.permute.xlu1 %v4939_v42 }
 0x134   :  { %324 = vperm.xlu1 %2992, %v3452_v12  }
 0x135   :  { %2994 = vset.pattern.permute.xlu2 %v3374_v29 }
 0x136   :  { %v3838_v17 = vpop.permute.xlu1 %681  ;;  %1258 = vperm.xlu2 %2994, %v3452_v12  }
 0x138   :  { %2666 = vmatmul.msk.bf16.gmra.mxu1 %vm347_vm10, %v3507_v43  ;;  %v3375_v43 = vmov 11  }
 0x139   :  { %2995 = vset.pattern.permute.xlu0 %v3375_v43 }
 0x13a   :  { %1294 = vperm.xlu0 %2995, %v3431_v3  }
 0x13b   :  { %2670 = vmatmul.msk.bf16.gmra.mxu2 %vm347_vm10, %v3617_v47  ;;  %v3845_v45 = vpop.permute.xlu2 %580  ;;  %v2683_v47 = vld [vmem:[#allocation2 + $0xc0] sm:$0xf] }
 0x13c   :  { %2690 = vmatmul.msk.bf16.gmra.mxu3 %vm347_vm10, %v2680_v22  ;;  %2993 = vset.pattern.permute.xlu1 %v3374_v29  ;;  %v2684_v37 = vor.u32 %v2879_v31, %v2683_v47 }
 0x13d   :  { %1254 = vperm.xlu1 %2993, %v3431_v3   ;;  %v577_v3 = vpop.permute.xlu0 %576 }
 0x13e   :  { %1246 = vperm.xlu2 %2994, %v3421_v1  }
 0x13f   :  { %v3851_v38 = vpop.permute.xlu1 %770 }
 0x145   :  { %2996 = vset.pattern.permute.xlu1 %v3375_v43  ;;  %v3873_v23 = vpop.permute.xlu0 %859 }
 0x146   :  { %1298 = vperm.xlu1 %2996, %v3452_v12   ;;  %2998 = vset.pattern.permute.xlu2 %v3375_v43  ;;  %v2880_v12 = vld [vmem:[#allocation2 + $0x140] sm:$0xf0] }
 0x147   :  { %v3859_v19 = vpop.permute.xlu2 %669  ;;  %v2688_v51 = vor.u32 %v2880_v12, %v2687_v9 }
 0x148   :  { %v488_v5 = vpop.permute.xlu1 %487  ;;  %2667 = vmatmul.msk.bf16.gmra.mxu1 %vm347_vm10, %v3521_v53 }
 0x14b   :  { %2671 = vmatmul.msk.bf16.gmra.mxu2 %vm347_vm10, %v3690_v16 }
 0x14c   :  { %2691 = vmatmul.msk.bf16.gmra.mxu3 %vm347_vm10, %v2684_v37 }
 0x14d   :  { %v3882_v27 = vpop.permute.xlu0 %843 }
 0x14e   :  { %2997 = vset.pattern.permute.xlu1 %v3374_v29 }
 0x150   :  { %v395_v1 = vpop.permute.xlu2 %394 }
 0x152   :  { %v3869_v54 = vpop.permute.xlu1 %863 }
 0x155   :  { %v301_v20 = vpop.permute.xlu0 %300 }
 0x158   :  { %2668 = vmatmul.msk.bf16.gmra.mxu1 %vm347_vm10, %v3550_v7 }
 0x159   :  { %v3871_v58 = vpop.permute.xlu2 %766 }
 0x15b   :  { %2672 = vmatmul.msk.bf16.gmra.mxu2 %vm347_vm10, %v3761_v39 }
 0x15c   :  { %2692 = vmatmul.msk.bf16.gmra.mxu3 %vm347_vm10, %v2688_v51 }
 0x15d   :  { %v585_v53 = vpop.permute.xlu1 %584 }
 0x162   :  { %v3880_v16 = vpop.permute.xlu2 %851 }
 0x165   :  { %v3884_v42 = vpop.f32.mrf.mxu1 }
 0x166   :  { %v391_v46 = vpop.permute.xlu1 %390 }
 0x169   :  { %v632_v24 = vpop.f32.mrf.mxu0 }
 0x16b   :  { %v573_v49 = vpop.permute.xlu2 %572 }
 0x16c   :  { %v633_v44 = vadd.f32 %v632_v24, %v573_v49 }
 0x16d   :  { %v371_v60 = vpop.f32.mrf.mxu1 }
 0x16e   :  { %1007 = vrot.lane.b32.xlu2 %v633_v44, %s3376_s9  ;;  %v450_v7 = vpop.f32.mrf.mxu2  ;;  %v3889_v13 = vadd.f32 %v371_v60, %v301_v20 }
 0x16f   :  { %v451_v62 = vadd.f32 %v450_v7, %v391_v46  ;;  %v551_v39 = vpop.f32.mrf.mxu3 }
 0x170   :  { %v552_v40 = vadd.f32 %v551_v39, %v480_v59  ;;  %v3887_v55 = vpop.permute.xlu1 %762 }
 0x171   :  { %v634_v48 = vpop.f32.mrf.mxu0  ;;  %943 = vrot.lane.b32.xlu0 %v451_v62, %s3377_s10 }
 0x172   :  { %975 = vrot.lane.b32.xlu1 %v552_v40, %s3378_s11  ;;  %v635_v47 = vadd.f32 %v634_v48, %v577_v3  ;;  %v317_v48 = vpop.permute.xlu0 %316 }
 0x175   :  { %v3893_v9 = vpop.f32.mrf.mxu1 }
 0x176   :  { %v452_v22 = vpop.f32.mrf.mxu2 }
 0x177   :  { %v453_v31 = vadd.f32 %v452_v22, %v395_v1  ;;  %v553_v37 = vpop.f32.mrf.mxu3 }
 0x179   :  { %v484_v12 = vpop.permute.xlu1 %483  ;;  %v637_v59 = vpop.f32.mrf.mxu0  ;;  %1009 = vrot.lane.b32.xlu0 %v635_v47, %s3376_s9 }
 0x17a   :  { %v554_v51 = vadd.f32 %v553_v37, %v484_v12  ;;  %945 = vrot.lane.b32.xlu1 %v453_v31, %s3377_s10  ;;  %v638_v3 = vadd.f32 %v637_v59, %v3845_v45 }
 0x17c   :  { %977 = vrot.lane.b32.xlu2 %v554_v51, %s3378_s11 }
 0x17d   :  { %v3899_v7 = vpop.f32.mrf.mxu1 }
 0x17e   :  { %v455_v46 = vpop.f32.mrf.mxu2 }
 0x17f   :  { %v456_v24 = vadd.f32 %v455_v46, %v3809_v61  ;;  %v556_v49 = vpop.f32.mrf.mxu3 }
 0x180   :  { %v557_v44 = vadd.f32 %v556_v49, %v488_v5  ;;  %v666_v49 = vpop.permute.xlu2 %665 }
 0x181   :  { %v639_v1 = vpop.f32.mrf.mxu0  ;;  %947 = vrot.lane.b32.xlu0 %v456_v24, %s3377_s10 }
 0x182   :  { %979 = vrot.lane.b32.xlu1 %v557_v44, %s3378_s11  ;;  %v640_v62 = vadd.f32 %v639_v1, %v585_v53  ;;  %v3922_v46 = vpop.permute.xlu1 %855 }
 0x184   :  { %1011 = vrot.lane.b32.xlu2 %v638_v3, %s3376_s9 }
 0x185   :  { %v3906_v60 = vpop.f32.mrf.mxu1 }
 0x186   :  { %v457_v20 = vpop.f32.mrf.mxu2 }
 0x187   :  { %v458_v39 = vadd.f32 %v457_v20, %v3807_v52  ;;  %v558_v40 = vpop.f32.mrf.mxu3 }
 0x188   :  { %v559_v5 = vadd.f32 %v558_v40, %v3835_v41 }
 0x189   :  { %v642_v61 = vpop.f32.mrf.mxu0  ;;  %1013 = vrot.lane.b32.xlu0 %v640_v62, %s3376_s9 }
 0x18a   :  { %949 = vrot.lane.b32.xlu1 %v458_v39, %s3377_s10  ;;  %v643_v37 = vadd.f32 %v642_v61, %v3855_v30  ;;  %v759_v61 = vpop.permute.xlu2 %758 }
 0x18b   :  { %v662_v3 = vpop.permute.xlu1 %661 }
 0x18c   :  { %981 = vrot.lane.b32.xlu2 %v559_v5, %s3378_s11 }
 0x18d   :  { %v381_v52 = vpop.f32.mrf.mxu1 }
 0x18e   :  { %v460_v45 = vpop.f32.mrf.mxu2  ;;  %v3914_v31 = vadd.f32 %v381_v52, %v317_v48 }
 0x18f   :  { %v461_v22 = vadd.f32 %v460_v45, %v3739_v28  ;;  %v561_v47 = vpop.f32.mrf.mxu3 }
 0x190   :  { %v562_v53 = vadd.f32 %v561_v47, %v3801_v11 }
 0x191   :  { %951 = vrot.lane.b32.xlu0 %v461_v22, %s3377_s10  ;;  %v644_v41 = vpop.f32.mrf.mxu0 }
 0x192   :  { %983 = vrot.lane.b32.xlu1 %v562_v53, %s3378_s11  ;;  %v645_v59 = vadd.f32 %v644_v41, %v3828_v14 }
 0x194   :  { %1015 = vrot.lane.b32.xlu2 %v643_v37, %s3376_s9 }
 0x195   :  { %v3924_v11 = vpop.f32.mrf.mxu1 }
 0x196   :  { %v462_v12 = vpop.f32.mrf.mxu2 }
 0x197   :  { %v463_v28 = vadd.f32 %v462_v12, %v3787_v2  ;;  %v563_v51 = vpop.f32.mrf.mxu3 }
 0x198   :  { %v564_v24 = vadd.f32 %v563_v51, %v3763_v15 }
 0x199   :  { %1017 = vrot.lane.b32.xlu0 %v645_v59, %s3376_s9  ;;  %v647_v30 = vpop.f32.mrf.mxu0 }
 0x19a   :  { %953 = vrot.lane.b32.xlu1 %v463_v28, %s3377_s10  ;;  %v648_v14 = vadd.f32 %v647_v30, %v3759_v56 }
 0x19c   :  { %985 = vrot.lane.b32.xlu2 %v564_v24, %s3378_s11 }
 0x19d   :  { %v3931_v2 = vpop.f32.mrf.mxu1 }
 0x19e   :  { %v465_v44 = vpop.f32.mrf.mxu2 }
 0x19f   :  { %v566_v1 = vpop.f32.mrf.mxu3  ;;  %v466_v20 = vadd.f32 %v465_v44, %v3694_v63  ;;  %v755_v63 = vpop.permute.xlu1 %754 }
 0x1a0   :  { %v567_v5 = vadd.f32 %v566_v1, %v3745_v32 }
 0x1a1   :  { %v649_v62 = vpop.f32.mrf.mxu0 }
 0x1a2   :  { %1019 = vrot.lane.b32.xlu1 %v648_v14, %s3376_s9  ;;  %v650_v56 = vadd.f32 %v649_v62, %v3721_v6 }
 0x1a4   :  { %955 = vrot.lane.b32.xlu2 %v466_v20, %s3377_s10 }
 0x1a5   :  { %v733_v45 = vpop.f32.mrf.mxu1 }
 0x1a6   :  { %v467_v15 = vpop.f32.mrf.mxu2  ;;  %v734_v47 = vadd.f32 %v733_v45, %v662_v3 }
 0x1a7   :  { %v468_v39 = vadd.f32 %v467_v15, %v3789_v35  ;;  %v568_v40 = vpop.f32.mrf.mxu3  ;;  %v3942_v35 = vpop.permute.xlu2 %320 }
 0x1a8   :  { %v569_v37 = vadd.f32 %v568_v40, %v3712_v33  ;;  %v848_v6 = vpop.permute.xlu1 %847 }
 0x1a9   :  { %957 = vrot.lane.b32.xlu0 %v468_v39, %s3377_s10 }
 0x1aa   :  { %987 = vrot.lane.b32.xlu1 %v567_v5, %s3378_s11 }
 0x1ac   :  { %1021 = vrot.lane.b32.xlu2 %v650_v56, %s3376_s9 }
 0x1ad   :  { %v735_v52 = vpop.f32.mrf.mxu1 }
 0x1ae   :  { %v814_v48 = vpop.f32.mrf.mxu2  ;;  %v736_v3 = vadd.f32 %v735_v52, %v666_v49 }
 0x1af   :  { %v915_v22 = vpop.f32.mrf.mxu3  ;;  %v815_v53 = vadd.f32 %v814_v48, %v755_v63  ;;  %v3949_v24 = vpop.permute.xlu2 %1258 }
 0x1b0   :  { %v916_v51 = vadd.f32 %v915_v22, %v3882_v27  ;;  %v3961_v62 = vpop.permute.xlu1 %324 }
 0x1b1   :  { %1071 = vrot.lane.b32.xlu0 %v815_v53, %s3379_s12  ;;  %v3981_v53 = vpop.permute.xlu0 %1294 }
 0x1b2   :  { %1039 = vrot.lane.b32.xlu1 %v734_v47, %s3380_s13 }
 0x1b4   :  { %989 = vrot.lane.b32.xlu2 %v569_v37, %s3378_s11 }
 0x1b5   :  { %v738_v28 = vpop.f32.mrf.mxu1 }
 0x1b6   :  { %v816_v32 = vpop.f32.mrf.mxu2  ;;  %v739_v44 = vadd.f32 %v738_v28, %v3859_v19 }
 0x1b7   :  { %v917_v41 = vpop.f32.mrf.mxu3  ;;  %v817_v12 = vadd.f32 %v816_v32, %v759_v61  ;;  %v3958_v27 = vpop.permute.xlu2 %1246 }
 0x1b8   :  { %v918_v59 = vadd.f32 %v917_v41, %v848_v6 }
 0x1ba   :  { %1105 = vrot.lane.b32.xlu0 %v918_v59, %s3381_s14  ;;  %1073 = vrot.lane.b32.xlu1 %v817_v12, %s3379_s12 }
 0x1bc   :  { %1103 = vrot.lane.b32.xlu2 %v916_v51, %s3381_s14 }
 0x1bd   :  { %v740_v14 = vpop.f32.mrf.mxu1 }
 0x1be   :  { %v819_v33 = vpop.f32.mrf.mxu2 }
 0x1bf   :  { %v920_v30 = vpop.f32.mrf.mxu3 }
 0x1c0   :  { %v921_v1 = vadd.f32 %v920_v30, %v3880_v16  ;;  %v820_v16 = vadd.f32 %v819_v33, %v3887_v55 }
 0x1c2   :  { %1107 = vrot.lane.b32.xlu0 %v921_v1, %s3381_s14  ;;  %1043 = vrot.lane.b32.xlu1 %v739_v44, %s3380_s13 }
 0x1c4   :  { %1041 = vrot.lane.b32.xlu2 %v736_v3, %s3380_s13 }
 0x1c5   :  { %v743_v40 = vpop.f32.mrf.mxu1 }
 0x1c6   :  { %v821_v20 = vpop.f32.mrf.mxu2  ;;  %v744_v45 = vadd.f32 %v743_v40, %v3791_v4 }
 0x1c7   :  { %v922_v15 = vpop.f32.mrf.mxu3  ;;  %v822_v39 = vadd.f32 %v821_v20, %v3871_v58  ;;  %v3973_v58 = vpop.permute.xlu1 %1254  ;;  %v4022_v20 = vld [vmem:[%s4919_s2 + $0x28] sm:$0xff] }
 0x1c8   :  { %v923_v19 = vadd.f32 %v922_v15, %v3922_v46  ;;  %v3969_v49 = vpop.permute.xlu2 %1007  ;;  %v741_v46 = vadd.f32 %v740_v14, %v3832_v0 }
 0x1ca   :  { %1077 = vrot.lane.b32.xlu0 %v822_v39, %s3379_s12  ;;  %1109 = vrot.lane.b32.xlu1 %v923_v19, %s3381_s14 }
 0x1cc   :  { %1075 = vrot.lane.b32.xlu2 %v820_v16, %s3379_s12 }
 0x1cd   :  { %v745_v55 = vpop.f32.mrf.mxu1 }
 0x1ce   :  { %v824_v61 = vpop.f32.mrf.mxu2  ;;  %v746_v41 = vadd.f32 %v745_v55, %v3838_v17 }
 0x1cf   :  { %v925_v5 = vpop.f32.mrf.mxu3  ;;  %v3986_v0 = vpop.permute.xlu1 %1298 }
 0x1d0   :  { %v926_v56 = vadd.f32 %v925_v5, %v3873_v23  ;;  %v825_v23 = vadd.f32 %v824_v61, %v3851_v38  ;;  %v370_v38 = vadd.f32 %v3884_v42, %v3661_v18  ;;  %v4044_v61 = vld [vmem:[%s4919_s2 + $0x20] sm:$0xff]  ;;  %v385_v5 = vadd.f32 %v3924_v11, %v3942_v35  ;;  %v4062_v11 = vld [vmem:[%s4919_s2 + $0x8] sm:$0xff]  ;;  %v4068_v35 = vld [vmem:[%s4919_s2 + $0x18] sm:$0xff] }
 0x1d2   :  { %1111 = vrot.lane.b32.xlu0 %v926_v56, %s3381_s14  ;;  %1047 = vrot.lane.b32.xlu1 %v744_v45, %s3380_s13 }
 0x1d4   :  { %1045 = vrot.lane.b32.xlu2 %v741_v46, %s3380_s13 }
 0x1d5   :  { %v748_v52 = vpop.f32.mrf.mxu1 }
 0x1d6   :  { %v978_v63 = vpop.permute.xlu2 %977  ;;  %v826_v48 = vpop.f32.mrf.mxu2 }
 0x1d7   :  { %v927_v22 = vpop.f32.mrf.mxu3  ;;  %v827_v47 = vadd.f32 %v826_v48, %v3819_v21  ;;  %v749_v21 = vadd.f32 %v748_v52, %v3817_v26 }
 0x1d8   :  { %v928_v4 = vadd.f32 %v927_v22, %v3869_v54 }
 0x1da   :  { %1081 = vrot.lane.b32.xlu0 %v827_v47, %s3379_s12  ;;  %1113 = vrot.lane.b32.xlu1 %v928_v4, %s3381_s14 }
 0x1dc   :  { %1079 = vrot.lane.b32.xlu2 %v825_v23, %s3379_s12  ;;  %v4079_v23 = vld [vmem:[%s4919_s2] sm:$0xff] }
 0x1dd   :  { %v750_v14 = vpop.f32.mrf.mxu1 }
 0x1de   :  { %v3989_v37 = vpop.permute.xlu2 %1011  ;;  %v829_v6 = vpop.f32.mrf.mxu2  ;;  %v751_v3 = vadd.f32 %v750_v14, %v3769_v57  ;;  %v4035_v57 = vld [vmem:[%s4919_s2 + $0x10] sm:$0xff] }
 0x1df   :  { %v930_v32 = vpop.f32.mrf.mxu3  ;;  %v830_v17 = vadd.f32 %v829_v6, %v3750_v10  ;;  %v375_v10 = vadd.f32 %v3893_v9, %v3718_v8  ;;  %v4943_v9 = vld [vmem:[#allocation5_spill] sm:$0xff] }
 0x1e0   :  { %v931_v54 = vadd.f32 %v930_v32, %v3815_v34  ;;  %v377_v19 = vadd.f32 %v3899_v7, %v4943_v9 }
 0x1e2   :  { %1115 = vrot.lane.b32.xlu0 %v931_v54, %s3381_s14  ;;  %1051 = vrot.lane.b32.xlu1 %v749_v21, %s3380_s13 }
 0x1e3   :  { %v944_v12 = vpop.permute.xlu0 %943 }
 0x1e4   :  { %v3998_v59 = vpop.permute.xlu1 %975  ;;  %v4001_v28 = vsel %vm1127_vm11, %v370_v38, %v944_v12  ;;  %1049 = vrot.lane.b32.xlu2 %v746_v41, %s3380_s13  ;;  %v387_v41 = vadd.f32 %v3931_v2, %v3961_v62 }
 0x1e6   :  { %v982_v26 = vpop.permute.xlu2 %981  ;;  %v831_v34 = vpop.f32.mrf.mxu2 }
 0x1e7   :  { %v932_v51 = vpop.f32.mrf.mxu3  ;;  %v832_v33 = vadd.f32 %v831_v34, %v3771_v50 }
 0x1e8   :  { %v933_v18 = vadd.f32 %v932_v51, %v3781_v25 }
 0x1ea   :  { %1085 = vrot.lane.b32.xlu0 %v832_v33, %s3379_s12  ;;  %1117 = vrot.lane.b32.xlu1 %v933_v18, %s3381_s14 }
 0x1eb   :  { %v1010_v42 = vpop.permute.xlu0 %1009 }
 0x1ec   :  { %v946_v30 = vpop.permute.xlu1 %945  ;;  %1083 = vrot.lane.b32.xlu2 %v830_v17, %s3379_s12 }
 0x1ed   :  { %v1129_v44 = vsel %vm1127_vm11, %v3889_v13, %v946_v30 }
 0x1ee   :  { %v1138_v1 = vsel %vm1136_vm12, %v1129_v44, %v978_v63  ;;  %v1016_v50 = vpop.permute.xlu2 %1015  ;;  %v380_v63 = vadd.f32 %v3906_v60, %v3736_v36 }
 0x1ef   :  { %v4014_v25 = vsel %vm1145_vm13, %v1138_v1, %v1010_v42 }
 0x1f2   :  { %1290 = vperm.xlu0 %2995, %v4022_v20   ;;  %1250 = vperm.xlu1 %2997, %v4022_v20  }
 0x1f3   :  { %v948_v13 = vpop.permute.xlu0 %947 }
 0x1f4   :  { %v4026_v15 = vpop.permute.xlu1 %979  ;;  %v4029_v39 = vsel %vm1127_vm11, %v375_v10, %v948_v13  ;;  %1053 = vrot.lane.b32.xlu2 %v751_v3, %s3380_s13 }
 0x1f6   :  { %v986_v8 = vpop.permute.xlu2 %985 }
 0x1fa   :  { %1278 = vperm.xlu0 %2995, %v4035_v57   ;;  %1238 = vperm.xlu1 %2997, %v4035_v57  }
 0x1fb   :  { %v1014_v40 = vpop.permute.xlu0 %1013 }
 0x1fc   :  { %v950_v16 = vpop.permute.xlu1 %949  ;;  %1286 = vperm.xlu2 %2998, %v4044_v61  }
 0x1fd   :  { %v1131_v45 = vsel %vm1127_vm11, %v377_v19, %v950_v16 }
 0x1fe   :  { %v1140_v56 = vsel %vm1136_vm12, %v1131_v45, %v982_v26  ;;  %v956_v46 = vpop.permute.xlu2 %955 }
 0x1ff   :  { %v4052_v55 = vsel %vm1145_vm13, %v1140_v56, %v1014_v40  ;;  %v1134_v7 = vsel %vm1127_vm11, %v385_v5, %v956_v46 }
 0x202   :  { %3001 = vset.pattern.permute.xlu0 %v3374_v29  ;;  %3000 = vset.pattern.permute.xlu1 %v3375_v43 }
 0x203   :  { %1234 = vperm.xlu0 %3001, %v4062_v11   ;;  %1282 = vperm.xlu1 %3000, %v4068_v35   ;;  %v952_v48 = vpop.permute.xlu0 %951 }
 0x204   :  { %v984_v36 = vpop.permute.xlu1 %983  ;;  %v1132_v60 = vsel %vm1127_vm11, %v380_v63, %v952_v48  ;;  %2999 = vset.pattern.permute.xlu2 %v3374_v29 }
 0x205   :  { %v1141_v22 = vsel %vm1136_vm12, %v1132_v60, %v984_v36  ;;  %1242 = vperm.xlu2 %2999, %v4068_v35  }
 0x206   :  { %v1022_v47 = vpop.permute.xlu2 %1021  ;;  %v1150_v4 = vsel %vm1145_vm13, %v1141_v22, %v1016_v50 }
 0x20b   :  { %1270 = vperm.xlu1 %3000, %v4079_v23   ;;  %v1018_v21 = vpop.permute.xlu0 %1017 }
 0x20c   :  { %v954_v52 = vpop.permute.xlu1 %953 }
 0x20d   :  { %v1133_v6 = vsel %vm1127_vm11, %v3914_v31, %v954_v52  ;;  %1230 = vperm.xlu2 %2999, %v4079_v23  }
 0x20e   :  { %v1142_v29 = vsel %vm1136_vm12, %v1133_v6, %v986_v8  ;;  %v990_v32 = vpop.permute.xlu2 %989 }
 0x214   :  { %v1020_v54 = vpop.permute.xlu1 %1019 }
 0x215   :  { %3002 = vset.pattern.permute.xlu2 %v3375_v43  ;;  %v1137_v43 = vsel %vm1136_vm12, %v4001_v28, %v3998_v59 }
 0x216   :  { %v1104_v38 = vpop.permute.xlu2 %1103  ;;  %1274 = vperm.xlu2 %3002, %v4062_v11   ;;  %v1146_v42 = vsel %vm1145_vm13, %v1137_v43, %v3969_v49 }
 0x21b   :  { %v958_v12 = vpop.permute.xlu0 %957 }
 0x21c   :  { %v988_v26 = vpop.permute.xlu1 %987  ;;  %v1135_v34 = vsel %vm1127_vm11, %v387_v41, %v958_v12 }
 0x21d   :  { %v1143_v31 = vsel %vm1136_vm12, %v1134_v7, %v988_v26  ;;  %v1144_v51 = vsel %vm1136_vm12, %v1135_v34, %v990_v32  ;;  %v1151_v7 = vsel %vm1145_vm13, %v1142_v29, %v1018_v21 }
 0x21e   :  { %v1042_v33 = vpop.permute.xlu2 %1041  ;;  %v1153_v18 = vsel %vm1145_vm13, %v1144_v51, %v1022_v47  ;;  %v1152_v17 = vsel %vm1145_vm13, %v1143_v31, %v1020_v54 }
 0x21f   :  { %v1156_v14 = vsel %vm1154_vm15, %v4014_v25, %v1042_v33 }
 0x223   :  { %v1072_v2 = vpop.permute.xlu0 %1071 }
 0x224   :  { %v1040_v62 = vpop.permute.xlu1 %1039 }
 0x225   :  { %v1155_v30 = vsel %vm1154_vm15, %v1146_v42, %v1040_v62 }
 0x226   :  { %v1164_v44 = vsel %vm1163_vm14, %v1155_v30, %v1072_v2  ;;  %v1076_v1 = vpop.permute.xlu2 %1075 }
 0x227   :  { %v4103_v50 = vsel %vm1172_vm0, %v1164_v44, %v1104_v38 }
 0x228   :  { %vm1181_vm8 = vcmp.gt.f32.partialorder %v4103_v50, 0.0 }
 0x22c   :  { %v1106_v59 = vpop.permute.xlu0 %1105  ;;  %v1074_v28 = vpop.permute.xlu1 %1073 }
 0x22d   :  { %v1165_v10 = vsel %vm1163_vm14, %v1156_v14, %v1074_v28 }
 0x22e   :  { %v1046_v3 = vpop.permute.xlu2 %1045  ;;  %v4109_v13 = vsel %vm1172_vm0, %v1165_v10, %v1106_v59 }
 0x22f   :  { %vm1182_vm7 = vcmp.gt.f32.partialorder %v4109_v13, 0.0 }
 0x234   :  { %v1108_v49 = vpop.permute.xlu0 %1107  ;;  %v1044_v8 = vpop.permute.xlu1 %1043 }
 0x236   :  { %v1080_v9 = vpop.permute.xlu2 %1079 }
 0x23c   :  { %v1078_v19 = vpop.permute.xlu0 %1077  ;;  %v1110_v40 = vpop.permute.xlu1 %1109 }
 0x23e   :  { %v1050_v16 = vpop.permute.xlu2 %1049 }
 0x23f   :  { %v1160_v36 = vsel %vm1154_vm15, %v1151_v7, %v1050_v16  ;;  %v1190_v7 = vmin.f32 %v4109_v13, 0.0 }
 0x244   :  { %v1112_v5 = vpop.permute.xlu0 %1111  ;;  %v1048_v45 = vpop.permute.xlu1 %1047 }
 0x245   :  { %v1159_v56 = vsel %vm1154_vm15, %v1150_v4, %v1048_v45  ;;  %v1139_v4 = vsel %vm1136_vm12, %v4029_v39, %v4026_v15  ;;  %v1158_v15 = vsel %vm1154_vm15, %v4052_v55, %v1046_v3 }
 0x246   :  { %v1168_v25 = vsel %vm1163_vm14, %v1159_v56, %v1080_v9  ;;  %v1084_v63 = vpop.permute.xlu2 %1083  ;;  %v1148_v54 = vsel %vm1145_vm13, %v1139_v4, %v3989_v37  ;;  %v1167_v37 = vsel %vm1163_vm14, %v1158_v15, %v1078_v19 }
 0x247   :  { %v1177_v46 = vsel %vm1172_vm0, %v1168_v25, %v1112_v5  ;;  %v1157_v29 = vsel %vm1154_vm15, %v1148_v54, %v1044_v8 }
 0x248   :  { %v1193_v48 = vmin.f32 %v1177_v46, 0.0  ;;  %v1166_v34 = vsel %vm1163_vm14, %v1157_v29, %v1076_v1  ;;  %vm1185_vm1 = vcmp.gt.f32.partialorder %v1177_v46, 0.0 }
 0x249   :  { %v4132_v43 = vsel %vm1172_vm0, %v1166_v34, %v1108_v49 }
 0x24a   :  { %v1205_v32 = vmul.f32 1.442695, %v1193_v48  ;;  %v1191_v44 = vmin.f32 %v4132_v43, 0.0  ;;  %vm1183_vm5 = vcmp.gt.f32.partialorder %v4132_v43, 0.0 }
 0x24c   :  { %v1082_v60 = vpop.permute.xlu0 %1081  ;;  %v1114_v22 = vpop.permute.xlu1 %1113  ;;  %3280 = vpow2.f32 %v1205_v32  ;;  %v1201_v9 = vmul.f32 1.442695, %v1191_v44 }
 0x24d   :  { %v1169_v47 = vsel %vm1163_vm14, %v1160_v36, %v1082_v60 }
 0x24e   :  { %v1178_v52 = vsel %vm1172_vm0, %v1169_v47, %v1114_v22  ;;  %v1054_v12 = vpop.permute.xlu2 %1053  ;;  %v1199_v22 = vmul.f32 1.442695, %v1190_v7 }
 0x24f   :  { %v1194_v6 = vmin.f32 %v1178_v52, 0.0  ;;  %v1162_v62 = vsel %vm1154_vm15, %v1153_v18, %v1054_v12  ;;  %vm1186_vm2 = vcmp.gt.f32.partialorder %v1178_v52, 0.0 }
 0x251   :  { %v1207_v21 = vmul.f32 1.442695, %v1194_v6 }
 0x252   :  { %v3281_v33 = vpop.eup %3280 }
 0x253   :  { %3282 = vpow2.f32 %v1207_v21  ;;  %v2697_v42 = vadd.f32 -1.0, %v3281_v33 }
 0x254   :  { %v1116_v38 = vpop.permute.xlu0 %1115  ;;  %v1052_v41 = vpop.permute.xlu1 %1051 }
 0x255   :  { %v1161_v26 = vsel %vm1154_vm15, %v1152_v17, %v1052_v41  ;;  %v4135_v17 = vsel %vm1172_vm0, %v1167_v37, %v1110_v40  ;;  %v1225_v49 = vsel %vm1185_vm1, %v1177_v46, %v2697_v42  ;;  %v1189_v46 = vmin.f32 %v4103_v50, 0.0  ;;  %vm4178_vm1 = vmpackc.low %vm2745_vm9, %vm2745_vm9 }
 0x256   :  { %v1170_v31 = vsel %vm1163_vm14, %v1161_v26, %v1084_v63  ;;  %v1192_v59 = vmin.f32 %v4135_v17, 0.0  ;;  %v1287_v10 = vpop.permute.xlu2 %1286  ;;  %v1265_v16 = vmul.f32 %v3958_v27, %v1225_v49  ;;  %vm1184_vm6 = vcmp.gt.f32.partialorder %v4135_v17, 0.0 }
 0x257   :  { %v1179_v39 = vsel %vm1172_vm0, %v1170_v31, %v1116_v38  ;;  %v1197_v29 = vmul.f32 1.442695, %v1189_v46  ;;  %v3385_v46 = vmov 14  }
 0x258   :  { %v1195_v51 = vmin.f32 %v1179_v39, 0.0  ;;  %v1203_v40 = vmul.f32 1.442695, %v1192_v59  ;;  %vm1187_vm3 = vcmp.gt.f32.partialorder %v1179_v39, 0.0  ;;  %v1305_v48 = vadd.f32 %v1287_v10, %v1265_v16  ;;  %v3333_v16 = vld [vmem:[%s4919_s2 + $0x30] sm:$0xff] }
 0x259   :  { %v3283_v1 = vpop.eup %3282 }
 0x25a   :  { %v1209_v2 = vmul.f32 1.442695, %v1195_v51  ;;  %v2698_v8 = vadd.f32 -1.0, %v3283_v1 }
 0x25c   :  { %3284 = vpow2.f32 %v1209_v2  ;;  %v1086_v30 = vpop.permute.xlu0 %1085  ;;  %v1118_v55 = vpop.permute.xlu1 %1117  ;;  %v1226_v25 = vsel %vm1186_vm2, %v1178_v52, %v2698_v8  ;;  %vm4195_vm2 = vmpackc.low %vm1172_vm0, %vm1172_vm0 }
 0x25d   :  { %v1171_v14 = vsel %vm1163_vm14, %v1162_v62, %v1086_v30 }
 0x25e   :  { %v1180_v28 = vsel %vm1172_vm0, %v1171_v14, %v1118_v55 }
 0x25f   :  { %v1196_v3 = vmin.f32 %v1180_v28, 0.0  ;;  %v1243_v27 = vpop.permute.xlu2 %1242  ;;  %vm1188_vm4 = vcmp.gt.f32.partialorder %v1180_v28, 0.0 }
 0x261   :  { %v1211_v18 = vmul.f32 1.442695, %v1196_v3 }
 0x262   :  { %v3285_v19 = vpop.eup %3284 }
 0x263   :  { %3286 = vpow2.f32 %v1211_v18  ;;  %v2699_v5 = vadd.f32 -1.0, %v3285_v19 }
 0x264   :  { %v1291_v45 = vpop.permute.xlu0 %1290  ;;  %v1251_v56 = vpop.permute.xlu1 %1250  ;;  %3288 = vpow2.f32 %v1201_v9 }
 0x265   :  { %v1266_v63 = vmul.f32 %v1251_v56, %v1226_v25  ;;  %3290 = vpow2.f32 %v1203_v40  ;;  %v1227_v60 = vsel %vm1187_vm3, %v1179_v39, %v2699_v5 }
 0x266   :  { %v1267_v52 = vmul.f32 %v3973_v58, %v1227_v60  ;;  %3292 = vpow2.f32 %v1199_v22 }
 0x267   :  { %v1306_v36 = vadd.f32 %v1291_v45, %v1266_v63  ;;  %3294 = vpow2.f32 %v1197_v29  ;;  %v1231_v62 = vpop.permute.xlu2 %1230  ;;  %v3384_v63 = vmov 13  }
 0x268   :  { %v1307_v31 = vadd.f32 %v3981_v53, %v1267_v52 }
 0x269   :  { %v3287_v47 = vpop.eup %3286  ;;  %v3013_v4 = vpack.i.bf16 %v1306_v36, %v1305_v48  ;;  %v1395_v6 = vpack.c.bf16 %v1306_v36, %v1305_v48 }
 0x26a   :  { %v3289_v32 = vpop.eup %3288  ;;  %v2700_v54 = vadd.f32 -1.0, %v3287_v47 }
 0x26b   :  { %3004 = vrot.lane.b32.xlu0 %v3013_v4, %s3382_s26  ;;  %v3291_v21 = vpop.eup %3290  ;;  %v2695_v34 = vadd.f32 -1.0, %v3289_v32 }
 0x26c   :  { %v1228_v38 = vsel %vm1188_vm4, %v1180_v28, %v2700_v54  ;;  %v1239_v41 = vpop.permute.xlu1 %1238  ;;  %v1279_v26 = vpop.permute.xlu0 %1278  ;;  %v2696_v39 = vadd.f32 -1.0, %v3291_v21 }
 0x26d   :  { %v1268_v12 = vmul.f32 %v3949_v24, %v1228_v38  ;;  %v1223_v58 = vsel %vm1183_vm5, %v4132_v43, %v2695_v34  ;;  %v3293_v33 = vpop.eup %3292 }
 0x26e   :  { %v1263_v2 = vmul.f32 %v1239_v41, %v1223_v58  ;;  %v1224_v24 = vsel %vm1184_vm6, %v4135_v17, %v2696_v39  ;;  %v3295_v53 = vpop.eup %3294  ;;  %v2694_v42 = vadd.f32 -1.0, %v3293_v33 }
 0x26f   :  { %v1308_v15 = vadd.f32 %v3986_v0, %v1268_v12  ;;  %v1264_v0 = vmul.f32 %v1243_v27, %v1224_v24  ;;  %v2693_v44 = vadd.f32 -1.0, %v3295_v53  ;;  %v2881_v24 = vld [vmem:[#allocation2 + $0x18] sm:$0xf] }
 0x270   :  { %v1303_v55 = vadd.f32 %v1279_v26, %v1263_v2  ;;  %v1222_v17 = vsel %vm1182_vm7, %v4109_v13, %v2694_v42  ;;  %v1275_v3 = vpop.permute.xlu2 %1274  ;;  %v3383_v13 = vmov 12   ;;  %v2882_v2 = vld [vmem:[#allocation2 + $0x3c] sm:$0xf0] }
 0x271   :  { %v3018_v37 = vpack.i.bf16 %v1308_v15, %v1307_v31  ;;  %v1396_v51 = vpack.c.bf16 %v1308_v15, %v1307_v31  ;;  %v1221_v10 = vsel %vm1181_vm8, %v4103_v50, %v2693_v44  ;;  %3044 = vset.pattern.permute.xlu1 %v3383_v13  ;;  %3045 = vset.pattern.permute.xlu2 %v3383_v13  ;;  %v3332_v50 = vld [vmem:[%s4919_s2 + $0x38] sm:$0xff] }
 0x272   :  { %v1261_v49 = vmul.f32 %v1231_v62, %v1221_v10  ;;  %3043 = vset.pattern.permute.xlu0 %v3383_v13  ;;  %v2705_v62 = vld [vmem:[#allocation2 + $0x40] sm:$0xf0]  ;;  %v2713_v44 = vld [vmem:[#allocation2 + $0x98] sm:$0xf0]  ;;  %v2721_v10 = vld [vmem:[#allocation2 + $0xf0] sm:$0xf0] }
 0x273   :  { %3019 = vrot.lane.b32.xlu2 %v3018_v37, %s3377_s10  ;;  %3009 = vrot.lane.b32.xlu1 %v3018_v37, %s3382_s26 }
 0x274   :  { %1481 = vmatpush.bf16.msra.mxu0 %v1396_v51 }
 0x275   :  { %v1283_v30 = vpop.permute.xlu1 %1282  ;;  %v1235_v1 = vpop.permute.xlu0 %1234 }
 0x276   :  { %v1304_v43 = vadd.f32 %v1283_v30, %v1264_v0  ;;  %v1262_v28 = vmul.f32 %v1235_v1, %v1222_v17  ;;  %v2708_v30 = vor.u32 %v2881_v24, %v2705_v62  ;;  %v2886_v17 = vld [vmem:[#allocation2 + $0xec] sm:$0xf0] }
 0x278   :  { %v3023_v14 = vpack.i.bf16 %v1304_v43, %v1303_v55  ;;  %1482 = vmatpush.bf16.msra.mxu0 %v1395_v6  ;;  %v1394_v59 = vpack.c.bf16 %v1304_v43, %v1303_v55  ;;  %v1302_v9 = vadd.f32 %v1275_v3, %v1262_v28  ;;  %v2884_v55 = vld [vmem:[#allocation2 + $0x94] sm:$0xf0]  ;;  %v2883_v43 = vld [vmem:[#allocation2 + $0x70] sm:$0xf]  ;;  %v2885_v28 = vld [vmem:[#allocation2 + $0xc8] sm:$0xf] }
 0x279   :  { %v2724_v3 = vor.u32 %v2885_v28, %v2721_v10 }
 0x27a   :  { %3029 = vrot.lane.b32.xlu0 %v3023_v14, %s3377_s10 }
 0x27b   :  { %3014 = vrot.lane.b32.xlu1 %v3013_v4, %s3377_s10  ;;  %3024 = vrot.lane.b32.xlu2 %v3023_v14, %s3382_s26  ;;  %v2716_v14 = vor.u32 %v2883_v43, %v2713_v44 }
 0x27c   :  { %1483 = vmatpush.bf16.msra.mxu0 %v1394_v59  ;;  %v2719_v59 = vld [vmem:[#allocation2 + $0xc4] sm:$0xf] }
 0x27d   :  { %v1271_v8 = vpop.permute.xlu1 %1270 }
 0x27e   :  { %v1301_v18 = vadd.f32 %v1271_v8, %v1261_v49  ;;  %v2727_v49 = vld [vmem:[#allocation2 + $0x11c] sm:$0xf]  ;;  %v2888_v8 = vld [vmem:[#allocation2 + $0x144] sm:$0xf0] }
 0x280   :  { %v3038_v19 = vpack.i.bf16 %v1302_v9, %v1301_v18  ;;  %v1393_v40 = vpack.c.bf16 %v1302_v9, %v1301_v18  ;;  %v2887_v9 = vld [vmem:[#allocation2 + $0x120] sm:$0xf]  ;;  %v2729_v18 = vld [vmem:[#allocation2 + $0x148] sm:$0xf0] }
 0x282   :  { %1484 = vmatpush.bf16.msra.mxu0 %v1393_v40  ;;  %1426 = vperm.xlu0 %3043, %v3333_v16  }
 0x283   :  { %3039 = vrot.lane.b32.xlu2 %v3038_v19, %s3377_s10  ;;  %3034 = vrot.lane.b32.xlu1 %v3038_v19, %s3382_s26  ;;  %v2728_v19 = vor.u32 %v2888_v8, %v2727_v49 }
 0x28a   :  { %1414 = vperm.xlu0 %3043, %v4068_v35  }
 0x28b   :  { %1430 = vperm.xlu1 %3044, %v3332_v50   ;;  %1418 = vperm.xlu2 %3045, %v4044_v61  }
 0x292   :  { %3046 = vset.pattern.permute.xlu0 %v3384_v63 }
 0x293   :  { %1422 = vperm.xlu1 %3044, %v4022_v20   ;;  %1410 = vperm.xlu2 %3045, %v4035_v57  }
 0x294   :  { %1612 = vperm.xlu0 %3046, %v3333_v16  }
 0x29b   :  { %1402 = vperm.xlu1 %3044, %v4079_v23   ;;  %1406 = vperm.xlu2 %3045, %v4062_v11  }
 0x29c   :  { %1608 = vperm.xlu0 %3046, %v4022_v20  }
 0x2a3   :  { %3047 = vset.pattern.permute.xlu1 %v3384_v63  ;;  %3048 = vset.pattern.permute.xlu2 %v3385_v46 }
 0x2a4   :  { %1616 = vperm.xlu1 %3047, %v3332_v50   ;;  %1652 = vperm.xlu2 %3048, %v3333_v16  }
 0x2a5   :  { %1596 = vperm.xlu0 %3046, %v4035_v57  }
 0x2ac   :  { %3049 = vset.pattern.permute.xlu1 %v3385_v46  ;;  %3050 = vset.pattern.permute.xlu2 %v3384_v63 }
 0x2ad   :  { %1656 = vperm.xlu1 %3049, %v3332_v50   ;;  %1604 = vperm.xlu2 %3050, %v4044_v61  }
 0x2ae   :  { %3053 = vset.pattern.permute.xlu0 %v3385_v46 }
 0x2af   :  { %1640 = vperm.xlu0 %3053, %v4068_v35  }
 0x2b5   :  { %1644 = vperm.xlu1 %3049, %v4044_v61   ;;  %3051 = vset.pattern.permute.xlu2 %v3385_v46 }
 0x2b6   :  { %1648 = vperm.xlu2 %3051, %v4022_v20  }
 0x2bd   :  { %3052 = vset.pattern.permute.xlu1 %v3384_v63 }
 0x2be   :  { %1600 = vperm.xlu1 %3052, %v4068_v35   ;;  %1636 = vperm.xlu2 %3051, %v4035_v57   ;;  %v2703_v35 = vld [vmem:[#allocation2 + $0x14] sm:$0xf]  ;;  %v2711_v57 = vld [vmem:[#allocation2 + $0x6c] sm:$0xf] }
 0x2bf   :  { %v2704_v42 = vor.u32 %v2882_v2, %v2703_v35  ;;  %v2712_v1 = vor.u32 %v2884_v55, %v2711_v57 }
 0x2c6   :  { %1588 = vperm.xlu1 %3052, %v4079_v23   ;;  %3054 = vset.pattern.permute.xlu2 %v3384_v63 }
 0x2c7   :  { %1592 = vperm.xlu2 %3054, %v4062_v11  }
 0x2cd   :  { %v3020_v5 = vpop.permute.xlu2 %3019 }
 0x2ce   :  { %v3022_v45 = vunpack.i.h.bf16 %v3020_v5  ;;  %v3021_v56 = vunpack.i.l.bf16 %v3020_v5  ;;  %3055 = vset.pattern.permute.xlu1 %v3385_v46 }
 0x2cf   :  { %1628 = vperm.xlu1 %3055, %v4079_v23   ;;  %3056 = vset.pattern.permute.xlu2 %v3385_v46  ;;  %v2720_v23 = vor.u32 %v2886_v17, %v2719_v59 }
 0x2d0   :  { %v2748_v7 = vpack.c.bf16 %v3022_v45, %v3021_v56  ;;  %1632 = vperm.xlu2 %3056, %v4062_v11   ;;  %v2732_v11 = vor.u32 %v2887_v9, %v2729_v18 }
 0x2d2   :  { %2749 = vmatpush.bf16.msk.msra.mxu1 %vm4178_vm1, %v2748_v7 }
 0x2d5   :  { %v3025_v47 = vpop.permute.xlu2 %3024 }
 0x2d6   :  { %v3027_v61 = vunpack.i.h.bf16 %v3025_v47  ;;  %v3026_v54 = vunpack.i.l.bf16 %v3025_v47 }
 0x2d8   :  { %v2740_v12 = vpack.c.bf16 %v3027_v61, %v3026_v54 }
 0x2dd   :  { %v3005_v48 = vpop.permute.xlu0 %3004  ;;  %v3040_v15 = vpop.permute.xlu2 %3039 }
 0x2de   :  { %v3007_v4 = vunpack.i.h.bf16 %v3005_v48  ;;  %v3006_v6 = vunpack.i.l.bf16 %v3005_v48  ;;  %v3042_v20 = vunpack.i.h.bf16 %v3040_v15  ;;  %v3041_v39 = vunpack.i.l.bf16 %v3040_v15 }
 0x2e0   :  { %v2737_v29 = vpack.c.bf16 %v3007_v4, %v3006_v6  ;;  %v2763_v53 = vpack.c.bf16 %v3042_v20, %v3041_v39 }
 0x2e5   :  { %v3010_v36 = vpop.permute.xlu1 %3009  ;;  %v4233_v13 = vpop.permute.xlu2 %1418 }
 0x2e6   :  { %v3012_v60 = vunpack.i.h.bf16 %v3010_v36  ;;  %v3011_v22 = vunpack.i.l.bf16 %v3010_v36 }
 0x2e8   :  { %v2734_v32 = vpack.c.bf16 %v3012_v60, %v3011_v22 }
 0x2ea   :  { %2735 = vmatpush.bf16.msk.msra.mxu0 %vm4195_vm2, %v2734_v32 }
 0x2ec   :  { %v3030_v52 = vpop.permute.xlu0 %3029 }
 0x2ed   :  { %v3015_v21 = vpop.permute.xlu1 %3014  ;;  %v3032_v26 = vunpack.i.h.bf16 %v3030_v52  ;;  %v3031_v34 = vunpack.i.l.bf16 %v3030_v52  ;;  %v1411_v16 = vpop.permute.xlu2 %1410 }
 0x2ee   :  { %v3017_v38 = vunpack.i.h.bf16 %v3015_v21  ;;  %v3016_v41 = vunpack.i.l.bf16 %v3015_v21  ;;  %2738 = vmatpush.bf16.msk.msra.mxu0 %vm4195_vm2, %v2737_v29 }
 0x2ef   :  { %v2758_v58 = vpack.c.bf16 %v3032_v26, %v3031_v34 }
 0x2f0   :  { %v2753_v31 = vpack.c.bf16 %v3017_v38, %v3016_v41 }
 0x2f2   :  { %2741 = vmatpush.bf16.msk.msra.mxu0 %vm4195_vm2, %v2740_v12  ;;  %2754 = vmatpush.bf16.msk.msra.mxu1 %vm4178_vm1, %v2753_v31 }
 0x2f4   :  { %v4245_v48 = vpop.permute.xlu0 %1426 }
 0x2f5   :  { %v3035_v37 = vpop.permute.xlu1 %3034  ;;  %v1407_v45 = vpop.permute.xlu2 %1406 }
 0x2f6   :  { %v3037_v51 = vunpack.i.h.bf16 %v3035_v37  ;;  %v3036_v33 = vunpack.i.l.bf16 %v3035_v37  ;;  %2759 = vmatpush.bf16.msk.msra.mxu1 %vm4178_vm1, %v2758_v58 }
 0x2f8   :  { %v2743_v0 = vpack.c.bf16 %v3037_v51, %v3036_v33 }
 0x2fa   :  { %2764 = vmatpush.bf16.msk.msra.mxu1 %vm4178_vm1, %v2763_v53  ;;  %2744 = vmatpush.bf16.msk.msra.mxu0 %vm4195_vm2, %v2743_v0 }
 0x2fc   :  { %v1415_v6 = vpop.permute.xlu0 %1414 }
 0x2fd   :  { %1489 = vmatmul.bf16.vlgmr.msra.gmra.mxu0 %v2704_v42  ;;  %2765 = vmatmul.msk.bf16.vlgmr.msra.gmra.mxu1 %vm347_vm10, %v2708_v30  ;;  %v4231_v40 = vpop.permute.xlu1 %1430 }
 0x2fe   :  { %v4239_v7 = vpop.permute.xlu2 %1652 }
 0x305   :  { %v4235_v50 = vpop.permute.xlu1 %1422 }
 0x306   :  { %v4255_v26 = vpop.permute.xlu0 %1612 }
 0x307   :  { %v4243_v46 = vpop.permute.xlu2 %1604 }
 0x30d   :  { %1494 = vmatmul.bf16.gmra.mxu0 %v2712_v1  ;;  %2766 = vmatmul.msk.bf16.gmra.mxu1 %vm347_vm10, %v2716_v14  ;;  %v1403_v5 = vpop.permute.xlu1 %1402 }
 0x30e   :  { %v4257_v53 = vpop.permute.xlu0 %1608 }
 0x310   :  { %v4249_v60 = vpop.permute.xlu2 %1648 }
 0x316   :  { %v4237_v56 = vpop.permute.xlu1 %1616 }
 0x318   :  { %v4253_v54 = vpop.permute.xlu2 %1636 }
 0x31d   :  { %1499 = vmatmul.bf16.gmra.mxu0 %v2720_v23  ;;  %2767 = vmatmul.msk.bf16.gmra.mxu1 %vm347_vm10, %v2724_v3 }
 0x31f   :  { %v4241_v63 = vpop.permute.xlu1 %1656 }
 0x321   :  { %v1593_v20 = vpop.permute.xlu2 %1592 }
 0x327   :  { %v4247_v36 = vpop.permute.xlu1 %1644 }
 0x32a   :  { %v1633_v1 = vpop.permute.xlu2 %1632 }
 0x32d   :  { %1504 = vmatmul.bf16.gmra.mxu0 %v2728_v19  ;;  %2768 = vmatmul.msk.bf16.gmra.mxu1 %vm347_vm10, %v2732_v11  ;;  %v1597_v19 = vpop.permute.xlu0 %1596 }
 0x330   :  { %v4251_v61 = vpop.permute.xlu1 %1600 }
 0x338   :  { %v1589_v15 = vpop.permute.xlu1 %1588 }
 0x341   :  { %v1629_v44 = vpop.permute.xlu1 %1628 }
 0x37a   :  { %v1490_v22 = vpop.f32.mrf.mxu0  ;;  %v1519_v47 = vpop.f32.mrf.mxu1 }
 0x37b   :  { %v1491_v27 = vadd.f32 %v1490_v22, %v1403_v5 }
 0x37d   :  { %v1520_v4 = vadd.f32 %v1519_v47, %v1491_v27 }
 0x37f   :  { %v1547_v32 = vmin.f32 %v1520_v4, 0.0  ;;  %vm1539_vm3 = vcmp.gt.f32.partialorder %v1520_v4, 0.0 }
 0x381   :  { %v1555_v29 = vmul.f32 1.442695, %v1547_v32 }
 0x382   :  { %v1492_v52 = vpop.f32.mrf.mxu0  ;;  %v1521_v21 = vpop.f32.mrf.mxu1 }
 0x383   :  { %3296 = vpow2.f32 %v1555_v29  ;;  %v1493_v38 = vadd.f32 %v1492_v52, %v1407_v45  ;;  %v1641_v29 = vpop.permute.xlu0 %1640 }
 0x385   :  { %v1522_v41 = vadd.f32 %v1521_v21, %v1493_v38 }
 0x387   :  { %v1548_v12 = vmin.f32 %v1522_v41, 0.0  ;;  %vm1540_vm4 = vcmp.gt.f32.partialorder %v1522_v41, 0.0 }
 0x389   :  { %v3297_v34 = vpop.eup %3296  ;;  %v1557_v31 = vmul.f32 1.442695, %v1548_v12 }
 0x38a   :  { %v1495_v39 = vpop.f32.mrf.mxu0  ;;  %v1524_v58 = vpop.f32.mrf.mxu1  ;;  %v2769_v35 = vadd.f32 -1.0, %v3297_v34 }
 0x38b   :  { %3298 = vpow2.f32 %v1557_v31  ;;  %v1496_v37 = vadd.f32 %v1495_v39, %v1411_v16 }
 0x38c   :  { %v1579_v2 = vsel %vm1539_vm3, %v1520_v4, %v2769_v35  ;;  %vm1867_vm3 = vcmask 457728  }
 0x38d   :  { %v1525_v51 = vadd.f32 %v1524_v58, %v1496_v37  ;;  %v1619_v57 = vmul.f32 %v1589_v15, %v1579_v2 }
 0x38f   :  { %v1549_v33 = vmin.f32 %v1525_v51, 0.0  ;;  %v4259_v17 = vadd.f32 %v1629_v44, %v1619_v57  ;;  %vm1541_vm5 = vcmp.gt.f32.partialorder %v1525_v51, 0.0 }
 0x391   :  { %v3299_v24 = vpop.eup %3298  ;;  %v1559_v62 = vmul.f32 1.442695, %v1549_v33 }
 0x392   :  { %v2770_v0 = vadd.f32 -1.0, %v3299_v24  ;;  %v1497_v42 = vpop.f32.mrf.mxu0  ;;  %v1526_v30 = vpop.f32.mrf.mxu1 }
 0x393   :  { %3300 = vpow2.f32 %v1559_v62  ;;  %v1498_v55 = vadd.f32 %v1497_v42, %v1415_v6 }
 0x394   :  { %v1580_v43 = vsel %vm1540_vm4, %v1522_v41, %v2770_v0  ;;  %vm1884_vm4 = vcmask 588800  }
 0x395   :  { %v1620_v14 = vmul.f32 %v1593_v20, %v1580_v43  ;;  %v1527_v59 = vadd.f32 %v1526_v30, %v1498_v55 }
 0x397   :  { %v1550_v28 = vmin.f32 %v1527_v59, 0.0  ;;  %v4261_v10 = vadd.f32 %v1633_v1, %v1620_v14  ;;  %vm1542_vm6 = vcmp.gt.f32.partialorder %v1527_v59, 0.0 }
 0x399   :  { %v3301_v23 = vpop.eup %3300  ;;  %v1561_v3 = vmul.f32 1.442695, %v1550_v28  ;;  %v4265_v49 = vpack.i.bf16 %v4261_v10, %v4259_v17 }
 0x39a   :  { %v1500_v8 = vpop.f32.mrf.mxu0  ;;  %v1529_v9 = vpop.f32.mrf.mxu1  ;;  %v2771_v11 = vadd.f32 -1.0, %v3301_v23 }
 0x39b   :  { %3302 = vpow2.f32 %v1561_v3  ;;  %v1501_v18 = vadd.f32 %v1500_v8, %v4233_v13  ;;  %3063 = vrot.lane.b32.xlu1 %v4265_v49, %s3378_s11  ;;  %3058 = vrot.lane.b32.xlu0 %v4265_v49, %s3377_s10 }
 0x39c   :  { %v1581_v45 = vsel %vm1541_vm5, %v1525_v51, %v2771_v11  ;;  %vm1893_vm5 = vcmask 654336  }
 0x39d   :  { %v1530_v16 = vadd.f32 %v1529_v9, %v1501_v18  ;;  %v1621_v32 = vmul.f32 %v1597_v19, %v1581_v45  ;;  %v1820_v19 = vsel %vm1127_vm11, %v4261_v10, 0.0 }
 0x39f   :  { %v1551_v5 = vmin.f32 %v1530_v16, 0.0  ;;  %v4275_v41 = vadd.f32 %v4253_v54, %v1621_v32  ;;  %vm1543_vm7 = vcmp.gt.f32.partialorder %v1530_v16, 0.0 }
 0x3a1   :  { %v3303_v22 = vpop.eup %3302  ;;  %v1563_v47 = vmul.f32 1.442695, %v1551_v5  ;;  %v1819_v5 = vsel %vm1127_vm11, %v4259_v17, 0.0 }
 0x3a2   :  { %v2772_v27 = vadd.f32 -1.0, %v3303_v22  ;;  %v1502_v4 = vpop.f32.mrf.mxu0  ;;  %v1531_v6 = vpop.f32.mrf.mxu1 }
 0x3a3   :  { %3304 = vpow2.f32 %v1563_v47  ;;  %v1503_v13 = vadd.f32 %v1502_v4, %v4235_v50 }
 0x3a4   :  { %v1582_v52 = vsel %vm1542_vm6, %v1527_v59, %v2772_v27  ;;  %vm1902_vm6 = vcmask 719872  }
 0x3a5   :  { %v1532_v21 = vadd.f32 %v1531_v6, %v1503_v13  ;;  %v1622_v38 = vmul.f32 %v4251_v61, %v1582_v52  ;;  %v1821_v52 = vsel %vm1127_vm11, %v4275_v41, 0.0 }
 0x3a7   :  { %v1552_v12 = vmin.f32 %v1532_v21, 0.0  ;;  %v4277_v34 = vadd.f32 %v1641_v29, %v1622_v38  ;;  %vm1544_vm8 = vcmp.gt.f32.partialorder %v1532_v21, 0.0 }
 0x3a9   :  { %v3305_v31 = vpop.eup %3304  ;;  %v1565_v15 = vmul.f32 1.442695, %v1552_v12  ;;  %v4281_v20 = vpack.i.bf16 %v4277_v34, %v4275_v41 }
 0x3aa   :  { %v1505_v39 = vpop.f32.mrf.mxu0  ;;  %v1534_v58 = vpop.f32.mrf.mxu1  ;;  %v2773_v61 = vadd.f32 -1.0, %v3305_v31 }
 0x3ab   :  { %3306 = vpow2.f32 %v1565_v15  ;;  %v1506_v50 = vadd.f32 %v1505_v39, %v4245_v48  ;;  %3083 = vrot.lane.b32.xlu2 %v4281_v20, %s3380_s13  ;;  %3078 = vrot.lane.b32.xlu1 %v4281_v20, %s3376_s9 }
 0x3ac   :  { %3068 = vrot.lane.b32.xlu0 %v4281_v20, %s3377_s10  ;;  %v1583_v35 = vsel %vm1543_vm7, %v1530_v16, %v2773_v61  ;;  %vm1911_vm7 = vcmask 785408  }
 0x3ad   :  { %v1535_v54 = vadd.f32 %v1534_v58, %v1506_v50  ;;  %v1623_v48 = vmul.f32 %v4243_v46, %v1583_v35 }
 0x3af   :  { %v1553_v37 = vmin.f32 %v1535_v54, 0.0  ;;  %v4296_v55 = vadd.f32 %v4247_v36, %v1623_v48  ;;  %vm1545_vm9 = vcmp.gt.f32.partialorder %v1535_v54, 0.0 }
 0x3b1   :  { %v3307_v51 = vpop.eup %3306  ;;  %v1567_v33 = vmul.f32 1.442695, %v1553_v37  ;;  %v1823_v31 = vsel %vm1127_vm11, %v4296_v55, 0.0 }
 0x3b2   :  { %v2774_v2 = vadd.f32 -1.0, %v3307_v51  ;;  %v1507_v24 = vpop.f32.mrf.mxu0  ;;  %v1536_v42 = vpop.f32.mrf.mxu1 }
 0x3b3   :  { %3308 = vpow2.f32 %v1567_v33  ;;  %v1508_v62 = vadd.f32 %v1507_v24, %v4231_v40 }
 0x3b4   :  { %v1584_v0 = vsel %vm1544_vm8, %v1532_v21, %v2774_v2  ;;  %3073 = vrot.lane.b32.xlu0 %v4281_v20, %s3378_s11  ;;  %v1822_v21 = vsel %vm1127_vm11, %v4277_v34, 0.0  ;;  %vm1920_vm8 = vcmask 850944  }
 0x3b5   :  { %v1624_v30 = vmul.f32 %v4257_v53, %v1584_v0  ;;  %v1537_v57 = vadd.f32 %v1536_v42, %v1508_v62 }
 0x3b7   :  { %v4299_v43 = vadd.f32 %v4249_v60, %v1624_v30  ;;  %v1554_v44 = vmin.f32 %v1537_v57, 0.0  ;;  %vm1546_vm2 = vcmp.gt.f32.partialorder %v1537_v57, 0.0 }
 0x3b9   :  { %v3309_v46 = vpop.eup %3308  ;;  %v1569_v1 = vmul.f32 1.442695, %v1554_v44  ;;  %v3087_v40 = vpack.i.bf16 %v4299_v43, %v4296_v55  ;;  %v1824_v58 = vsel %vm1127_vm11, %v4299_v43, 0.0 }
 0x3ba   :  { %v2775_v14 = vadd.f32 -1.0, %v3309_v46 }
 0x3bb   :  { %3310 = vpow2.f32 %v1569_v1  ;;  %3088 = vrot.lane.b32.xlu2 %v3087_v40, %s3377_s10  ;;  %3093 = vrot.lane.b32.xlu1 %v3087_v40, %s3378_s11 }
 0x3bc   :  { %3113 = vrot.lane.b32.xlu0 %v3087_v40, %s3381_s14  ;;  %v1585_v36 = vsel %vm1545_vm9, %v1535_v54, %v2775_v14 }
 0x3bd   :  { %v1625_v60 = vmul.f32 %v4255_v26, %v1585_v36 }
 0x3bf   :  { %v1665_v3 = vadd.f32 %v4239_v7, %v1625_v60 }
 0x3c1   :  { %v3311_v53 = vpop.eup %3310  ;;  %v4366_v50 = vsel %vm1127_vm11, %v1665_v3, 0.0 }
 0x3c2   :  { %v2776_v59 = vadd.f32 -1.0, %v3311_v53 }
 0x3c3   :  { %3108 = vrot.lane.b32.xlu2 %v3087_v40, %s3379_s12  ;;  %3098 = vrot.lane.b32.xlu1 %v3087_v40, %s3376_s9 }
 0x3c4   :  { %v1586_v28 = vsel %vm1546_vm2, %v1537_v57, %v2776_v59 }
 0x3c5   :  { %v1626_v23 = vmul.f32 %v4237_v56, %v1586_v28 }
 0x3c7   :  { %v1666_v8 = vadd.f32 %v4241_v63, %v1626_v23 }
 0x3c9   :  { %v3117_v9 = vpack.i.bf16 %v1666_v8, %v1665_v3  ;;  %v4369_v41 = vsel %vm1127_vm11, %v1666_v8, 0.0 }
 0x3cb   :  { %3133 = vrot.lane.b32.xlu2 %v4281_v20, %s3379_s12  ;;  %3103 = vrot.lane.b32.xlu1 %v3087_v40, %s3380_s13 }
 0x3cc   :  { %3118 = vrot.lane.b32.xlu0 %v3117_v9, %s3377_s10 }
 0x3d3   :  { %3153 = vrot.lane.b32.xlu2 %v3117_v9, %s3380_s13  ;;  %3123 = vrot.lane.b32.xlu1 %v3117_v9, %s3378_s11 }
 0x3d4   :  { %3138 = vrot.lane.b32.xlu0 %v3087_v40, %s3386_s30 }
 0x3db   :  { %3158 = vrot.lane.b32.xlu2 %v3117_v9, %s3379_s12  ;;  %3128 = vrot.lane.b32.xlu1 %v4265_v49, %s3376_s9 }
 0x3dc   :  { %3148 = vrot.lane.b32.xlu0 %v3117_v9, %s3376_s9 }
 0x3e3   :  { %3163 = vrot.lane.b32.xlu2 %v3117_v9, %s3381_s14  ;;  %3143 = vrot.lane.b32.xlu1 %v4265_v49, %s3380_s13 }
 0x3e4   :  { %3173 = vrot.lane.b32.xlu0 %v3117_v9, %s3386_s30 }
 0x3eb   :  { %3168 = vrot.lane.b32.xlu2 %v4281_v20, %s3381_s14  ;;  %3183 = vrot.lane.b32.xlu1 %v4281_v20, %s3386_s30 }
 0x3ec   :  { %3178 = vrot.lane.b32.xlu0 %v4265_v49, %s3379_s12 }
 0x3f3   :  { %3188 = vrot.lane.b32.xlu2 %v4265_v49, %s3381_s14  ;;  %3198 = vrot.lane.b32.xlu1 %v3117_v9, %s3366_s8 }
 0x3f4   :  { %3193 = vrot.lane.b32.xlu0 %v4265_v49, %s3386_s30 }
 0x3fb   :  { %3203 = vrot.lane.b32.xlu2 %v3087_v40, %s3366_s8  ;;  %3213 = vrot.lane.b32.xlu1 %v4265_v49, %s3366_s8 }
 0x3fc   :  { %3208 = vrot.lane.b32.xlu0 %v4281_v20, %s3366_s8 }
 0x405   :  { %v3084_v56 = vpop.permute.xlu2 %3083 }
 0x406   :  { %v4373_v35 = vunpack.i.h.bf16 %v3084_v56  ;;  %v4375_v51 = vunpack.i.l.bf16 %v3084_v56 }
 0x40d   :  { %v3059_v7 = vpop.permute.xlu0 %3058  ;;  %v3064_v18 = vpop.permute.xlu1 %3063 }
 0x40e   :  { %v3061_v63 = vunpack.i.h.bf16 %v3059_v7  ;;  %v3060_v26 = vunpack.i.l.bf16 %v3059_v7  ;;  %v3066_v45 = vunpack.i.h.bf16 %v3064_v18  ;;  %v3065_v49 = vunpack.i.l.bf16 %v3064_v18 }
 0x410   :  { %v1828_v11 = vsel %vm1136_vm12, %v1820_v19, %v3061_v63  ;;  %v1827_v22 = vsel %vm1136_vm12, %v1819_v5, %v3060_v26  ;;  %v1963_v10 = vsel %vm1127_vm11, 0.0, %v3061_v63  ;;  %v1962_v32 = vsel %vm1127_vm11, 0.0, %v3060_v26 }
 0x411   :  { %v1836_v16 = vsel %vm1145_vm13, %v1828_v11, 0.0  ;;  %v1835_v47 = vsel %vm1145_vm13, %v1827_v22, 0.0  ;;  %v1971_v29 = vsel %vm1136_vm12, %v1963_v10, 0.0  ;;  %v1970_v17 = vsel %vm1136_vm12, %v1962_v32, 0.0 }
 0x412   :  { %v1843_v27 = vsel %vm1154_vm15, %v1835_v47, %v3065_v49  ;;  %v1844_v4 = vsel %vm1154_vm15, %v1836_v16, %v3066_v45  ;;  %v2099_v12 = vsel %vm1136_vm12, 0.0, %v3066_v45  ;;  %v2098_v39 = vsel %vm1136_vm12, 0.0, %v3065_v49 }
 0x413   :  { %v1979_v34 = vsel %vm1145_vm13, %v1971_v29, %v3066_v45  ;;  %v1978_v61 = vsel %vm1145_vm13, %v1970_v17, %v3065_v49  ;;  %v4378_v33 = vsel %vm1145_vm13, %v2099_v12, 0.0  ;;  %v4381_v2 = vsel %vm1145_vm13, %v2098_v39, 0.0 }
 0x414   :  { %v4387_v0 = vsel %vm1154_vm15, %v1979_v34, 0.0  ;;  %v4390_v42 = vsel %vm1154_vm15, %v1978_v61, 0.0  ;;  %v4393_v57 = vsel %vm1163_vm14, %v1843_v27, 0.0  ;;  %v4396_v55 = vsel %vm1163_vm14, %v1844_v4, 0.0 }
 0x415   :  { %v3089_v6 = vpop.permute.xlu2 %3088 }
 0x416   :  { %v3091_v15 = vunpack.i.h.bf16 %v3089_v6  ;;  %v3090_v20 = vunpack.i.l.bf16 %v3089_v6 }
 0x418   :  { %v1832_v24 = vsel %vm1136_vm12, %v1824_v58, %v3091_v15  ;;  %v1967_v48 = vsel %vm1127_vm11, 0.0, %v3091_v15  ;;  %v1831_v62 = vsel %vm1136_vm12, %v1823_v31, %v3090_v20  ;;  %v1966_v59 = vsel %vm1127_vm11, 0.0, %v3090_v20 }
 0x419   :  { %v1840_v14 = vsel %vm1145_vm13, %v1832_v24, 0.0  ;;  %v1975_v36 = vsel %vm1136_vm12, %v1967_v48, 0.0  ;;  %v1839_v53 = vsel %vm1145_vm13, %v1831_v62, 0.0  ;;  %v1974_v22 = vsel %vm1136_vm12, %v1966_v59, 0.0 }
 0x41d   :  { %v4351_v13 = vpop.permute.xlu2 %3108  ;;  %v3079_v30 = vpop.permute.xlu1 %3078 }
 0x41e   :  { %v3069_v38 = vpop.permute.xlu0 %3068  ;;  %v3081_v28 = vunpack.i.h.bf16 %v3079_v30  ;;  %v3080_v23 = vunpack.i.l.bf16 %v3079_v30  ;;  %v4423_v6 = vunpack.i.h.bf16 %v4351_v13  ;;  %v4433_v15 = vunpack.i.l.bf16 %v4351_v13 }
 0x41f   :  { %v3071_v54 = vunpack.i.h.bf16 %v3069_v38  ;;  %v3070_v37 = vunpack.i.l.bf16 %v3069_v38 }
 0x421   :  { %v1830_v43 = vsel %vm1136_vm12, %v1822_v21, %v3071_v54  ;;  %v1965_v44 = vsel %vm1127_vm11, 0.0, %v3071_v54  ;;  %v1829_v46 = vsel %vm1136_vm12, %v1821_v52, %v3070_v37  ;;  %v1964_v1 = vsel %vm1127_vm11, 0.0, %v3070_v37 }
 0x422   :  { %v1838_v9 = vsel %vm1145_vm13, %v1830_v43, 0.0  ;;  %v1973_v56 = vsel %vm1136_vm12, %v1965_v44, 0.0  ;;  %v1837_v7 = vsel %vm1145_vm13, %v1829_v46, 0.0  ;;  %v1972_v63 = vsel %vm1136_vm12, %v1964_v1, 0.0 }
 0x425   :  { %v3134_v40 = vpop.permute.xlu2 %3133 }
 0x426   :  { %v3074_v60 = vpop.permute.xlu0 %3073  ;;  %v4435_v20 = vunpack.i.h.bf16 %v3134_v40  ;;  %v4437_v39 = vunpack.i.l.bf16 %v3134_v40 }
 0x427   :  { %v3076_v3 = vunpack.i.h.bf16 %v3074_v60  ;;  %v3075_v8 = vunpack.i.l.bf16 %v3074_v60 }
 0x429   :  { %v2101_v26 = vsel %vm1136_vm12, 0.0, %v3076_v3  ;;  %v1845_v18 = vsel %vm1154_vm15, %v1837_v7, %v3075_v8  ;;  %v1846_v19 = vsel %vm1154_vm15, %v1838_v9, %v3076_v3  ;;  %v1980_v11 = vsel %vm1145_vm13, %v1972_v63, %v3075_v8 }
 0x42a   :  { %v2109_v16 = vsel %vm1145_vm13, %v2101_v26, 0.0  ;;  %v1853_v5 = vsel %vm1163_vm14, %v1845_v18, 0.0  ;;  %v1854_v45 = vsel %vm1163_vm14, %v1846_v19, 0.0  ;;  %v1981_v49 = vsel %vm1145_vm13, %v1973_v56, %v3076_v3 }
 0x42b   :  { %v1861_v47 = vsel %vm1172_vm0, %v1853_v5, %v3080_v23  ;;  %v1862_v27 = vsel %vm1172_vm0, %v1854_v45, %v3081_v28  ;;  %v1988_v4 = vsel %vm1154_vm15, %v1980_v11, 0.0  ;;  %v2117_v10 = vsel %vm1154_vm15, %v2109_v16, %v3081_v28 }
 0x42c   :  { %v1870_v32 = vsel %vm1867_vm3, %v1861_v47, 0.0  ;;  %v1989_v29 = vsel %vm1154_vm15, %v1981_v49, 0.0  ;;  %v1871_v17 = vsel %vm1867_vm3, %v1862_v27, 0.0  ;;  %v1996_v52 = vsel %vm1163_vm14, %v1988_v4, %v3080_v23 }
 0x42d   :  { %v1997_v21 = vsel %vm1163_vm14, %v1989_v29, %v3081_v28  ;;  %v2100_v38 = vsel %vm1136_vm12, 0.0, %v3075_v8  ;;  %v3154_v12 = vpop.permute.xlu2 %3153  ;;  %v3094_v31 = vpop.permute.xlu1 %3093  ;;  %v2125_v34 = vsel %vm1163_vm14, %v2117_v10, 0.0  ;;  %v2004_v48 = vsel %vm1172_vm0, %v1996_v52, 0.0 }
 0x42e   :  { %v2108_v58 = vsel %vm1145_vm13, %v2100_v38, 0.0  ;;  %v3096_v54 = vunpack.i.h.bf16 %v3094_v31  ;;  %v3095_v37 = vunpack.i.l.bf16 %v3094_v31  ;;  %v3114_v24 = vpop.permute.xlu0 %3113  ;;  %v2005_v62 = vsel %vm1172_vm0, %v1997_v21, 0.0 }
 0x42f   :  { %v2116_v61 = vsel %vm1154_vm15, %v2108_v58, %v3080_v23  ;;  %v1878_v13 = vsel %vm347_vm10, %v1870_v32, %v4375_v51  ;;  %v1879_v30 = vsel %vm347_vm10, %v1871_v17, %v4373_v35  ;;  %v4448_v43 = vunpack.i.h.bf16 %v3154_v12 }
 0x430   :  { %v4450_v44 = vunpack.i.l.bf16 %v3154_v12  ;;  %v1848_v46 = vsel %vm1154_vm15, %v1840_v14, %v3096_v54  ;;  %v1983_v1 = vsel %vm1145_vm13, %v1975_v36, %v3096_v54  ;;  %v2124_v40 = vsel %vm1163_vm14, %v2116_v61, 0.0 }
 0x431   :  { %v2103_v59 = vsel %vm1136_vm12, 0.0, %v3096_v54  ;;  %v4456_v60 = vunpack.i.h.bf16 %v3114_v24  ;;  %v4458_v28 = vunpack.i.l.bf16 %v3114_v24  ;;  %v1847_v23 = vsel %vm1154_vm15, %v1839_v53, %v3095_v37 }
 0x432   :  { %v1982_v3 = vsel %vm1145_vm13, %v1974_v22, %v3095_v37  ;;  %v1887_v8 = vsel %vm1884_vm4, %v1878_v13, 0.0  ;;  %v1888_v9 = vsel %vm1884_vm4, %v1879_v30, 0.0  ;;  %v1856_v14 = vsel %vm1163_vm14, %v1848_v46, 0.0 }
 0x433   :  { %v1991_v36 = vsel %vm1154_vm15, %v1983_v1, 0.0  ;;  %v2102_v56 = vsel %vm1136_vm12, 0.0, %v3095_v37  ;;  %v1896_v7 = vsel %vm1893_vm5, %v1887_v8, %v4437_v39  ;;  %v2111_v63 = vsel %vm1145_vm13, %v2103_v59, 0.0 }
 0x434   :  { %v1897_v53 = vsel %vm1893_vm5, %v1888_v9, %v4435_v20  ;;  %v2012_v19 = vsel %vm1867_vm3, %v2004_v48, %v4375_v51  ;;  %v2013_v11 = vsel %vm1867_vm3, %v2005_v62, %v4373_v35  ;;  %v1855_v16 = vsel %vm1163_vm14, %v1847_v23, 0.0 }
 0x435   :  { %v3159_v26 = vpop.permute.xlu2 %3158  ;;  %v3099_v18 = vpop.permute.xlu1 %3098  ;;  %v1990_v5 = vsel %vm1154_vm15, %v1982_v3, 0.0  ;;  %v2110_v22 = vsel %vm1145_vm13, %v2102_v56, 0.0  ;;  %v4480_v47 = vsel %vm1902_vm6, %v1896_v7, 0.0  ;;  %v2020_v27 = vsel %vm347_vm10, %v2012_v19, 0.0 }
 0x436   :  { %v3101_v45 = vunpack.i.h.bf16 %v3099_v18  ;;  %v3100_v49 = vunpack.i.l.bf16 %v3099_v18  ;;  %v2021_v4 = vsel %vm347_vm10, %v2013_v11, 0.0  ;;  %v4488_v17 = vsel %vm1902_vm6, %v1897_v53, 0.0 }
 0x437   :  { %v4490_v52 = vunpack.i.h.bf16 %v3159_v26  ;;  %v2132_v38 = vsel %vm1172_vm0, %v2124_v40, %v4375_v51  ;;  %v2133_v12 = vsel %vm1172_vm0, %v2125_v34, %v4373_v35  ;;  %v2028_v61 = vsel %vm1884_vm4, %v2020_v27, %v4437_v39 }
 0x438   :  { %v1863_v10 = vsel %vm1172_vm0, %v1855_v16, %v3100_v49  ;;  %v1864_v32 = vsel %vm1172_vm0, %v1856_v14, %v3101_v45  ;;  %v1998_v29 = vsel %vm1163_vm14, %v1990_v5, %v3100_v49  ;;  %v1999_v21 = vsel %vm1163_vm14, %v1991_v36, %v3101_v45 }
 0x439   :  { %v2118_v31 = vsel %vm1154_vm15, %v2110_v22, %v3100_v49  ;;  %v2119_v58 = vsel %vm1154_vm15, %v2111_v63, %v3101_v45  ;;  %v2029_v54 = vsel %vm1884_vm4, %v2021_v4, %v4435_v20  ;;  %v4503_v37 = vunpack.i.l.bf16 %v3159_v26 }
 0x43a   :  { %v1872_v24 = vsel %vm1867_vm3, %v1863_v10, 0.0  ;;  %v1873_v48 = vsel %vm1867_vm3, %v1864_v32, 0.0  ;;  %v2006_v51 = vsel %vm1172_vm0, %v1998_v29, 0.0  ;;  %v2007_v35 = vsel %vm1172_vm0, %v1999_v21, 0.0 }
 0x43b   :  { %v2126_v34 = vsel %vm1163_vm14, %v2118_v31, 0.0  ;;  %v2140_v62 = vsel %vm1867_vm3, %v2132_v38, 0.0  ;;  %v2141_v13 = vsel %vm1867_vm3, %v2133_v12, 0.0  ;;  %v2127_v30 = vsel %vm1163_vm14, %v2119_v58, 0.0 }
 0x43c   :  { %v2036_v40 = vsel %vm1893_vm5, %v2028_v61, 0.0  ;;  %v2037_v59 = vsel %vm1893_vm5, %v2029_v54, 0.0  ;;  %v2148_v23 = vsel %vm347_vm10, %v2140_v62, %v4437_v39  ;;  %v2149_v36 = vsel %vm347_vm10, %v2141_v13, %v4435_v20 }
 0x43d   :  { %v3164_v46 = vpop.permute.xlu2 %3163  ;;  %v3104_v1 = vpop.permute.xlu1 %3103  ;;  %v2156_v26 = vsel %vm1884_vm4, %v2148_v23, 0.0  ;;  %v2157_v29 = vsel %vm1884_vm4, %v2149_v36, 0.0 }
 0x43e   :  { %v4517_v3 = vunpack.i.h.bf16 %v3164_v46  ;;  %v3106_v8 = vunpack.i.h.bf16 %v3104_v1  ;;  %v3105_v9 = vunpack.i.l.bf16 %v3104_v1  ;;  %v3119_v14 = vpop.permute.xlu0 %3118  ;;  %v4521_v56 = vunpack.i.l.bf16 %v3164_v46 }
 0x43f   :  { %v3121_v7 = vunpack.i.h.bf16 %v3119_v14  ;;  %v3120_v63 = vunpack.i.l.bf16 %v3119_v14 }
 0x440   :  { %v1880_v18 = vsel %vm347_vm10, %v1872_v24, %v3105_v9  ;;  %v1881_v53 = vsel %vm347_vm10, %v1873_v48, %v3106_v8  ;;  %v2014_v39 = vsel %vm1867_vm3, %v2006_v51, %v3105_v9  ;;  %v2015_v19 = vsel %vm1867_vm3, %v2007_v35, %v3106_v8 }
 0x441   :  { %v1889_v11 = vsel %vm1884_vm4, %v1880_v18, 0.0  ;;  %v1890_v16 = vsel %vm1884_vm4, %v1881_v53, 0.0  ;;  %v2022_v20 = vsel %vm347_vm10, %v2014_v39, 0.0  ;;  %v2023_v5 = vsel %vm347_vm10, %v2015_v19, 0.0 }
 0x442   :  { %v1898_v45 = vsel %vm1893_vm5, %v1889_v11, %v4433_v15  ;;  %v1899_v49 = vsel %vm1893_vm5, %v1890_v16, %v4423_v6  ;;  %v2030_v22 = vsel %vm1884_vm4, %v2022_v20, %v4433_v15  ;;  %v2031_v27 = vsel %vm1884_vm4, %v2023_v5, %v4423_v6 }
 0x443   :  { %v4541_v4 = vsel %vm1902_vm6, %v1898_v45, 0.0  ;;  %v4544_v10 = vsel %vm1902_vm6, %v1899_v49, 0.0  ;;  %v2038_v32 = vsel %vm1893_vm5, %v2030_v22, 0.0  ;;  %v2134_v21 = vsel %vm1172_vm0, %v2126_v34, %v3105_v9 }
 0x444   :  { %v2135_v38 = vsel %vm1172_vm0, %v2127_v30, %v3106_v8  ;;  %v1834_v12 = vsel %vm1136_vm12, %v4369_v41, %v3121_v7  ;;  %v1969_v31 = vsel %vm1127_vm11, 0.0, %v3121_v7  ;;  %v2039_v58 = vsel %vm1893_vm5, %v2031_v27, 0.0 }
 0x445   :  { %v2142_v61 = vsel %vm1867_vm3, %v2134_v21, 0.0  ;;  %v2143_v54 = vsel %vm1867_vm3, %v2135_v38, 0.0  ;;  %v1842_v24 = vsel %vm1145_vm13, %v1834_v12, 0.0  ;;  %v3169_v48 = vpop.permute.xlu2 %3168  ;;  %v3124_v51 = vpop.permute.xlu1 %3123  ;;  %v1833_v41 = vsel %vm1136_vm12, %v4366_v50, %v3120_v63 }
 0x446   :  { %v2150_v35 = vsel %vm347_vm10, %v2142_v61, %v4433_v15  ;;  %v2151_v34 = vsel %vm347_vm10, %v2143_v54, %v4423_v6  ;;  %v1968_v62 = vsel %vm1127_vm11, 0.0, %v3120_v63  ;;  %v3139_v13 = vpop.permute.xlu0 %3138  ;;  %v1977_v1 = vsel %vm1136_vm12, %v1969_v31, 0.0 }
 0x447   :  { %v2158_v30 = vsel %vm1884_vm4, %v2150_v35, 0.0  ;;  %v2159_v46 = vsel %vm1884_vm4, %v2151_v34, 0.0  ;;  %v1841_v23 = vsel %vm1145_vm13, %v1833_v41, 0.0  ;;  %v3171_v8 = vunpack.i.h.bf16 %v3169_v48 }
 0x448   :  { %v3170_v9 = vunpack.i.l.bf16 %v3169_v48  ;;  %v3126_v15 = vunpack.i.h.bf16 %v3124_v51  ;;  %v3125_v14 = vunpack.i.l.bf16 %v3124_v51  ;;  %v1976_v6 = vsel %vm1136_vm12, %v1968_v62, 0.0 }
 0x449   :  { %v3141_v36 = vunpack.i.h.bf16 %v3139_v13  ;;  %v3140_v7 = vunpack.i.l.bf16 %v3139_v13  ;;  %v2046_v50 = vsel %vm1902_vm6, %v2038_v32, %v4458_v28  ;;  %v1915_v18 = vsel %vm1911_vm7, %v4488_v17, %v3171_v8 }
 0x44a   :  { %v1914_v63 = vsel %vm1911_vm7, %v4480_v47, %v3170_v9  ;;  %v2044_v53 = vsel %vm1902_vm6, %v2036_v40, %v3170_v9  ;;  %v2045_v39 = vsel %vm1902_vm6, %v2037_v59, %v3171_v8  ;;  %v4581_v11 = vsel %vm1920_vm8, %v1915_v18, 0.0 }
 0x44b   :  { %v4578_v19 = vsel %vm1920_vm8, %v1914_v63, 0.0  ;;  %v4584_v16 = vsel %vm1911_vm7, %v2044_v53, 0.0  ;;  %v2047_v20 = vsel %vm1902_vm6, %v2039_v58, %v4456_v60  ;;  %v2164_v47 = vsel %vm1893_vm5, %v2156_v26, %v3170_v9 }
 0x44c   :  { %v2165_v17 = vsel %vm1893_vm5, %v2157_v29, %v3171_v8  ;;  %v2105_v40 = vsel %vm1136_vm12, 0.0, %v3126_v15  ;;  %v1849_v59 = vsel %vm1154_vm15, %v1841_v23, %v3125_v14  ;;  %v4593_v5 = vsel %vm1911_vm7, %v2045_v39, 0.0 }
 0x44d   :  { %v4596_v45 = vsel %vm1902_vm6, %v2164_v47, 0.0  ;;  %v4599_v49 = vsel %vm1902_vm6, %v2165_v17, 0.0  ;;  %v1850_v22 = vsel %vm1154_vm15, %v1842_v24, %v3126_v15  ;;  %v3129_v27 = vpop.permute.xlu1 %3128  ;;  %v2113_v26 = vsel %vm1145_vm13, %v2105_v40, 0.0  ;;  %v3189_v54 = vpop.permute.xlu2 %3188 }
 0x44e   :  { %v1857_v32 = vsel %vm1163_vm14, %v1849_v59, 0.0  ;;  %v1984_v29 = vsel %vm1145_vm13, %v1976_v6, %v3125_v14  ;;  %v1985_v21 = vsel %vm1145_vm13, %v1977_v1, %v3126_v15  ;;  %v3149_v38 = vpop.permute.xlu0 %3148  ;;  %v1858_v12 = vsel %vm1163_vm14, %v1850_v22, 0.0 }
 0x44f   :  { %v1992_v31 = vsel %vm1154_vm15, %v1984_v29, 0.0  ;;  %v2104_v58 = vsel %vm1136_vm12, 0.0, %v3125_v14  ;;  %v2054_v61 = vsel %vm1911_vm7, %v2046_v50, 0.0  ;;  %v1993_v24 = vsel %vm1154_vm15, %v1985_v21, 0.0 }
 0x450   :  { %v2055_v48 = vsel %vm1911_vm7, %v2047_v20, 0.0  ;;  %v4613_v51 = vsel %vm1920_vm8, %v2054_v61, %v3140_v7  ;;  %v2166_v35 = vsel %vm1893_vm5, %v2158_v30, %v4458_v28  ;;  %v2112_v34 = vsel %vm1145_vm13, %v2104_v58, 0.0 }
 0x451   :  { %v4619_v41 = vsel %vm1920_vm8, %v2055_v48, %v3141_v36  ;;  %v2167_v62 = vsel %vm1893_vm5, %v2159_v46, %v4456_v60  ;;  %v2174_v13 = vsel %vm1902_vm6, %v2166_v35, 0.0  ;;  %v4628_v9 = vunpack.i.h.bf16 %v3189_v54 }
 0x452   :  { %v2175_v1 = vsel %vm1902_vm6, %v2167_v62, 0.0  ;;  %v2182_v23 = vsel %vm1911_vm7, %v2174_v13, %v3140_v7  ;;  %v2797_v8 = vpack.c.bf16 %v4619_v41, %v4613_v51  ;;  %v3131_v15 = vunpack.i.h.bf16 %v3129_v27 }
 0x453   :  { %v2183_v30 = vsel %vm1911_vm7, %v2175_v1, %v3141_v36  ;;  %v3130_v14 = vunpack.i.l.bf16 %v3129_v27  ;;  %v3151_v6 = vunpack.i.h.bf16 %v3149_v38  ;;  %v4631_v50 = vunpack.i.l.bf16 %v3189_v54 }
 0x454   :  { %v3150_v63 = vunpack.i.l.bf16 %v3149_v38  ;;  %v4634_v46 = vsel %vm1920_vm8, %v2182_v23, 0.0  ;;  %v4637_v18 = vsel %vm1920_vm8, %v2183_v30, 0.0  ;;  %v1860_v53 = vsel %vm1172_vm0, %v4396_v55, %v3131_v15 }
 0x455   :  { %v1859_v7 = vsel %vm1172_vm0, %v4393_v57, %v3130_v14  ;;  %v1994_v36 = vsel %vm1163_vm14, %v4390_v42, %v3130_v14  ;;  %v1995_v39 = vsel %vm1163_vm14, %v4387_v0, %v3131_v15  ;;  %v3144_v20 = vpop.permute.xlu1 %3143  ;;  %v1869_v17 = vsel %vm1867_vm3, %v1860_v53, 0.0 }
 0x456   :  { %v1868_v47 = vsel %vm1867_vm3, %v1859_v7, 0.0  ;;  %v2002_v40 = vsel %vm1172_vm0, %v1994_v36, 0.0  ;;  %v2003_v59 = vsel %vm1172_vm0, %v1995_v39, 0.0  ;;  %v4651_v22 = vpop.permute.xlu0 %3173  ;;  %v2114_v57 = vsel %vm1154_vm15, %v4381_v2, %v3130_v14 }
 0x457   :  { %v2115_v42 = vsel %vm1154_vm15, %v4378_v33, %v3131_v15  ;;  %v2121_v55 = vsel %vm1154_vm15, %v2113_v26, %v3151_v6  ;;  %v1865_v0 = vsel %vm1172_vm0, %v1857_v32, %v3150_v63  ;;  %v2122_v27 = vsel %vm1163_vm14, %v2114_v57, 0.0  ;;  %v4668_v26 = vpop.permute.xlu2 %3203 }
 0x458   :  { %v2123_v29 = vsel %vm1163_vm14, %v2115_v42, 0.0  ;;  %v2129_v21 = vsel %vm1163_vm14, %v2121_v55, 0.0  ;;  %v1866_v38 = vsel %vm1172_vm0, %v1858_v12, %v3151_v6  ;;  %v1874_v2 = vsel %vm1867_vm3, %v1865_v0, 0.0 }
 0x459   :  { %v2137_v58 = vsel %vm1172_vm0, %v2129_v21, %v4448_v43  ;;  %v1875_v61 = vsel %vm1867_vm3, %v1866_v38, 0.0  ;;  %v2000_v33 = vsel %vm1163_vm14, %v1992_v31, %v3150_v63  ;;  %v1882_v54 = vsel %vm347_vm10, %v1874_v2, %v4450_v44 }
 0x45a   :  { %v2145_v32 = vsel %vm1867_vm3, %v2137_v58, 0.0  ;;  %v1883_v48 = vsel %vm347_vm10, %v1875_v61, %v4448_v43  ;;  %v2001_v12 = vsel %vm1163_vm14, %v1993_v24, %v3151_v6  ;;  %v4677_v35 = vsel %vm1884_vm4, %v1882_v54, 0.0 }
 0x45b   :  { %v4680_v62 = vsel %vm1884_vm4, %v1883_v48, 0.0  ;;  %v2008_v31 = vsel %vm1172_vm0, %v2000_v33, 0.0  ;;  %v2009_v13 = vsel %vm1172_vm0, %v2001_v12, 0.0  ;;  %v2120_v30 = vsel %vm1154_vm15, %v2112_v34, %v3150_v63 }
 0x45c   :  { %v2016_v1 = vsel %vm1867_vm3, %v2008_v31, %v4450_v44  ;;  %v2017_v23 = vsel %vm1867_vm3, %v2009_v13, %v4448_v43  ;;  %v3206_v24 = vunpack.i.h.bf16 %v4668_v26  ;;  %vm1929_vm11 = vcmask 916480  }
 0x45d   :  { %v2024_v15 = vsel %vm347_vm10, %v2016_v1, 0.0  ;;  %v2025_v14 = vsel %vm347_vm10, %v2017_v23, 0.0  ;;  %v2128_v6 = vsel %vm1163_vm14, %v2120_v30, 0.0  ;;  %v3205_v7 = vunpack.i.l.bf16 %v4668_v26  ;;  %v3184_v53 = vpop.permute.xlu1 %3183  ;;  %vm4733_vm13 = vmpackc.low %vm1929_vm11, %vm1929_vm11 }
 0x45e   :  { %v2136_v36 = vsel %vm1172_vm0, %v2128_v6, %v4450_v44  ;;  %v3146_v39 = vunpack.i.h.bf16 %v3144_v20  ;;  %v3145_v57 = vunpack.i.l.bf16 %v3144_v20  ;;  %v3176_v43 = vunpack.i.h.bf16 %v4651_v22  ;;  %v3179_v34 = vpop.permute.xlu0 %3178 }
 0x45f   :  { %v2144_v63 = vsel %vm1867_vm3, %v2136_v36, 0.0  ;;  %v3175_v42 = vunpack.i.l.bf16 %v4651_v22  ;;  %v2032_v55 = vsel %vm1884_vm4, %v2024_v15, %v4503_v37  ;;  %v2033_v0 = vsel %vm1884_vm4, %v2025_v14, %v4490_v52 }
 0x460   :  { %v1876_v21 = vsel %vm347_vm10, %v1868_v47, %v3145_v57  ;;  %v1877_v38 = vsel %vm347_vm10, %v1869_v17, %v3146_v39  ;;  %v2010_v44 = vsel %vm1867_vm3, %v2002_v40, %v3145_v57  ;;  %v2011_v20 = vsel %vm1867_vm3, %v2003_v59, %v3146_v39 }
 0x461   :  { %v1885_v58 = vsel %vm1884_vm4, %v1876_v21, 0.0  ;;  %v1886_v2 = vsel %vm1884_vm4, %v1877_v38, 0.0  ;;  %v2018_v22 = vsel %vm347_vm10, %v2010_v44, 0.0  ;;  %v2019_v61 = vsel %vm347_vm10, %v2011_v20, 0.0 }
 0x462   :  { %v2130_v33 = vsel %vm1172_vm0, %v2122_v27, %v3145_v57  ;;  %v2131_v54 = vsel %vm1172_vm0, %v2123_v29, %v3146_v39  ;;  %v2040_v47 = vsel %vm1893_vm5, %v2032_v55, 0.0  ;;  %v2041_v17 = vsel %vm1893_vm5, %v2033_v0, 0.0 }
 0x463   :  { %v2138_v40 = vsel %vm1867_vm3, %v2130_v33, 0.0  ;;  %v2139_v59 = vsel %vm1867_vm3, %v2131_v54, 0.0  ;;  %v2048_v48 = vsel %vm1902_vm6, %v2040_v47, %v4521_v56  ;;  %v2049_v12 = vsel %vm1902_vm6, %v2041_v17, %v4517_v3 }
 0x464   :  { %v2056_v31 = vsel %vm1911_vm7, %v2048_v48, 0.0  ;;  %v2057_v27 = vsel %vm1911_vm7, %v2049_v12, 0.0  ;;  %v2152_v29 = vsel %vm347_vm10, %v2144_v63, %v4503_v37  ;;  %v2153_v13 = vsel %vm347_vm10, %v2145_v32, %v4490_v52 }
 0x465   :  { %v2064_v1 = vsel %vm1920_vm8, %v2056_v31, %v3175_v42  ;;  %v2065_v23 = vsel %vm1920_vm8, %v2057_v27, %v3176_v43  ;;  %v2160_v30 = vsel %vm1884_vm4, %v2152_v29, 0.0  ;;  %v2161_v15 = vsel %vm1884_vm4, %v2153_v13, 0.0  ;;  %v3199_v6 = vpop.permute.xlu1 %3198 }
 0x466   :  { %v2168_v36 = vsel %vm1893_vm5, %v2160_v30, %v4521_v56  ;;  %v2169_v32 = vsel %vm1893_vm5, %v2161_v15, %v4517_v3  ;;  %v2794_v39 = vpack.c.bf16 %v2065_v23, %v2064_v1  ;;  %v3186_v57 = vunpack.i.h.bf16 %v3184_v53  ;;  %v3194_v63 = vpop.permute.xlu0 %3193 }
 0x467   :  { %v2176_v55 = vsel %vm1902_vm6, %v2168_v36, 0.0  ;;  %v2177_v0 = vsel %vm1902_vm6, %v2169_v32, 0.0  ;;  %v3185_v21 = vunpack.i.l.bf16 %v3184_v53  ;;  %v3181_v38 = vunpack.i.h.bf16 %v3179_v34 }
 0x468   :  { %v2184_v44 = vsel %vm1911_vm7, %v2176_v55, %v3175_v42  ;;  %v2185_v20 = vsel %vm1911_vm7, %v2177_v0, %v3176_v43  ;;  %2795 = vmatpush.bf16.msk.msra.mxu2 %vm4733_vm13, %v2794_v39  ;;  %v2061_v33 = vsel %vm1920_vm8, %v4593_v5, %v3186_v57  ;;  %v4751_v54 = vsel %vm1911_vm7, %v4599_v49, %v3186_v57 }
 0x469   :  { %v2192_v47 = vsel %vm1920_vm8, %v2184_v44, 0.0  ;;  %v2193_v17 = vsel %vm1920_vm8, %v2185_v20, 0.0  ;;  %v2060_v53 = vsel %vm1920_vm8, %v4584_v16, %v3185_v21  ;;  %v2180_v43 = vsel %vm1911_vm7, %v4596_v45, %v3185_v21 }
 0x46a   :  { %v2800_v42 = vpack.c.bf16 %v2061_v33, %v2060_v53  ;;  %v2147_v48 = vsel %vm347_vm10, %v2139_v59, %v3181_v38  ;;  %v3180_v12 = vunpack.i.l.bf16 %v3179_v34  ;;  %v1895_v5 = vsel %vm1893_vm5, %v1886_v2, %v3181_v38 }
 0x46b   :  { %v2155_v31 = vsel %vm1884_vm4, %v2147_v48, 0.0  ;;  %v4763_v49 = vsel %vm1902_vm6, %v1895_v5, 0.0  ;;  %v2027_v27 = vsel %vm1884_vm4, %v2019_v61, %v3181_v38  ;;  %v3201_v29 = vunpack.i.h.bf16 %v3199_v6 }
 0x46c   :  { %v1894_v13 = vsel %vm1893_vm5, %v1885_v58, %v3180_v12  ;;  %v2026_v16 = vsel %vm1884_vm4, %v2018_v22, %v3180_v12  ;;  %v2035_v45 = vsel %vm1893_vm5, %v2027_v27, 0.0  ;;  %v2146_v1 = vsel %vm347_vm10, %v2138_v40, %v3180_v12  ;;  %2798 = vmatpush.bf16.msk.msra.mxu2 %vm4733_vm13, %v2797_v8 }
 0x46d   :  { %v1903_v34 = vsel %vm1902_vm6, %v1894_v13, 0.0  ;;  %v2034_v2 = vsel %vm1893_vm5, %v2026_v16, 0.0  ;;  %v2154_v61 = vsel %vm1884_vm4, %v2146_v1, 0.0  ;;  %v3200_v59 = vunpack.i.l.bf16 %v3199_v6  ;;  %v3214_v30 = vpop.permute.xlu1 %3213  ;;  %vm2846_vm4 = vmneg %vm1136_vm12 }
 0x46e   :  { %v2201_v58 = vsel %vm1929_vm11, %v2193_v17, %v3201_v29  ;;  %v3196_v22 = vunpack.i.h.bf16 %v3194_v63  ;;  %v3195_v23 = vunpack.i.l.bf16 %v3194_v63  ;;  %v2042_v40 = vsel %vm1902_vm6, %v2034_v2, %v4631_v50  ;;  %v3209_v57 = vpop.permute.xlu0 %3208  ;;  %v2889_v2 = vld [vmem:[#allocation2 + $0x20] sm:$0xf] }
 0x46f   :  { %v2200_v51 = vsel %vm1929_vm11, %v2192_v47, %v3200_v59  ;;  %v2043_v41 = vsel %vm1902_vm6, %v2035_v45, %v4628_v9  ;;  %v2050_v8 = vsel %vm1911_vm7, %v2042_v40, 0.0  ;;  %v2162_v15 = vsel %vm1893_vm5, %v2154_v61, %v4631_v50  ;;  %v2781_v61 = vld [vmem:[#allocation2 + $0x48] sm:$0xf0]  ;;  %v4853_v59 = vld [vmem:[%s4919_s2] sm:$0xff]  ;;  %v2890_v40 = vld [vmem:[#allocation2 + $0x44] sm:$0xf0] }
 0x470   :  { %2801 = vmatpush.bf16.msk.msra.mxu2 %vm4733_vm13, %v2800_v42  ;;  %v2217_v6 = vpack.c.bf16 %v2201_v58, %v2200_v51  ;;  %v2051_v36 = vsel %vm1911_vm7, %v2043_v41, 0.0  ;;  %v2058_v32 = vsel %vm1920_vm8, %v2050_v8, %v3195_v23  ;;  %v2163_v39 = vsel %vm1893_vm5, %v2155_v31, %v4628_v9  ;;  %v4872_v41 = vld [vmem:[%s4919_s2 + $0x8] sm:$0xff] }
 0x471   :  { %v2059_v63 = vsel %vm1920_vm8, %v2051_v36, %v3196_v22  ;;  %v2170_v55 = vsel %vm1902_vm6, %v2162_v15, 0.0  ;;  %v2171_v0 = vsel %vm1902_vm6, %v2163_v39, 0.0  ;;  %v3216_v21 = vunpack.i.h.bf16 %v3214_v30  ;;  %v2891_v15 = vld [vmem:[#allocation2 + $0x78] sm:$0xf]  ;;  %v2892_v39 = vld [vmem:[#allocation2 + $0x9c] sm:$0xf0] }
 0x472   :  { %v2178_v38 = vsel %vm1911_vm7, %v2170_v55, %v3195_v23  ;;  %v2179_v44 = vsel %vm1911_vm7, %v2171_v0, %v3196_v22  ;;  %v2803_v20 = vpack.c.bf16 %v2059_v63, %v2058_v32  ;;  %2289 = vmatpush.bf16.msra.mxu3 %v2217_v6  ;;  %v3215_v33 = vunpack.i.l.bf16 %v3214_v30  ;;  %v2220_v22 = vld [vmem:[%s4919_s2 + $0x10] sm:$0xff]  ;;  %v2779_v23 = vld [vmem:[#allocation2 + $0x1c] sm:$0xf]  ;;  %v2789_v6 = vld [vmem:[#allocation2 + $0xa0] sm:$0xf0] }
 0x473   :  { %v3211_v47 = vunpack.i.h.bf16 %v3209_v57  ;;  %v3210_v17 = vunpack.i.l.bf16 %v3209_v57  ;;  %v1900_v53 = vsel %vm1893_vm5, %v4677_v35, %v4503_v37  ;;  %v1901_v42 = vsel %vm1893_vm5, %v4680_v62, %v4490_v52  ;;  %v2787_v32 = vld [vmem:[#allocation2 + $0x74] sm:$0xf]  ;;  %vm2848_vm5 = vmpackc.low %vm2846_vm4, %vm2846_vm4 }
 0x474   :  { %2804 = vmatpush.bf16.msk.msra.mxu2 %vm4733_vm13, %v2803_v20  ;;  %v1909_v48 = vsel %vm1902_vm6, %v1900_v53, 0.0  ;;  %v1910_v12 = vsel %vm1902_vm6, %v1901_v42, 0.0  ;;  %v2198_v5 = vsel %vm1929_vm11, %v4634_v46, %v3205_v7  ;;  %v2199_v37 = vsel %vm1929_vm11, %v4637_v18, %v3206_v24 }
 0x475   :  { %v1918_v52 = vsel %vm1911_vm7, %v1909_v48, %v4521_v56  ;;  %v1919_v35 = vsel %vm1911_vm7, %v1910_v12, %v4517_v3  ;;  %v2216_v62 = vpack.c.bf16 %v2199_v37, %v2198_v5  ;;  %v1916_v31 = vsel %vm1911_vm7, %v4541_v4, %v4458_v28 }
 0x476   :  { %v1927_v27 = vsel %vm1920_vm8, %v1918_v52, 0.0  ;;  %v1928_v46 = vsel %vm1920_vm8, %v1919_v35, 0.0  ;;  %v1917_v26 = vsel %vm1911_vm7, %v4544_v10, %v4456_v60  ;;  %v1925_v18 = vsel %vm1920_vm8, %v1916_v31, 0.0 }
 0x477   :  { %v2806_v24 = vpack.c.bf16 %v1928_v46, %v1927_v27  ;;  %2290 = vmatpush.bf16.msra.mxu3 %v2216_v62  ;;  %v1926_v56 = vsel %vm1920_vm8, %v1917_v26, 0.0  ;;  %v2188_v3 = vsel %vm1920_vm8, %v2180_v43, 0.0  ;;  %v2189_v7 = vsel %vm1920_vm8, %v4751_v54, 0.0 }
 0x478   :  { %v2809_v28 = vpack.c.bf16 %v1926_v56, %v1925_v18  ;;  %v2196_v4 = vsel %vm1929_vm11, %v2188_v3, %v3210_v17  ;;  %v2197_v29 = vsel %vm1929_vm11, %v2189_v7, %v3211_v47  ;;  %v2812_v13 = vpack.c.bf16 %v4581_v11, %v4578_v19 }
 0x479   :  { %2807 = vmatpush.bf16.msk.msra.mxu2 %vm4733_vm13, %v2806_v24  ;;  %v2215_v60 = vpack.c.bf16 %v2197_v29, %v2196_v4  ;;  %v2186_v10 = vsel %vm1920_vm8, %v2178_v38, 0.0  ;;  %v2187_v16 = vsel %vm1920_vm8, %v2179_v44, 0.0  ;;  %v1912_v43 = vsel %vm1911_vm7, %v1903_v34, %v4631_v50  ;;  %v2221_v34 = vld [vmem:[%s4919_s2 + $0x18] sm:$0xff] }
 0x47a   :  { %v2194_v54 = vsel %vm1929_vm11, %v2186_v10, %v3215_v33  ;;  %v2195_v45 = vsel %vm1929_vm11, %v2187_v16, %v3216_v21  ;;  %v1913_v1 = vsel %vm1911_vm7, %v4763_v49, %v4628_v9  ;;  %v1921_v19 = vsel %vm1920_vm8, %v1912_v43, 0.0 }
 0x47b   :  { %2291 = vmatpush.bf16.msra.mxu3 %v2215_v60  ;;  %v1922_v11 = vsel %vm1920_vm8, %v1913_v1, 0.0  ;;  %v2214_v9 = vpack.c.bf16 %v2195_v45, %v2194_v54  ;;  %v3387_v49 = vmov 15   ;;  %v2784_v58 = vor.u32 %v2889_v2, %v2781_v61 }
 0x47c   :  { %v2815_v50 = vpack.c.bf16 %v1922_v11, %v1921_v19  ;;  %3219 = vset.pattern.permute.xlu1 %v3387_v49  ;;  %3218 = vset.pattern.permute.xlu0 %v3387_v49  ;;  %v2780_v30 = vor.u32 %v2890_v40, %v2779_v23  ;;  %v3388_v51 = vmov 16   ;;  %v3389_v8 = vmov 17  }
 0x47d   :  { %2810 = vmatpush.bf16.msk.msra.mxu2 %vm4733_vm13, %v2809_v28  ;;  %2224 = vperm.xlu1 %3219, %v4853_v59   ;;  %v2792_v36 = vor.u32 %v2891_v15, %v2789_v6  ;;  %v2788_v57 = vor.u32 %v2892_v39, %v2787_v32  ;;  %vm2478_vm6 = vcmask 982016  }
 0x47e   :  { %2239 = vperm.xlu0 %3218, %v2221_v34   ;;  %3217 = vset.pattern.permute.xlu2 %v3387_v49  ;;  %vm2856_vm12 = vmpackc.low %vm2478_vm6, %vm2478_vm6 }
 0x47f   :  { %2292 = vmatpush.bf16.msra.mxu3 %v2214_v9  ;;  %2234 = vperm.xlu2 %3217, %v2220_v22  }
 0x481   :  { %2813 = vmatpush.bf16.msk.msra.mxu2 %vm4733_vm13, %v2812_v13 }
 0x482   :  { %2817 = vmatmul.msk.bf16.vlgmr.msra.gmra.mxu3 %vm347_vm10, %v2784_v58 }
 0x485   :  { %2816 = vmatpush.bf16.msk.msra.mxu2 %vm4733_vm13, %v2815_v50  ;;  %3220 = vset.pattern.permute.xlu1 %v3388_v51 }
 0x486   :  { %2337 = vperm.xlu1 %3220, %v2220_v22   ;;  %3222 = vset.pattern.permute.xlu0 %v3389_v8 }
 0x487   :  { %2357 = vperm.xlu0 %3222, %v2220_v22   ;;  %2229 = vperm.xlu2 %3217, %v4872_v41  }
 0x488   :  { %2274 = vmatmul.bf16.vlgmr.msra.gmra.mxu2 %v2780_v30 }
 0x48e   :  { %3223 = vset.pattern.permute.xlu1 %v3389_v8 }
 0x48f   :  { %2361 = vperm.xlu1 %3223, %v2221_v34   ;;  %2353 = vperm.xlu0 %3222, %v4872_v41  }
 0x490   :  { %3221 = vset.pattern.permute.xlu2 %v3388_v51 }
 0x491   :  { %2341 = vperm.xlu2 %3221, %v2221_v34  }
 0x492   :  { %2818 = vmatmul.msk.bf16.gmra.mxu3 %vm347_vm10, %v2792_v36 }
 0x497   :  { %3224 = vset.pattern.permute.xlu1 %v3388_v51 }
 0x498   :  { %2279 = vmatmul.bf16.gmra.mxu2 %v2788_v57  ;;  %2333 = vperm.xlu1 %3224, %v4872_v41  }
 0x499   :  { %2329 = vperm.xlu2 %3221, %v4853_v59  }
 0x4a1   :  { %3225 = vset.pattern.permute.xlu2 %v3389_v8 }
 0x4a2   :  { %2349 = vperm.xlu2 %3225, %v4853_v59  }
 0x4d9   :  { %v2235_v63 = vpop.permute.xlu2 %2234 }
 0x4e1   :  { %v2230_v55 = vpop.permute.xlu2 %2229 }
 0x4eb   :  { %v2342_v17 = vpop.permute.xlu2 %2341 }
 0x4ef   :  { %v2225_v21 = vpop.permute.xlu1 %2224 }
 0x4f0   :  { %v2240_v53 = vpop.permute.xlu0 %2239 }
 0x4f3   :  { %v2330_v27 = vpop.permute.xlu2 %2329 }
 0x4f8   :  { %v2338_v33 = vpop.permute.xlu1 %2337 }
 0x4f9   :  { %v2358_v46 = vpop.permute.xlu0 %2357 }
 0x4fc   :  { %v2350_v54 = vpop.permute.xlu2 %2349 }
 0x501   :  { %v2362_v35 = vpop.permute.xlu1 %2361  ;;  %v2354_v19 = vpop.permute.xlu0 %2353 }
 0x505   :  { %v2294_v0 = vpop.f32.mrf.mxu3 }
 0x50a   :  { %v2334_v60 = vpop.permute.xlu1 %2333 }
 0x50b   :  { %v2275_v38 = vpop.f32.mrf.mxu2 }
 0x50c   :  { %v2276_v44 = vadd.f32 %v2275_v38, %v2225_v21 }
 0x50d   :  { %v2296_v42 = vpop.f32.mrf.mxu3 }
 0x50e   :  { %v2295_v20 = vadd.f32 %v2294_v0, %v2276_v44 }
 0x510   :  { %v2308_v47 = vmin.f32 %v2295_v20, 0.0  ;;  %vm2304_vm10 = vcmp.gt.f32.partialorder %v2295_v20, 0.0 }
 0x512   :  { %v2312_v48 = vmul.f32 1.442695, %v2308_v47 }
 0x513   :  { %v2277_v12 = vpop.f32.mrf.mxu2 }
 0x514   :  { %v2278_v5 = vadd.f32 %v2277_v12, %v2230_v55  ;;  %3312 = vpow2.f32 %v2312_v48  ;;  %v3391_v55 = vmov 19  }
 0x515   :  { %v2299_v18 = vpop.f32.mrf.mxu3  ;;  %3248 = vset.pattern.permute.xlu1 %v3391_v55 }
 0x516   :  { %v2297_v37 = vadd.f32 %v2296_v42, %v2278_v5 }
 0x518   :  { %v2309_v52 = vmin.f32 %v2297_v37, 0.0  ;;  %vm2305_vm14 = vcmp.gt.f32.partialorder %v2297_v37, 0.0 }
 0x51a   :  { %v3313_v62 = vpop.eup %3312  ;;  %v2314_v31 = vmul.f32 1.442695, %v2309_v52 }
 0x51b   :  { %v2280_v26 = vpop.f32.mrf.mxu2  ;;  %v2819_v56 = vadd.f32 -1.0, %v3313_v62  ;;  %v2893_v62 = vld [vmem:[#allocation2 + $0x4c] sm:$0xf0] }
 0x51c   :  { %3314 = vpow2.f32 %v2314_v31  ;;  %v2281_v24 = vadd.f32 %v2280_v26, %v2235_v63  ;;  %v3390_v63 = vmov 18  }
 0x51d   :  { %v2324_v28 = vsel %vm2304_vm10, %v2295_v20, %v2819_v56  ;;  %v2301_v45 = vpop.f32.mrf.mxu3  ;;  %3247 = vset.pattern.permute.xlu0 %v3390_v63  ;;  %3246 = vset.pattern.permute.xlu2 %v3390_v63 }
 0x51e   :  { %v2300_v3 = vadd.f32 %v2299_v18, %v2281_v24  ;;  %v2344_v16 = vmul.f32 %v2330_v27, %v2324_v28 }
 0x520   :  { %v2310_v7 = vmin.f32 %v2300_v3, 0.0  ;;  %v2364_v50 = vadd.f32 %v2350_v54, %v2344_v16  ;;  %vm2306_vm15 = vcmp.gt.f32.partialorder %v2300_v3, 0.0 }
 0x522   :  { %v3315_v4 = vpop.eup %3314  ;;  %v2316_v29 = vmul.f32 1.442695, %v2310_v7 }
 0x523   :  { %v2282_v13 = vpop.f32.mrf.mxu2  ;;  %v2820_v10 = vadd.f32 -1.0, %v3315_v4 }
 0x524   :  { %3316 = vpow2.f32 %v2316_v29  ;;  %v2283_v43 = vadd.f32 %v2282_v13, %v2240_v53 }
 0x525   :  { %v2325_v1 = vsel %vm2305_vm14, %v2297_v37, %v2820_v10 }
 0x526   :  { %v2302_v11 = vadd.f32 %v2301_v45, %v2283_v43  ;;  %v2345_v2 = vmul.f32 %v2334_v60, %v2325_v1 }
 0x528   :  { %v2311_v61 = vmin.f32 %v2302_v11, 0.0  ;;  %v2365_v34 = vadd.f32 %v2354_v19, %v2345_v2  ;;  %vm2307_vm9 = vcmp.gt.f32.partialorder %v2302_v11, 0.0 }
 0x52a   :  { %v3317_v9 = vpop.eup %3316  ;;  %v2318_v49 = vmul.f32 1.442695, %v2311_v61  ;;  %v3241_v58 = vpack.i.bf16 %v2365_v34, %v2364_v50  ;;  %v2408_v30 = vpack.c.bf16 %v2365_v34, %v2364_v50 }
 0x52b   :  { %v2821_v22 = vadd.f32 -1.0, %v3317_v9  ;;  %v2505_v9 = vld [vmem:[%s4919_s2] sm:$0x1] }
 0x52c   :  { %3318 = vpow2.f32 %v2318_v49  ;;  %3232 = vrot.lane.b32.xlu2 %v3241_v58, %s3377_s10  ;;  %v3393_v49 = vmov 21  }
 0x52d   :  { %v2326_v23 = vsel %vm2306_vm15, %v2300_v3, %v2821_v22 }
 0x52e   :  { %v2346_v8 = vmul.f32 %v2338_v33, %v2326_v23 }
 0x530   :  { %v2366_v36 = vadd.f32 %v2358_v46, %v2346_v8 }
 0x532   :  { %v3319_v40 = vpop.eup %3318 }
 0x533   :  { %v2822_v51 = vadd.f32 -1.0, %v3319_v40 }
 0x534   :  { %2416 = vperm.xlu2 %3246, %v4853_v59  }
 0x535   :  { %v2327_v15 = vsel %vm2307_vm9, %v2302_v11, %v2822_v51 }
 0x536   :  { %v2347_v6 = vmul.f32 %v2342_v17, %v2327_v15  ;;  %v3392_v17 = vmov 20  }
 0x538   :  { %v2367_v32 = vadd.f32 %v2362_v35, %v2347_v6  ;;  %v3394_v6 = vmov 0.0|0.0  }
 0x53a   :  { %v3226_v39 = vpack.i.bf16 %v2367_v32, %v2366_v36  ;;  %v2409_v57 = vpack.c.bf16 %v2367_v32, %v2366_v36  ;;  %v2499_v36 = vld [vmem:[#allocation2 + $0x28] sm:$0x1] }
 0x53c   :  { %3227 = vrot.lane.b32.xlu1 %v3226_v39, %s3377_s10  ;;  %3237 = vrot.lane.b32.xlu0 %v3226_v39, %s3382_s26 }
 0x53d   :  { %3249 = vset.pattern.permute.xlu2 %v3391_v55 }
 0x53e   :  { %2463 = vperm.xlu2 %3249, %v4872_v41  }
 0x544   :  { %3242 = vrot.lane.b32.xlu1 %v3241_v58, %s3382_s26  ;;  %2421 = vperm.xlu0 %3247, %v4872_v41  }
 0x546   :  { %3251 = vset.pattern.permute.xlu2 %v3392_v17 }
 0x547   :  { %2473 = vperm.xlu2 %3251, %v4872_v41  }
 0x54c   :  { %2459 = vperm.xlu1 %3248, %v4853_v59   ;;  %3263 = vset.pattern.permute.xlu0 %v3393_v49 }
 0x54f   :  { %3262 = vset.pattern.permute.xlu2 %v3393_v49 }
 0x550   :  { %2508 = vperm.xlu2 %3262, %v2505_v9  }
 0x554   :  { %3250 = vset.pattern.permute.xlu1 %v3392_v17 }
 0x555   :  { %2469 = vperm.xlu1 %3250, %v4853_v59   ;;  %v2825_v59 = vld [vmem:[#allocation2 + $0x24] sm:$0xf] }
 0x556   :  { %v2826_v27 = vor.u32 %v2893_v62, %v2825_v59 }
 0x586   :  { %v3233_v0 = vpop.permute.xlu2 %3232 }
 0x587   :  { %v3235_v20 = vunpack.i.h.bf16 %v3233_v0  ;;  %v3234_v33 = vunpack.i.l.bf16 %v3233_v0 }
 0x589   :  { %v2835_v53 = vpack.c.bf16 %v3235_v20, %v3234_v33 }
 0x58e   :  { %v2417_v46 = vpop.permute.xlu2 %2416 }
 0x598   :  { %v2464_v60 = vpop.permute.xlu2 %2463 }
 0x5a1   :  { %v2474_v19 = vpop.permute.xlu2 %2473 }
 0x5aa   :  { %v2509_v32 = vpop.permute.xlu2 %2508 }
 0x5ae   :  { %v3228_v21 = vpop.permute.xlu1 %3227  ;;  %v3238_v42 = vpop.permute.xlu0 %3237 }
 0x5af   :  { %v3230_v38 = vunpack.i.h.bf16 %v3228_v21  ;;  %v3229_v44 = vunpack.i.l.bf16 %v3228_v21  ;;  %v3240_v48 = vunpack.i.h.bf16 %v3238_v42  ;;  %v3239_v12 = vunpack.i.l.bf16 %v3238_v42 }
 0x5b1   :  { %v2830_v47 = vpack.c.bf16 %v3230_v38, %v3229_v44  ;;  %v2838_v37 = vpack.c.bf16 %v3240_v48, %v3239_v12 }
 0x5b3   :  { %2831 = vmatpush.bf16.msk.msrb.mxu2 %vm4178_vm1, %v2830_v47 }
 0x5b6   :  { %v3243_v5 = vpop.permute.xlu1 %3242  ;;  %v2422_v56 = vpop.permute.xlu0 %2421 }
 0x5b7   :  { %2836 = vmatpush.bf16.msk.msrb.mxu2 %vm4178_vm1, %v2835_v53  ;;  %v3245_v52 = vunpack.i.h.bf16 %v3243_v5  ;;  %v3244_v35 = vunpack.i.l.bf16 %v3243_v5 }
 0x5b9   :  { %v2841_v31 = vpack.c.bf16 %v3245_v52, %v3244_v35 }
 0x5bb   :  { %2436 = vmatpush.bf16.msrb.mxu2 %v2409_v57 }
 0x5be   :  { %v2460_v13 = vpop.permute.xlu1 %2459 }
 0x5bf   :  { %2437 = vmatpush.bf16.msrb.mxu2 %v2408_v30 }
 0x5c3   :  { %2839 = vmatpush.bf16.msk.msrb.mxu2 %vm4733_vm13, %v2838_v37 }
 0x5c7   :  { %2842 = vmatpush.bf16.msk.msrb.mxu2 %vm4733_vm13, %v2841_v31  ;;  %v2470_v1 = vpop.permute.xlu1 %2469 }
 0x5ca   :  { %2843 = vmatmul.msk.bf16.vlgmr.msrb.gmra.mxu2 %vm1911_vm7, %v2826_v27 }
 0x64d   :  { %v2441_v26 = vpop.f32.mrf.mxu2 }
 0x64e   :  { %v2442_v18 = vadd.f32 %v2441_v26, %v2417_v46 }
 0x650   :  { %v2448_v24 = vmin.f32 %v2442_v18, 0.0  ;;  %vm2446_vm2 = vcmp.gt.f32.partialorder %v2442_v18, 0.0 }
 0x652   :  { %v2450_v41 = vmul.f32 1.442695, %v2448_v24 }
 0x654   :  { %3320 = vpow2.f32 %v2450_v41 }
 0x655   :  { %v2443_v3 = vpop.f32.mrf.mxu2 }
 0x656   :  { %v2444_v7 = vadd.f32 %v2443_v3, %v2422_v56 }
 0x658   :  { %v2449_v28 = vmin.f32 %v2444_v7, 0.0  ;;  %vm2447_vm3 = vcmp.gt.f32.partialorder %v2444_v7, 0.0 }
 0x65a   :  { %v3321_v4 = vpop.eup %3320  ;;  %v2452_v29 = vmul.f32 1.442695, %v2449_v28 }
 0x65b   :  { %v2844_v10 = vadd.f32 -1.0, %v3321_v4 }
 0x65c   :  { %3322 = vpow2.f32 %v2452_v29 }
 0x65d   :  { %v2456_v14 = vsel %vm2446_vm2, %v2442_v18, %v2844_v10 }
 0x65e   :  { %v2466_v54 = vmul.f32 %v2460_v13, %v2456_v14 }
 0x660   :  { %v2476_v2 = vadd.f32 %v2470_v1, %v2466_v54 }
 0x662   :  { %v3323_v16 = vpop.eup %3322 }
 0x663   :  { %v2845_v43 = vadd.f32 -1.0, %v3323_v16 }
 0x665   :  { %v2457_v45 = vsel %vm2447_vm3, %v2444_v7, %v2845_v43 }
 0x666   :  { %v2467_v11 = vmul.f32 %v2464_v60, %v2457_v45 }
 0x668   :  { %v2477_v61 = vadd.f32 %v2474_v19, %v2467_v11 }
 0x66a   :  { %v3257_v50 = vpack.i.bf16 %v2477_v61, %v2476_v2  ;;  %v2857_v34 = vpack.c.bf16 %v2477_v61, %v2476_v2 }
 0x66c   :  { %3253 = vrot.lane.b32.xlu0 %v3257_v50, %s3378_s11  ;;  %3258 = vrot.lane.b32.xlu1 %v3257_v50, %s3377_s10 }
 0x6de   :  { %v3254_v58 = vpop.permute.xlu0 %3253  ;;  %v3259_v22 = vpop.permute.xlu1 %3258 }
 0x6df   :  { %v3256_v23 = vunpack.i.h.bf16 %v3254_v58  ;;  %v3255_v40 = vunpack.i.l.bf16 %v3254_v58  ;;  %v3261_v51 = vunpack.i.h.bf16 %v3259_v22  ;;  %v3260_v8 = vunpack.i.l.bf16 %v3259_v22 }
 0x6e1   :  { %v2504_v30 = vpack.c.bf16 %v3256_v23, %v3255_v40  ;;  %v2854_v15 = vpack.c.bf16 %v3261_v51, %v3260_v8 }
 0x6e3   :  { %2850 = vmatpush.bf16.msk.msrb.mxu3 %vm2848_vm5, %v2504_v30  ;;  %2532 = vmatpush.bf16.msra.mxu2 %v2504_v30 }
 0x6e7   :  { %2855 = vmatpush.bf16.msk.msrb.mxu3 %vm4178_vm1, %v2854_v15  ;;  %2533 = vmatpush.bf16.msra.mxu2 %v3394_v6 }
 0x6eb   :  { %2858 = vmatpush.bf16.msk.msrb.mxu3 %vm2856_vm12, %v2857_v34  ;;  %2534 = vmatpush.bf16.msra.mxu2 %v3394_v6 }
 0x6ee   :  { %2859 = vmatmul.msk.bf16.vlgmr.msrb.gmra.mxu3 %vm1172_vm0, %v2499_v36  ;;  %2860 = vmatmul.msk.bf16.vlgmr.msra.gmra.mxu2 %vm1172_vm0, %v2499_v36 }
 0x771   :  { %v2523_v39 = vpop.f32.mrf.mxu3  ;;  %v2536_v57 = vpop.f32.mrf.mxu2 }
 0x772   :  { %v2524_v63 = vadd.f32 %v2523_v39, %v2509_v32  ;;  %v2537_v55 = vadd.f32 %v2536_v57, %v2509_v32 }
 0x774   :  { %2547 = vrot.lane.b32.xlu1 %v2537_v55, %s3382_s26  ;;  %2541 = vrot.lane.b32.xlu0 %v2524_v63, %s3382_s26 }
 0x779   :  { %v2525_v25 = vpop.f32.mrf.mxu3  ;;  %v2538_v0 = vpop.f32.mrf.mxu2 }
 0x7e6   :  { %v2548_v21 = vpop.permute.xlu1 %2547  ;;  %v2542_v38 = vpop.permute.xlu0 %2541 }
 0x7e7   :  { %v2550_v44 = vadd.f32 %v2548_v21, %v2524_v63  ;;  %v2544_v20 = vadd.f32 %v2542_v38, %v2524_v63 }
 0x7e9   :  { %v2551_v33 = vmul.f32 0.5, %v2550_v44  ;;  %v2545_v47 = vmul.f32 0.5, %v2544_v20 }
 0x7eb   :  { %v2565_v17 = vsel %vm2478_vm6, %v2545_v47, %v2551_v33 }
 0x7ec   :  { %3324 = vtanh.f32 %v2565_v17 }
 0x7f2   :  { %v3325_v53 = vpop.eup %3324 }
 0x7f3   :  { %2567 = vst [vmem:[%s4920_s3] sm:$0x1] %v3325_v53 }
 0x7f4   :  { %2572 = vsyncpa [#allocation3], 1 }

</bundles_post_ra>
